<compile_context>
chip_gen: v7x
topology: tpu7x:2x2x1
jax: 0.10.0
libtpu: 0.0.40
codegen_flags: <defaults>
</compile_context>

<pallas_src>
from functools import partial
import math

import jax
import jax.numpy as jnp
from jax.experimental import pallas as pl
from jax.experimental.pallas import tpu as pltpu

HIDDEN = 750      # logical hidden size fixed by the reference module
HP = 768          # zero-padded hidden: 6 x 128 lanes
SA_PAD = 128      # padded [state|action] lane group
X_W = 2 * SA_PAD  # packed batch-input slab width ([sa | noise])
OUT_W = 128       # packed output slab width
OFF_U = 32        # u    lives at output lanes [32, 32+action_dim)
OFF_STD = 64      # std  lives at output lanes [64, 64+latent_dim); mean at [0, latent_dim)


def _round_up(x, m):
    return (x + m - 1) // m * m


def _cdiv(a, b):
    return -(-a // b)


# --------------------------------------------------------------------------
# Kernel
# --------------------------------------------------------------------------
def vae_forward_kernel(x_ref, win_ref, wbig_ref, whead_ref, bias_ref, out_ref,
                       *, max_action, latent_dim):
    f32, bf16 = jnp.float32, jnp.bfloat16
    L = latent_dim

    x = x_ref[...]                                  # [TB, 256] f32
    sa = x[:, :SA_PAD].astype(bf16)                 # [state | action | 0]
    noise = x[:, SA_PAD:]                           # noise at lanes [0, L), else 0

    b1, b2 = bias_ref[0:1, :], bias_ref[1:2, :]
    bd1, bd2 = bias_ref[2:3, :], bias_ref[3:4, :]
    bhead = bias_ref[4:5, :OUT_W]                   # bm at [0,L), bs at [64,64+L)
    bd3 = bias_ref[5:6, :OUT_W]                     # bd3 at [32, 32+A)
    s2, sd2 = bias_ref[6:7, :], bias_ref[7:8, :]    # int8 dequant scales (per out col)

    # ---- encoder e1 + decoder-d1 state contribution: one fused K=128 matmul ----
    fused = jnp.dot(sa, win_ref[:, :2 * HP], preferred_element_type=f32)   # [TB, 2*HP]
    h = jnp.maximum(fused[:, :HP] + b1, 0.0).astype(bf16)                  # relu(e1)
    d1_state = fused[:, HP:]                                               # pre-bias d1 state part

    # ---- e2 (int8 weights; scale applied after the f32-accumulated dot) ----
    w2 = wbig_ref[:, :HP].astype(f32).astype(bf16)          # exact: |q| <= 127
    h = jnp.dot(h, w2, preferred_element_type=f32) * s2 + b2
    h = jnp.maximum(h, 0.0).astype(bf16)                    # relu(e2)

    # ---- fused mean / log_std head: mean -> lanes [0,L), log_std -> [64,64+L) ----
    head = jnp.dot(h, whead_ref[:, :OUT_W], preferred_element_type=f32) + bhead
    std_full = jnp.exp(jnp.clip(head, -4.0, 15.0))          # std at [64, 64+L)
    # Half-rotation aligns std with mean/noise at lanes [0,L); shift 64 on a 128-lane
    # axis is its own inverse, so the rotation direction is irrelevant.
    std_swap = pltpu.roll(std_full, shift=OFF_STD, axis=1)

    # ---- reparameterize: z = mean + std * noise (valid at lanes [0,L); junk lanes
    # hit exactly-zero rows of the d1 z-weight block, so they contribute nothing) ----
    z = (head + std_swap * noise).astype(bf16)

    # ---- decoder d1 = precomputed state part + z part ----
    a = d1_state + jnp.dot(z, win_ref[:, 2 * HP:], preferred_element_type=f32) + bd1
    a = jnp.maximum(a, 0.0).astype(bf16)

    # ---- d2 (int8) ----
    wd2 = wbig_ref[:, HP:].astype(f32).astype(bf16)
    a = jnp.dot(a, wd2, preferred_element_type=f32) * sd2 + bd2
    a = jnp.maximum(a, 0.0).astype(bf16)

    # ---- d3: action columns land directly at output lanes [OFF_U, OFF_U+A) ----
    u = max_action * jnp.tanh(
        jnp.dot(a, whead_ref[:, OUT_W:], preferred_element_type=f32) + bd3)

    # ---- assemble the single lane-dense output slab: [mean | u | std] ----
    lane = jax.lax.broadcasted_iota(jnp.int32, head.shape, 1)
    mean_out = jnp.where(lane < OFF_STD, head, 0.0)                           # mean @ [0,L)
    std_out = jnp.where((lane >= OFF_STD) & (lane < OFF_STD + L), std_full, 0.0)
    out_ref[...] = u + mean_out + std_out


# --------------------------------------------------------------------------
# Parameter init (PyTorch default nn.Linear init) + packing into lane-dense slabs
# --------------------------------------------------------------------------
def _init_linear(key, in_dim, out_dim):
    kw, kb = jax.random.split(key)
    bound = 1.0 / math.sqrt(in_dim)
    w = jax.random.uniform(kw, (in_dim, out_dim), jnp.float32, -bound, bound)
    b = jax.random.uniform(kb, (out_dim,), jnp.float32, -bound, bound)
    return w, b


def _quantize_per_col(w):
    """Symmetric int8 quantization with one scale per output column."""
    amax = jnp.max(jnp.abs(w), axis=0, keepdims=True)
    scale = jnp.where(amax > 0, amax / 127.0, jnp.float32(1.0))
    q = jnp.clip(jnp.round(w / scale), -127, 127).astype(jnp.int8)
    return q, scale[0]


def init_vae_params(key, state_dim, action_dim, latent_dim):
    """Returns (packed kernel params, logical reference weights).

    The reference weights already carry the kernel's weight-storage rounding
    (bf16 for the small matrices, int8 + per-column scale for e2/d2), so the
    pure-JAX reference and the Pallas kernel compute the same function (only
    bf16 MXU operand rounding differs)."""
    H = HIDDEN
    SA = state_dim + action_dim
    assert SA <= SA_PAD and action_dim <= 32 and latent_dim <= 32

    ks = jax.random.split(key, 7)
    w1, b1 = _init_linear(ks[0], SA, H)                       # e1
    w2, b2 = _init_linear(ks[1], H, H)                        # e2
    wm, bm = _init_linear(ks[2], H, latent_dim)               # mean head
    ws, bs = _init_linear(ks[3], H, latent_dim)               # log_std head
    wd1, bd1 = _init_linear(ks[4], state_dim + latent_dim, H)  # d1
    wd2, bd2 = _init_linear(ks[5], H, H)                      # d2
    wd3, bd3 = _init_linear(ks[6], H, action_dim)             # d3

    f32, bf16 = jnp.float32, jnp.bfloat16
    rnd = lambda w: w.astype(bf16).astype(f32)                # bf16 storage rounding

    # int8 quantization of the two 768x768 matrices (~98% of weight bytes)
    q2, s2 = _quantize_per_col(w2)
    qd2, sd2 = _quantize_per_col(wd2)

    # ---- w_in: [128, 3*HP] bf16 = [ e1 | d1(state part) | d1(z part) ] ----
    w_in = jnp.zeros((SA_PAD, 3 * HP), f32)
    w_in = w_in.at[:SA, 0:H].set(w1)
    w_in = w_in.at[:state_dim, HP:HP + H].set(wd1[:state_dim])
    w_in = w_in.at[:latent_dim, 2 * HP:2 * HP + H].set(wd1[state_dim:])
    w_in = w_in.astype(bf16)

    # ---- w_big: [HP, 2*HP] int8 = [ e2 | d2 ] ----
    w_big = jnp.zeros((HP, 2 * HP), jnp.int8)
    w_big = w_big.at[:H, 0:H].set(q2)
    w_big = w_big.at[:H, HP:HP + H].set(qd2)

    # ---- w_heads: [HP, 2*OUT_W] bf16 = [ mean/log_std head | d3 ] ----
    w_heads = jnp.zeros((HP, 2 * OUT_W), f32)
    w_heads = w_heads.at[:H, 0:latent_dim].set(wm)
    w_heads = w_heads.at[:H, OFF_STD:OFF_STD + latent_dim].set(ws)
    w_heads = w_heads.at[:H, OUT_W + OFF_U:OUT_W + OFF_U + action_dim].set(wd3)
    w_heads = w_heads.astype(bf16)

    # ---- bias / dequant-scale slab: [8, HP] f32 ----
    bias = jnp.zeros((8, HP), f32)
    bias = bias.at[0, :H].set(b1)
    bias = bias.at[1, :H].set(b2)
    bias = bias.at[2, :H].set(bd1)
    bias = bias.at[3, :H].set(bd2)
    bias = bias.at[4, 0:latent_dim].set(bm)
    bias = bias.at[4, OFF_STD:OFF_STD + latent_dim].set(bs)
    bias = bias.at[5, OFF_U:OFF_U + action_dim].set(bd3)
    bias = bias.at[6, :].set(1.0)            # padded columns: scale 1 (q is 0 there)
    bias = bias.at[7, :].set(1.0)
    bias = bias.at[6, :H].set(s2)
    bias = bias.at[7, :H].set(sd2)

    packed = dict(w_in=w_in, w_big=w_big, w_heads=w_heads, bias=bias)
    ref = dict(w1=rnd(w1), b1=b1, w2=q2.astype(f32) * s2, b2=b2,
               wm=rnd(wm), bm=bm, ws=rnd(ws), bs=bs,
               wd1=rnd(wd1), bd1=bd1, wd2=qd2.astype(f32) * sd2, bd2=bd2,
               wd3=rnd(wd3), bd3=bd3)
    return packed, ref


# --------------------------------------------------------------------------
# Wrapper
# --------------------------------------------------------------------------
def vae_forward(params, state, action, noise, max_action, *, batch_tile=256):
    B, state_dim = state.shape
    action_dim = action.shape[1]
    latent_dim = noise.shape[1]
    assert state_dim + action_dim <= SA_PAD
    assert action_dim <= 32 and latent_dim <= 32

    # Batch tiling: single tile (single TensorCore, no duplicated weight stream)
    # until B > batch_tile; batch padding only to a multiple of 8.
    nt = _cdiv(B, batch_tile)
    TB = _round_up(_cdiv(B, nt), 8)
    nb = _cdiv(B, TB)
    Bp = nb * TB

    # One packed batch-input slab: [state | action | 0.. | noise | 0..]
    x = jnp.zeros((Bp, X_W), jnp.float32)
    x = x.at[:B, :state_dim].set(state)
    x = x.at[:B, state_dim:state_dim + action_dim].set(action)
    x = x.at[:B, SA_PAD:SA_PAD + latent_dim].set(noise)

    w_in, w_big = params["w_in"], params["w_big"]
    w_heads, bias = params["w_heads"], params["bias"]

    def resident(arr):
        # Constant index map -> block never changes -> fetched once, stays in VMEM.
        return pl.BlockSpec(arr.shape, lambda i: (0, 0))

    flops = 2 * Bp * (SA_PAD * 2 * HP + HP * HP + HP * OUT_W
                      + SA_PAD * HP + HP * HP + HP * OUT_W)
    bytes_accessed = (x.size * 4 + w_in.size * 2 + w_big.size * 1
                      + w_heads.size * 2 + bias.size * 4 + Bp * OUT_W * 4)
    cost = pl.CostEstimate(flops=int(flops),
                           transcendentals=int(Bp * 2 * OUT_W),
                           bytes_accessed=int(bytes_accessed))

    out = pl.pallas_call(
        partial(vae_forward_kernel, max_action=float(max_action),
                latent_dim=latent_dim),
        out_shape=jax.ShapeDtypeStruct((Bp, OUT_W), jnp.float32),
        grid=(nb,),
        in_specs=[pl.BlockSpec((TB, X_W), lambda i: (i, 0)),
                  resident(w_in), resident(w_big), resident(w_heads),
                  resident(bias)],
        out_specs=pl.BlockSpec((TB, OUT_W), lambda i: (i, 0)),
        compiler_params=pltpu.CompilerParams(
            dimension_semantics=("parallel",),
            vmem_limit_bytes=32 << 20),
        cost_estimate=cost,
    )(x, w_in, w_big, w_heads, bias)

    u = out[:B, OFF_U:OFF_U + action_dim]
    mean = out[:B, 0:latent_dim]
    std = out[:B, OFF_STD:OFF_STD + latent_dim]
    return u, mean, std


# --------------------------------------------------------------------------
# Pure-JAX reference of the PyTorch forward (same stored weights as the kernel)
# --------------------------------------------------------------------------
def vae_forward_ref(ref, state, action, noise, max_action):
    hi = jax.lax.Precision.HIGHEST
    mm = lambda a, b: jnp.dot(a, b, precision=hi)
    h = jax.nn.relu(mm(jnp.concatenate([state, action], 1), ref["w1"]) + ref["b1"])
    h = jax.nn.relu(mm(h, ref["w2"]) + ref["b2"])
    mean = mm(h, ref["wm"]) + ref["bm"]
    log_std = jnp.clip(mm(h, ref["ws"]) + ref["bs"], -4.0, 15.0)
    std = jnp.exp(log_std)
    z = mean + std * noise
    a = jax.nn.relu(mm(jnp.concatenate([state, z], 1), ref["wd1"]) + ref["bd1"])
    a = jax.nn.relu(mm(a, ref["wd2"]) + ref["bd2"])
    u = max_action * jnp.tanh(mm(a, ref["wd3"]) + ref["bd3"])
    return u, mean, std


if __name__ == "__main__":
    state_dim, action_dim, latent_dim = 16, 8, 4
    max_action = 1.0
    batch = 8

    key = jax.random.PRNGKey(0)
    k_params, k_state, k_action, k_noise = jax.random.split(key, 4)

    params, ref_weights = init_vae_params(k_params, state_dim, action_dim, latent_dim)
    state = jax.random.normal(k_state, (batch, state_dim), jnp.float32)
    action = jax.random.normal(k_action, (batch, action_dim), jnp.float32)
    # The torch module draws np.random.normal noise internally; pass it in instead
    # (deterministic, host-generated).
    noise = jax.random.normal(k_noise, (batch, latent_dim), jnp.float32)

    u, mean, std = jax.block_until_ready(
        vae_forward(params, state, action, noise, max_action))

    u_ref, mean_ref, std_ref = vae_forward_ref(ref_weights, state, action, noise,
                                               max_action)
    assert u.shape == (batch, action_dim)
    assert mean.shape == (batch, latent_dim) and std.shape == (batch, latent_dim)
    # bf16 MXU operands with f32 accumulate vs f32 reference -> ~1e-2 scale differences
    assert jnp.allclose(u, u_ref, atol=2e-2, rtol=2e-2), float(jnp.max(jnp.abs(u - u_ref)))
    assert jnp.allclose(mean, mean_ref, atol=2e-2, rtol=2e-2), float(jnp.max(jnp.abs(mean - mean_ref)))
    assert jnp.allclose(std, std_ref, atol=2e-2, rtol=2e-2), float(jnp.max(jnp.abs(std - std_ref)))

    print("KERNEL_OK")
</pallas_src>

<mosaic_0001>
module attributes {stable_mosaic.version = 11 : i64} {
  func.func @vae_forward_kernel(%arg0: i32, %arg1: memref<8x256xf32, #tpu.memory_space<vmem>>, %arg2: memref<128x2304xbf16, #tpu.memory_space<vmem>>, %arg3: memref<768x1536xi8, #tpu.memory_space<vmem>>, %arg4: memref<768x256xbf16, #tpu.memory_space<vmem>>, %arg5: memref<8x768xf32, #tpu.memory_space<vmem>>, %arg6: memref<8x128xf32, #tpu.memory_space<vmem>>) attributes {dimension_semantics = [#tpu.dimension_semantics<parallel>], iteration_bounds = array<i64: 1>, scalar_prefetch = 0 : i64, scratch_operands = 0 : i64, tpu.core_type = #tpu.core_type<tc>, window_params = [{transform_indices = @transform_0, window_bounds = array<i64: 8, 256>}, {pipeline_mode = #tpu.pipeline_mode<synchronous>, transform_indices = @transform_1, window_bounds = array<i64: 128, 2304>}, {pipeline_mode = #tpu.pipeline_mode<synchronous>, transform_indices = @transform_2, window_bounds = array<i64: 768, 1536>}, {pipeline_mode = #tpu.pipeline_mode<synchronous>, transform_indices = @transform_3, window_bounds = array<i64: 768, 256>}, {pipeline_mode = #tpu.pipeline_mode<synchronous>, transform_indices = @transform_4, window_bounds = array<i64: 8, 768>}, {transform_indices = @transform_5, window_bounds = array<i64: 8, 128>}]} {
    %c0 = arith.constant 0 : index
    %c0_0 = arith.constant 0 : index
    %0 = vector.load %arg1[%c0, %c0_0] : memref<8x256xf32, #tpu.memory_space<vmem>>, vector<8x256xf32>
    %1 = vector.extract_strided_slice %0 {offsets = [0, 0], sizes = [8, 128], strides = [1, 1]} : vector<8x256xf32> to vector<8x128xf32>
    %2 = arith.truncf %1 : vector<8x128xf32> to vector<8x128xbf16>
    %3 = vector.extract_strided_slice %0 {offsets = [0, 128], sizes = [8, 128], strides = [1, 1]} : vector<8x256xf32> to vector<8x128xf32>
    %c0_1 = arith.constant 0 : index
    %c0_2 = arith.constant 0 : index
    %4 = vector.load %arg5[%c0_1, %c0_2] : memref<8x768xf32, #tpu.memory_space<vmem>>, vector<1x768xf32>
    %c1 = arith.constant 1 : index
    %c0_3 = arith.constant 0 : index
    %5 = vector.load %arg5[%c1, %c0_3] : memref<8x768xf32, #tpu.memory_space<vmem>>, vector<1x768xf32>
    %c2 = arith.constant 2 : index
    %c0_4 = arith.constant 0 : index
    %6 = vector.load %arg5[%c2, %c0_4] : memref<8x768xf32, #tpu.memory_space<vmem>>, vector<1x768xf32>
    %c3 = arith.constant 3 : index
    %c0_5 = arith.constant 0 : index
    %7 = vector.load %arg5[%c3, %c0_5] : memref<8x768xf32, #tpu.memory_space<vmem>>, vector<1x768xf32>
    %c4 = arith.constant 4 : index
    %c0_6 = arith.constant 0 : index
    %8 = vector.load %arg5[%c4, %c0_6] : memref<8x768xf32, #tpu.memory_space<vmem>>, vector<1x128xf32>
    %c5 = arith.constant 5 : index
    %c0_7 = arith.constant 0 : index
    %9 = vector.load %arg5[%c5, %c0_7] : memref<8x768xf32, #tpu.memory_space<vmem>>, vector<1x128xf32>
    %c6 = arith.constant 6 : index
    %c0_8 = arith.constant 0 : index
    %10 = vector.load %arg5[%c6, %c0_8] : memref<8x768xf32, #tpu.memory_space<vmem>>, vector<1x768xf32>
    %c7 = arith.constant 7 : index
    %c0_9 = arith.constant 0 : index
    %11 = vector.load %arg5[%c7, %c0_9] : memref<8x768xf32, #tpu.memory_space<vmem>>, vector<1x768xf32>
    %c0_10 = arith.constant 0 : index
    %c0_11 = arith.constant 0 : index
    %12 = vector.load %arg2[%c0_10, %c0_11] : memref<128x2304xbf16, #tpu.memory_space<vmem>>, vector<128x1536xbf16>
    %cst = arith.constant dense<0.000000e+00> : vector<8x1536xf32>
    %13 = tpu.matmul %2, %12, %cst {dimension_numbers = #tpu.dot_dimension_numbers<[1], [0], [0], [1], [0, 0, 1, 1], [], []>} : vector<8x128xbf16>, vector<128x1536xbf16>, vector<8x1536xf32> -> vector<8x1536xf32>
    %14 = vector.extract_strided_slice %13 {offsets = [0, 0], sizes = [8, 768], strides = [1, 1]} : vector<8x1536xf32> to vector<8x768xf32>
    %15 = vector.broadcast %4 : vector<1x768xf32> to vector<8x768xf32>
    %16 = arith.addf %14, %15 : vector<8x768xf32>
    %cst_12 = arith.constant 0.000000e+00 : f32
    %17 = vector.broadcast %cst_12 : f32 to vector<8x768xf32>
    %18 = arith.maximumf %16, %17 : vector<8x768xf32>
    %19 = arith.truncf %18 : vector<8x768xf32> to vector<8x768xbf16>
    %20 = vector.extract_strided_slice %13 {offsets = [0, 768], sizes = [8, 768], strides = [1, 1]} : vector<8x1536xf32> to vector<8x768xf32>
    %c0_13 = arith.constant 0 : index
    %c0_14 = arith.constant 0 : index
    %21 = vector.load %arg3[%c0_13, %c0_14] : memref<768x1536xi8, #tpu.memory_space<vmem>>, vector<768x768xi8>
    %22 = arith.sitofp %21 : vector<768x768xi8> to vector<768x768xf32>
    %23 = arith.truncf %22 : vector<768x768xf32> to vector<768x768xbf16>
    %cst_15 = arith.constant dense<0.000000e+00> : vector<8x768xf32>
    %24 = tpu.matmul %19, %23, %cst_15 {dimension_numbers = #tpu.dot_dimension_numbers<[1], [0], [0], [1], [0, 0, 1, 1], [], []>} : vector<8x768xbf16>, vector<768x768xbf16>, vector<8x768xf32> -> vector<8x768xf32>
    %25 = vector.broadcast %10 : vector<1x768xf32> to vector<8x768xf32>
    %26 = arith.mulf %24, %25 : vector<8x768xf32>
    %27 = vector.broadcast %5 : vector<1x768xf32> to vector<8x768xf32>
    %28 = arith.addf %26, %27 : vector<8x768xf32>
    %cst_16 = arith.constant 0.000000e+00 : f32
    %29 = vector.broadcast %cst_16 : f32 to vector<8x768xf32>
    %30 = arith.maximumf %28, %29 : vector<8x768xf32>
    %31 = arith.truncf %30 : vector<8x768xf32> to vector<8x768xbf16>
    %c0_17 = arith.constant 0 : index
    %c0_18 = arith.constant 0 : index
    %32 = vector.load %arg4[%c0_17, %c0_18] : memref<768x256xbf16, #tpu.memory_space<vmem>>, vector<768x128xbf16>
    %cst_19 = arith.constant dense<0.000000e+00> : vector<8x128xf32>
    %33 = tpu.matmul %31, %32, %cst_19 {dimension_numbers = #tpu.dot_dimension_numbers<[1], [0], [0], [1], [0, 0, 1, 1], [], []>} : vector<8x768xbf16>, vector<768x128xbf16>, vector<8x128xf32> -> vector<8x128xf32>
    %34 = vector.broadcast %8 : vector<1x128xf32> to vector<8x128xf32>
    %35 = arith.addf %33, %34 : vector<8x128xf32>
    %cst_20 = arith.constant -4.000000e+00 : f32
    %cst_21 = arith.constant 1.500000e+01 : f32
    %36 = vector.broadcast %cst_20 : f32 to vector<8x128xf32>
    %37 = arith.maximumf %36, %35 : vector<8x128xf32>
    %38 = vector.broadcast %cst_21 : f32 to vector<8x128xf32>
    %39 = arith.minimumf %38, %37 : vector<8x128xf32>
    %40 = math.exp %39 : vector<8x128xf32>
    %c64_i32 = arith.constant 64 : i32
    %41 = tpu.dynamic_rotate %40 by %c64_i32 dim 1 : vector<8x128xf32>, i32 -> vector<8x128xf32>
    %42 = arith.mulf %41, %3 : vector<8x128xf32>
    %43 = arith.addf %35, %42 : vector<8x128xf32>
    %44 = arith.truncf %43 : vector<8x128xf32> to vector<8x128xbf16>
    %c0_22 = arith.constant 0 : index
    %c1536 = arith.constant 1536 : index
    %45 = vector.load %arg2[%c0_22, %c1536] : memref<128x2304xbf16, #tpu.memory_space<vmem>>, vector<128x768xbf16>
    %cst_23 = arith.constant dense<0.000000e+00> : vector<8x768xf32>
    %46 = tpu.matmul %44, %45, %cst_23 {dimension_numbers = #tpu.dot_dimension_numbers<[1], [0], [0], [1], [0, 0, 1, 1], [], []>} : vector<8x128xbf16>, vector<128x768xbf16>, vector<8x768xf32> -> vector<8x768xf32>
    %47 = arith.addf %20, %46 : vector<8x768xf32>
    %48 = vector.broadcast %6 : vector<1x768xf32> to vector<8x768xf32>
    %49 = arith.addf %47, %48 : vector<8x768xf32>
    %cst_24 = arith.constant 0.000000e+00 : f32
    %50 = vector.broadcast %cst_24 : f32 to vector<8x768xf32>
    %51 = arith.maximumf %49, %50 : vector<8x768xf32>
    %52 = arith.truncf %51 : vector<8x768xf32> to vector<8x768xbf16>
    %c0_25 = arith.constant 0 : index
    %c768 = arith.constant 768 : index
    %53 = vector.load %arg3[%c0_25, %c768] : memref<768x1536xi8, #tpu.memory_space<vmem>>, vector<768x768xi8>
    %54 = arith.sitofp %53 : vector<768x768xi8> to vector<768x768xf32>
    %55 = arith.truncf %54 : vector<768x768xf32> to vector<768x768xbf16>
    %cst_26 = arith.constant dense<0.000000e+00> : vector<8x768xf32>
    %56 = tpu.matmul %52, %55, %cst_26 {dimension_numbers = #tpu.dot_dimension_numbers<[1], [0], [0], [1], [0, 0, 1, 1], [], []>} : vector<8x768xbf16>, vector<768x768xbf16>, vector<8x768xf32> -> vector<8x768xf32>
    %57 = vector.broadcast %11 : vector<1x768xf32> to vector<8x768xf32>
    %58 = arith.mulf %56, %57 : vector<8x768xf32>
    %59 = vector.broadcast %7 : vector<1x768xf32> to vector<8x768xf32>
    %60 = arith.addf %58, %59 : vector<8x768xf32>
    %cst_27 = arith.constant 0.000000e+00 : f32
    %61 = vector.broadcast %cst_27 : f32 to vector<8x768xf32>
    %62 = arith.maximumf %60, %61 : vector<8x768xf32>
    %63 = arith.truncf %62 : vector<8x768xf32> to vector<8x768xbf16>
    %c0_28 = arith.constant 0 : index
    %c128 = arith.constant 128 : index
    %64 = vector.load %arg4[%c0_28, %c128] : memref<768x256xbf16, #tpu.memory_space<vmem>>, vector<768x128xbf16>
    %cst_29 = arith.constant dense<0.000000e+00> : vector<8x128xf32>
    %65 = tpu.matmul %63, %64, %cst_29 {dimension_numbers = #tpu.dot_dimension_numbers<[1], [0], [0], [1], [0, 0, 1, 1], [], []>} : vector<8x768xbf16>, vector<768x128xbf16>, vector<8x128xf32> -> vector<8x128xf32>
    %66 = vector.broadcast %9 : vector<1x128xf32> to vector<8x128xf32>
    %67 = arith.addf %65, %66 : vector<8x128xf32>
    %68 = math.tanh %67 : vector<8x128xf32>
    %cst_30 = arith.constant 1.000000e+00 : f32
    %69 = vector.broadcast %cst_30 : f32 to vector<8x128xf32>
    %70 = arith.mulf %69, %68 : vector<8x128xf32>
    %71 = tpu.iota {dimensions = array<i32: 1>} : vector<8x128xi32>
    %c64_i32_31 = arith.constant 64 : i32
    %72 = vector.broadcast %c64_i32_31 : i32 to vector<8x128xi32>
    %73 = arith.cmpi slt, %71, %72 : vector<8x128xi32>
    %cst_32 = arith.constant 0.000000e+00 : f32
    %74 = vector.broadcast %cst_32 : f32 to vector<8x128xf32>
    %75 = arith.select %73, %35, %74 : vector<8x128xi1>, vector<8x128xf32>
    %c64_i32_33 = arith.constant 64 : i32
    %76 = vector.broadcast %c64_i32_33 : i32 to vector<8x128xi32>
    %77 = arith.cmpi sge, %71, %76 : vector<8x128xi32>
    %c68_i32 = arith.constant 68 : i32
    %78 = vector.broadcast %c68_i32 : i32 to vector<8x128xi32>
    %79 = arith.cmpi slt, %71, %78 : vector<8x128xi32>
    %80 = arith.andi %77, %79 : vector<8x128xi1>
    %cst_34 = arith.constant 0.000000e+00 : f32
    %81 = vector.broadcast %cst_34 : f32 to vector<8x128xf32>
    %82 = arith.select %80, %40, %81 : vector<8x128xi1>, vector<8x128xf32>
    %83 = arith.addf %70, %75 : vector<8x128xf32>
    %84 = arith.addf %83, %82 : vector<8x128xf32>
    %c0_35 = arith.constant 0 : index
    %c0_36 = arith.constant 0 : index
    %85 = vector.load %arg6[%c0_35, %c0_36] : memref<8x128xf32, #tpu.memory_space<vmem>>, vector<8x128xf32>
    tpu.vector_store %arg6[%c0_35, %c0_36], %84 {strides = array<i32>} : memref<8x128xf32, #tpu.memory_space<vmem>>, vector<8x128xf32>,
    return
  }
  func.func @transform_0(%arg0: i32) -> (i32, i32) {
    %c0_i32 = arith.constant 0 : i32
    %c0_i32_0 = arith.constant 0 : i32
    return %arg0, %c0_i32 : i32, i32
  }
  func.func @transform_1(%arg0: i32) -> (i32, i32) {
    %c0_i32 = arith.constant 0 : i32
    %c0_i32_0 = arith.constant 0 : i32
    %c0_i32_1 = arith.constant 0 : i32
    return %c0_i32, %c0_i32_0 : i32, i32
  }
  func.func @transform_2(%arg0: i32) -> (i32, i32) {
    %c0_i32 = arith.constant 0 : i32
    %c0_i32_0 = arith.constant 0 : i32
    %c0_i32_1 = arith.constant 0 : i32
    return %c0_i32, %c0_i32_0 : i32, i32
  }
  func.func @transform_3(%arg0: i32) -> (i32, i32) {
    %c0_i32 = arith.constant 0 : i32
    %c0_i32_0 = arith.constant 0 : i32
    %c0_i32_1 = arith.constant 0 : i32
    return %c0_i32, %c0_i32_0 : i32, i32
  }
  func.func @transform_4(%arg0: i32) -> (i32, i32) {
    %c0_i32 = arith.constant 0 : i32
    %c0_i32_0 = arith.constant 0 : i32
    %c0_i32_1 = arith.constant 0 : i32
    return %c0_i32, %c0_i32_0 : i32, i32
  }
  func.func @transform_5(%arg0: i32) -> (i32, i32) {
    %c0_i32 = arith.constant 0 : i32
    %c0_i32_0 = arith.constant 0 : i32
    return %arg0, %c0_i32 : i32, i32
  }
}

</mosaic_0001>

<bundles_post_ra>
// kernel: tpu_custom_call.1
= control target key start
LH: loop header
LB: loop body
LE: loop exit
PB: predicated region body
PF: predicated region fallthrough
CT: control target
= control target key end

     0   :  { %10 = vsyncpa [#allocation3], 0  ;;  %s5522_s0 = inlined_call_operand.hbm [shape: f32[8,256], index: 0, kind: input, shape index: {}]   ;;  %s5523_s1 = inlined_call_operand.hbm [shape: bf16[128,2304], index: 1, kind: input, shape index: {}]   ;;  %s5524_s2 = inlined_call_operand.hbm [shape: s8[768,1536], index: 2, kind: input, shape index: {}]   ;;  %s5525_s3 = inlined_call_operand.hbm [shape: bf16[768,256], index: 3, kind: input, shape index: {}]   ;;  %s5526_s4 = inlined_call_operand.hbm [shape: f32[8,768], index: 4, kind: input, shape index: {}]   ;;  %s5527_s5 = inlined_call_operand.hbm [shape: f32[8,128], index: 5, kind: output, shape index: {}]  }
   0x1   :  { %11 = vsyncpa [#allocation6], 0 }
   0x2   :  { %12 = vsyncpa [#allocation9], 0 }
   0x3   :  { %13 = vsyncpa [#allocation4], 0  ;;  %s5161_s18 = smov [#allocation5]   ;;  %s5021_s22 = scalar_lea.hbm %s5523_s1, 18432 }
   0x4   :  { %s29_s19 = sshll.u32 %s5161_s18, 4  ;;  %p5022_p0 = scmp.ne.s32.totalorder %s5523_s1, %s5021_s22  ;;  %s30_s19 = int_to_ptr.vmem [resolvable:$true] %s29_s19 }
   0x5   :  { %p5025_p1 = scmp.lt.u32.totalorder %s5021_s22, %s5523_s1 }
   0x7   :  { %p5027_p2 = pnand %p5025_p1, %p5022_p0 }
   0x9   :  { %5030 = shalt.err (!%p5027_p2)
}
   0xa   :  { %s5031_s27 = scalar_lea.vmem %s30_s19, 18432  ;;  %p5036_p4 = scmp.lt.s32.totalorder %s30_s19, %s30_s19 }
   0xb   :  { %p5032_p3 = scmp.ne.s32.totalorder %s30_s19, %s5031_s27  ;;  %p5037_p5 = scmp.lt.s32.totalorder %s5031_s27, %s5031_s27 }
   0xd   :  { %p5038_p6 = por %p5037_p5, %p5036_p4 }
   0xf   :  { %p5039_p7 = pnand %p5038_p6, %p5032_p3 }
  0x11   :  { %5042 = shalt.err (!%p5039_p7)
}
  0x12   :  { %s5162_s28 = smov 1152   ;;  %s5163_s29 = smov 72  }
  0x13   :  { %35 = dma.hbm_to_vmem [thread:$0]  %s5523_s1, 18432, %s30_s19, [#allocation6], %s5162_s28, %s5162_s28, %s5163_s29  }
  0x14   :  { %s5164_s7 = smov [#allocation8]   ;;  %s5043_s11 = scalar_lea.hbm %s5525_s3, 12288 }
  0x15   :  { %s53_s8 = sshll.u32 %s5164_s7, 4  ;;  %p5044_p8 = scmp.ne.s32.totalorder %s5525_s3, %s5043_s11  ;;  %s54_s8 = int_to_ptr.vmem [resolvable:$true] %s53_s8 }
  0x16   :  { %p5047_p9 = scmp.lt.u32.totalorder %s5043_s11, %s5525_s3 }
  0x18   :  { %p5049_p10 = pnand %p5047_p9, %p5044_p8 }
  0x1a   :  { %5052 = shalt.err (!%p5049_p10)
}
  0x1b   :  { %s5053_s16 = scalar_lea.vmem %s54_s8, 12288  ;;  %p5058_p12 = scmp.lt.s32.totalorder %s54_s8, %s54_s8 }
  0x1c   :  { %p5054_p11 = scmp.ne.s32.totalorder %s54_s8, %s5053_s16  ;;  %p5059_p13 = scmp.lt.s32.totalorder %s5053_s16, %s5053_s16 }
  0x1e   :  { %p5060_p0 = por %p5059_p13, %p5058_p12 }
  0x20   :  { %p5061_p1 = pnand %p5060_p0, %p5054_p11 }
  0x22   :  { %5064 = shalt.err (!%p5061_p1)
}
  0x23   :  { %s5165_s1 = smov 128   ;;  %s5166_s17 = smov 8  }
  0x24   :  { %59 = dma.hbm_to_vmem [thread:$0]  %s5525_s3, 12288, %s54_s8, [#allocation9], %s5165_s1, %s5165_s1, %s5166_s17  }
  0x25   :  { %s5167_s20 = smov [#allocation2]   ;;  %s5168_s22 = smov [#allocation7]  }
  0x26   :  { %s20_s21 = sshll.u32 %s5167_s20, 4  ;;  %s41_s23 = sshll.u32 %s5168_s22, 4  ;;  %s21_s21 = int_to_ptr.vmem [resolvable:$true] %s20_s21  ;;  %s5229_s23 = int_to_ptr.vmem [resolvable:$true] %s41_s23 }
  0x27   :  { %s5065_s26 = scalar_lea.hbm %s5522_s0, 256 }
  0x28   :  { %p5066_p2 = scmp.ne.s32.totalorder %s5522_s0, %s5065_s26  ;;  %p5069_p3 = scmp.lt.u32.totalorder %s5065_s26, %s5522_s0 }
  0x2a   :  { %p5071_p4 = pnand %p5069_p3, %p5066_p2 }
  0x2c   :  { %5074 = shalt.err (!%p5071_p4)
}
  0x2d   :  { %s5075_s3 = scalar_lea.vmem %s21_s21, 256  ;;  %p5080_p6 = scmp.lt.s32.totalorder %s21_s21, %s21_s21 }
  0x2e   :  { %p5076_p5 = scmp.ne.s32.totalorder %s21_s21, %s5075_s3  ;;  %p5081_p7 = scmp.lt.s32.totalorder %s5075_s3, %s5075_s3 }
  0x30   :  { %p5082_p8 = por %p5081_p7, %p5080_p6 }
  0x32   :  { %p5083_p9 = pnand %p5082_p8, %p5076_p5 }
  0x34   :  { %5086 = shalt.err (!%p5083_p9)
}
  0x35   :  { %23 = dma.hbm_to_vmem [thread:$0]  %s5522_s0, 256, %s21_s21, [#allocation3]  }
  0x36   :  { %s5087_s10 = scalar_lea.hbm %s5524_s2, 36864 }
  0x37   :  { %p5088_p10 = scmp.ne.s32.totalorder %s5524_s2, %s5087_s10  ;;  %p5091_p11 = scmp.lt.u32.totalorder %s5087_s10, %s5524_s2 }
  0x39   :  { %p5093_p12 = pnand %p5091_p11, %p5088_p10 }
  0x3b   :  { %5096 = shalt.err (!%p5093_p12)
}
  0x3c   :  { %s5097_s15 = scalar_lea.vmem %s5229_s23, 36864  ;;  %p5102_p0 = scmp.lt.s32.totalorder %s5229_s23, %s5229_s23 }
  0x3d   :  { %p5098_p13 = scmp.ne.s32.totalorder %s5229_s23, %s5097_s15  ;;  %p5103_p1 = scmp.lt.s32.totalorder %s5097_s15, %s5097_s15 }
  0x3f   :  { %p5104_p2 = por %p5103_p1, %p5102_p0 }
  0x41   :  { %p5105_p3 = pnand %p5104_p2, %p5098_p13 }
  0x43   :  { %5108 = shalt.err (!%p5105_p3)
}
  0x44   :  { %s5169_s0 = smov 1536   ;;  %s5170_s16 = smov 96  }
  0x45   :  { %47 = dma.hbm_to_vmem [thread:$0]  %s5524_s2, 36864, %s5229_s23, [#allocation6], %s5169_s0, %s5169_s0, %s5170_s16  }
  0x46   :  { %s5171_s18 = smov [#allocation10]   ;;  %s5109_s22 = scalar_lea.hbm %s5526_s4, 768 }
  0x47   :  { %s66_s19 = sshll.u32 %s5171_s18, 4  ;;  %p5110_p4 = scmp.ne.s32.totalorder %s5526_s4, %s5109_s22  ;;  %s67_s19 = int_to_ptr.vmem [resolvable:$true] %s66_s19 }
  0x48   :  { %p5113_p5 = scmp.lt.u32.totalorder %s5109_s22, %s5526_s4 }
  0x4a   :  { %p5115_p6 = pnand %p5113_p5, %p5110_p4 }
  0x4c   :  { %5118 = shalt.err (!%p5115_p6)
}
  0x4d   :  { %s5119_s28 = scalar_lea.vmem %s67_s19, 768  ;;  %p5124_p8 = scmp.lt.s32.totalorder %s67_s19, %s67_s19 }
  0x4e   :  { %p5120_p7 = scmp.ne.s32.totalorder %s67_s19, %s5119_s28  ;;  %p5125_p9 = scmp.lt.s32.totalorder %s5119_s28, %s5119_s28 }
  0x50   :  { %p5126_p10 = por %p5125_p9, %p5124_p8 }
  0x52   :  { %p5127_p11 = pnand %p5126_p10, %p5120_p7 }
  0x54   :  { %5130 = shalt.err (!%p5127_p11)
}
  0x55   :  { %69 = dma.hbm_to_vmem [thread:$0]  %s5526_s4, 768, %s67_s19, [#allocation9]  }
  0x56   :  { %5153 = dma.done.wait [#allocation3], 256  }
  0x57   :  { %5154 = vsyncadd [#allocation3], 4294967040 }
  0x58   :  { %5155 = dma.done.wait [#allocation6], 55296  }
  0x59   :  { %5156 = vsyncadd [#allocation6], 4294912000 }
  0x5a   :  { %5157 = dma.done.wait [#allocation9], 13056  }
  0x5b   :  { %5158 = vsyncadd [#allocation9], 4294954240  ;;  %v5172_v0 = vmov 0   ;;  %v4705_v1 = vld [vmem:[#allocation5 + $0x4] ss:$72 sps:$4 sm:$0xff]   ;;  %v86_v21 = vld [vmem:[#allocation2] sm:$0xff] }
  0x5c   :  { %722 = vmatprep.mubr.bf16.mxu1 %v5172_v0  ;;  %804 = vmatprep.mubr.bf16.mxu0 %v5172_v0  ;;  %v4707_v2 = vld [vmem:[#allocation5] ss:$72 sps:$4 sm:$0xff]   ;;  %v4708_v3 = vld [vmem:[#allocation5 + $0x94] ss:$72 sps:$4 sm:$0xff]   ;;  %v4710_v4 = vld [vmem:[#allocation5 + $0x90] ss:$72 sps:$4 sm:$0xff]   ;;  %v5274_v25 = vpack.c.bf16 %v86_v21, %v86_v21 }
  0x5d   :  { %690 = vmatprep.subr.bf16.mxu1 %v4705_v1  ;;  %v4711_v5 = vld [vmem:[#allocation5 + $0x124] ss:$72 sps:$4 sm:$0xff]   ;;  %v4713_v6 = vld [vmem:[#allocation5 + $0x120] ss:$72 sps:$4 sm:$0xff]   ;;  %v4714_v7 = vld [vmem:[#allocation5 + $0x1b4] ss:$72 sps:$4 sm:$0xff]  }
  0x5e   :  { %691 = vmatpush1.bf16.msra.mxu1 %v4707_v2  ;;  %v4716_v8 = vld [vmem:[#allocation5 + $0x1b0] ss:$72 sps:$4 sm:$0xff]   ;;  %v4717_v9 = vld [vmem:[#allocation5 + $0x244] ss:$72 sps:$4 sm:$0xff]   ;;  %v4719_v10 = vld [vmem:[#allocation5 + $0x240] ss:$72 sps:$4 sm:$0xff]  }
  0x5f   :  { %692 = vmatprep.subr.bf16.mxu1 %v4708_v3  ;;  %v4720_v11 = vld [vmem:[#allocation5 + $0x2d4] ss:$72 sps:$4 sm:$0xff]   ;;  %v4722_v12 = vld [vmem:[#allocation5 + $0x2d0] ss:$72 sps:$4 sm:$0xff]   ;;  %v4723_v13 = vld [vmem:[#allocation5 + $0x364] ss:$72 sps:$4 sm:$0xff]  }
  0x60   :  { %v4753_v14 = vld [vmem:[#allocation5 + $0x14] ss:$72 sps:$4 sm:$0xff]   ;;  %v4755_v15 = vld [vmem:[#allocation5 + $0x10] ss:$72 sps:$4 sm:$0xff]   ;;  %v4725_v16 = vld [vmem:[#allocation5 + $0x360] ss:$72 sps:$4 sm:$0xff]  }
  0x61   :  { %v4726_v17 = vld [vmem:[#allocation5 + $0x3f4] ss:$72 sps:$4 sm:$0xff]   ;;  %772 = vmatprep.subr.bf16.mxu0 %v4753_v14  ;;  %v4759_v18 = vld [vmem:[#allocation5 + $0xa4] ss:$72 sps:$4 sm:$0xff]   ;;  %v4761_v19 = vld [vmem:[#allocation5 + $0xa0] ss:$72 sps:$4 sm:$0xff]  }
  0x62   :  { %693 = vmatpush1.bf16.msra.mxu1 %v4710_v4  ;;  %773 = vmatpush1.bf16.msra.mxu0 %v4755_v15  ;;  %v4728_v20 = vld [vmem:[#allocation5 + $0x3f0] ss:$72 sps:$4 sm:$0xff]   ;;  %v4765_v22 = vld [vmem:[#allocation5 + $0x134] ss:$72 sps:$4 sm:$0xff]   ;;  %v4771_v26 = vld [vmem:[#allocation5 + $0x1c4] ss:$72 sps:$4 sm:$0xff]  }
  0x63   :  { %694 = vmatprep.subr.bf16.mxu1 %v4711_v5  ;;  %774 = vmatprep.subr.bf16.mxu0 %v4759_v18  ;;  %v4731_v23 = vld [vmem:[#allocation5 + $0xc] ss:$72 sps:$4 sm:$0xff]   ;;  %v4767_v24 = vld [vmem:[#allocation5 + $0x130] ss:$72 sps:$4 sm:$0xff]   ;;  %v4734_v28 = vld [vmem:[#allocation5 + $0x9c] ss:$72 sps:$4 sm:$0xff]  }
  0x64   :  { %v4729_v27 = vld [vmem:[#allocation5 + $0x8] ss:$72 sps:$4 sm:$0xff]   ;;  %v4777_v30 = vld [vmem:[#allocation5 + $0x254] ss:$72 sps:$4 sm:$0xff]   ;;  %v4732_v31 = vld [vmem:[#allocation5 + $0x98] ss:$72 sps:$4 sm:$0xff]  }
  0x65   :  { %v4773_v29 = vld [vmem:[#allocation5 + $0x1c0] ss:$72 sps:$4 sm:$0xff]   ;;  %v4737_v32 = vld [vmem:[#allocation5 + $0x12c] ss:$72 sps:$4 sm:$0xff]   ;;  %v4779_v33 = vld [vmem:[#allocation5 + $0x250] ss:$72 sps:$4 sm:$0xff]  }
  0x66   :  { %695 = vmatpush1.bf16.msra.mxu1 %v4713_v6  ;;  %775 = vmatpush1.bf16.msra.mxu0 %v4761_v19  ;;  %v4783_v34 = vld [vmem:[#allocation5 + $0x2e4] ss:$72 sps:$4 sm:$0xff]   ;;  %v4735_v35 = vld [vmem:[#allocation5 + $0x128] ss:$72 sps:$4 sm:$0xff]   ;;  %v4789_v38 = vld [vmem:[#allocation5 + $0x374] ss:$72 sps:$4 sm:$0xff]  }
  0x67   :  { %696 = vmatprep.subr.bf16.mxu1 %v4714_v7  ;;  %776 = vmatprep.subr.bf16.mxu0 %v4765_v22  ;;  %v4740_v36 = vld [vmem:[#allocation5 + $0x1bc] ss:$72 sps:$4 sm:$0xff]   ;;  %v4785_v37 = vld [vmem:[#allocation5 + $0x2e0] ss:$72 sps:$4 sm:$0xff]   ;;  %v4743_v40 = vld [vmem:[#allocation5 + $0x24c] ss:$72 sps:$4 sm:$0xff]  }
  0x68   :  { %v4738_v39 = vld [vmem:[#allocation5 + $0x1b8] ss:$72 sps:$4 sm:$0xff]   ;;  %v4795_v42 = vld [vmem:[#allocation5 + $0x404] ss:$72 sps:$4 sm:$0xff]   ;;  %v4741_v43 = vld [vmem:[#allocation5 + $0x248] ss:$72 sps:$4 sm:$0xff]  }
  0x69   :  { %v4791_v41 = vld [vmem:[#allocation5 + $0x370] ss:$72 sps:$4 sm:$0xff]   ;;  %v4746_v44 = vld [vmem:[#allocation5 + $0x2dc] ss:$72 sps:$4 sm:$0xff]   ;;  %v4797_v45 = vld [vmem:[#allocation5 + $0x400] ss:$72 sps:$4 sm:$0xff]  }
  0x6a   :  { %697 = vmatpush1.bf16.msra.mxu1 %v4716_v8  ;;  %777 = vmatpush1.bf16.msra.mxu0 %v4767_v24  ;;  %v4803_v46 = vld [vmem:[#allocation5 + $0x24] ss:$72 sps:$4 sm:$0xff]   ;;  %v4744_v47 = vld [vmem:[#allocation5 + $0x2d8] ss:$72 sps:$4 sm:$0xff]   ;;  %v4809_v50 = vld [vmem:[#allocation5 + $0xb4] ss:$72 sps:$4 sm:$0xff]  }
  0x6b   :  { %698 = vmatprep.subr.bf16.mxu1 %v4717_v9  ;;  %778 = vmatprep.subr.bf16.mxu0 %v4771_v26  ;;  %v4749_v48 = vld [vmem:[#allocation5 + $0x36c] ss:$72 sps:$4 sm:$0xff]   ;;  %v4801_v49 = vld [vmem:[#allocation5 + $0x20] ss:$72 sps:$4 sm:$0xff]   ;;  %v4752_v52 = vld [vmem:[#allocation5 + $0x3fc] ss:$72 sps:$4 sm:$0xff]  }
  0x6c   :  { %v4747_v51 = vld [vmem:[#allocation5 + $0x368] ss:$72 sps:$4 sm:$0xff]   ;;  %v4815_v54 = vld [vmem:[#allocation5 + $0x144] ss:$72 sps:$4 sm:$0xff]   ;;  %v4750_v55 = vld [vmem:[#allocation5 + $0x3f8] ss:$72 sps:$4 sm:$0xff]  }
  0x6d   :  { %v4807_v53 = vld [vmem:[#allocation5 + $0xb0] ss:$72 sps:$4 sm:$0xff]   ;;  %v4758_v56 = vld [vmem:[#allocation5 + $0x1c] ss:$72 sps:$4 sm:$0xff]   ;;  %v4813_v57 = vld [vmem:[#allocation5 + $0x140] ss:$72 sps:$4 sm:$0xff]  }
  0x6e   :  { %699 = vmatpush1.bf16.msra.mxu1 %v4719_v10  ;;  %779 = vmatpush1.bf16.msra.mxu0 %v4773_v29  ;;  %v4821_v58 = vld [vmem:[#allocation5 + $0x1d4] ss:$72 sps:$4 sm:$0xff]   ;;  %v4756_v59 = vld [vmem:[#allocation5 + $0x18] ss:$72 sps:$4 sm:$0xff]   ;;  %v4827_v62 = vld [vmem:[#allocation5 + $0x264] ss:$72 sps:$4 sm:$0xff]  }
  0x6f   :  { %700 = vmatprep.subr.bf16.mxu1 %v4720_v11  ;;  %780 = vmatprep.subr.bf16.mxu0 %v4777_v30  ;;  %v4764_v60 = vld [vmem:[#allocation5 + $0xac] ss:$72 sps:$4 sm:$0xff]   ;;  %v4819_v61 = vld [vmem:[#allocation5 + $0x1d0] ss:$72 sps:$4 sm:$0xff]   ;;  %v4770_v1 = vld [vmem:[#allocation5 + $0x13c] ss:$72 sps:$4 sm:$0xff]  }
  0x70   :  { %v4762_v63 = vld [vmem:[#allocation5 + $0xa8] ss:$72 sps:$4 sm:$0xff]   ;;  %v4833_v3 = vld [vmem:[#allocation5 + $0x2f4] ss:$72 sps:$4 sm:$0xff]   ;;  %v4768_v4 = vld [vmem:[#allocation5 + $0x138] ss:$72 sps:$4 sm:$0xff]  }
  0x71   :  { %v4825_v2 = vld [vmem:[#allocation5 + $0x260] ss:$72 sps:$4 sm:$0xff]   ;;  %v4776_v5 = vld [vmem:[#allocation5 + $0x1cc] ss:$72 sps:$4 sm:$0xff]   ;;  %v4831_v7 = vld [vmem:[#allocation5 + $0x2f0] ss:$72 sps:$4 sm:$0xff]  }
  0x72   :  { %701 = vmatpush1.bf16.msra.mxu1 %v4722_v12  ;;  %781 = vmatpush1.bf16.msra.mxu0 %v4779_v33  ;;  %v4774_v6 = vld [vmem:[#allocation5 + $0x1c8] ss:$72 sps:$4 sm:$0xff]   ;;  %v4782_v8 = vld [vmem:[#allocation5 + $0x25c] ss:$72 sps:$4 sm:$0xff]   ;;  %v4780_v12 = vld [vmem:[#allocation5 + $0x258] ss:$72 sps:$4 sm:$0xff]  }
  0x73   :  { %702 = vmatprep.subr.bf16.mxu1 %v4723_v13  ;;  %782 = vmatprep.subr.bf16.mxu0 %v4783_v34  ;;  %v4839_v9 = vld [vmem:[#allocation5 + $0x384] ss:$72 sps:$4 sm:$0xff]   ;;  %v4837_v10 = vld [vmem:[#allocation5 + $0x380] ss:$72 sps:$4 sm:$0xff]   ;;  %v4845_v11 = vld [vmem:[#allocation5 + $0x414] ss:$72 sps:$4 sm:$0xff]  }
  0x74   :  { %v986_v13 = vld [vmem:[#allocation7 + $0x8] sm:$0xff]  ;;  %v4843_v15 = vld [vmem:[#allocation5 + $0x410] ss:$72 sps:$4 sm:$0xff]   ;;  %v4794_v18 = vld [vmem:[#allocation5 + $0x37c] ss:$72 sps:$4 sm:$0xff]   ;;  %s5173_s4 = smov 64  }
  0x75   :  { %v4788_v14 = vld [vmem:[#allocation5 + $0x2ec] ss:$72 sps:$4 sm:$0xff]   ;;  %v1130_v19 = vunpack.c.l.s8.bf16 %v986_v13  ;;  %v1136_v24 = vunpack.c.h.s8.bf16 %v986_v13  ;;  %v991_v26 = vld [vmem:[#allocation7 + $0x60] sm:$0xff]  ;;  %s5174_s29 = smov [#allocation11]  }
  0x76   :  { %703 = vmatpush1.bf16.msra.mxu1 %v4725_v16  ;;  %783 = vmatpush1.bf16.msra.mxu0 %v4785_v37  ;;  %v985_v16 = vld [vmem:[#allocation7] sm:$0xff]  ;;  %v992_v22 = vld [vmem:[#allocation7 + $0x68] sm:$0xff]  ;;  %s4260_s30 = sshll.u32 %s5174_s29, 4  ;;  %s4261_s30 = int_to_ptr.vmem [resolvable:$true] %s4260_s30 }
  0x77   :  { %704 = vmatprep.subr.bf16.mxu1 %v4726_v17  ;;  %784 = vmatprep.subr.bf16.mxu0 %v4789_v38  ;;  %v4786_v17 = vld [vmem:[#allocation5 + $0x2e8] ss:$72 sps:$4 sm:$0xff]   ;;  %v1129_v21 = vunpack.c.l.s8.bf16 %v985_v16  ;;  %v4806_v29 = vld [vmem:[#allocation5 + $0x2c] ss:$72 sps:$4 sm:$0xff]   ;;  %v1142_v30 = vunpack.c.l.s8.bf16 %v992_v22  ;;  %v4812_v34 = vld [vmem:[#allocation5 + $0xbc] ss:$72 sps:$4 sm:$0xff]   ;;  %v1147_v38 = vunpack.c.h.s8.bf16 %v991_v26  ;;  %p5136_p13 = scmp.lt.s32.totalorder %s4261_s30, %s4261_s30 }
  0x78   :  { %v998_v33 = vld [vmem:[#allocation7 + $0xc8] sm:$0xff]  ;;  %v4810_v37 = vld [vmem:[#allocation5 + $0xb8] ss:$72 sps:$4 sm:$0xff]   ;;  %s5131_s3 = scalar_lea.vmem %s4261_s30, 128 }
  0x79   :  { %p5132_p12 = scmp.ne.s32.totalorder %s4261_s30, %s5131_s3  ;;  %p5137_p0 = scmp.lt.s32.totalorder %s5131_s3, %s5131_s3 }
  0x7a   :  { %705 = vmatpush1.bf16.msra.mxu1 %v4728_v20  ;;  %785 = vmatpush1.bf16.msra.mxu0 %v4791_v41  ;;  %v4792_v20 = vld [vmem:[#allocation5 + $0x378] ss:$72 sps:$4 sm:$0xff]   ;;  %v4816_v41 = vld [vmem:[#allocation5 + $0x148] ss:$72 sps:$4 sm:$0xff]  }
  0x7b   :  { %731 = vmatprep.subr.bf16.mxu1 %v4731_v23  ;;  %786 = vmatprep.subr.bf16.mxu0 %v4795_v42  ;;  %v4800_v23 = vld [vmem:[#allocation5 + $0x40c] ss:$72 sps:$4 sm:$0xff]   ;;  %p5138_p1 = por %p5137_p0, %p5136_p13 }
  0x7d   :  { %723 = vmatmul.mubr.bf16.vlgmr.msra.gmra.mrb[0].mxu1 %v5274_v25  ;;  %p5139_p2 = pnand %p5138_p1, %p5132_p12 }
  0x7e   :  { %732 = vmatpush1.bf16.msra.mxu1 %v4729_v27  ;;  %763 = vmatprep.mubr.bf16.mxu1 %v5172_v0  ;;  %v4798_v27 = vld [vmem:[#allocation5 + $0x408] ss:$72 sps:$4 sm:$0xff]  }
  0x7f   :  { %733 = vmatprep.subr.bf16.mxu1 %v4734_v28  ;;  %787 = vmatpush1.bf16.msra.mxu0 %v4797_v45  ;;  %v1135_v28 = vunpack.c.h.s8.bf16 %v985_v16  ;;  %v1160_v45 = vunpack.c.h.s8.bf16 %v998_v33  ;;  %v1021_v16 = vld [vmem:[#allocation7 + $0x240] sm:$0xff] }
  0x80   :  { %854 = vmatprep.subr.bf16.mxu0 %v4803_v46  ;;  %v1003_v46 = vld [vmem:[#allocation7 + $0x120] sm:$0xff] }
  0x82   :  { %734 = vmatpush1.bf16.msra.mxu1 %v4732_v31  ;;  %805 = vmatmul.mubr.bf16.vlgmr.msra.gmra.mrb[0].mxu0 %v5274_v25  ;;  %v4804_v31 = vld [vmem:[#allocation5 + $0x28] ss:$72 sps:$4 sm:$0xff]  }
  0x83   :  { %735 = vmatprep.subr.bf16.mxu1 %v4737_v32  ;;  %855 = vmatpush1.bf16.msra.mxu0 %v4801_v49  ;;  %v1141_v32 = vunpack.c.l.s8.bf16 %v991_v26  ;;  %v4830_v49 = vld [vmem:[#allocation5 + $0x26c] ss:$72 sps:$4 sm:$0xff]  }
  0x84   :  { %886 = vmatprep.mubr.bf16.mxu0 %v5172_v0  ;;  %856 = vmatprep.subr.bf16.mxu0 %v4809_v50 }
  0x86   :  { %736 = vmatpush1.bf16.msra.mxu1 %v4735_v35  ;;  %v1148_v35 = vunpack.c.h.s8.bf16 %v992_v22  ;;  %v1201_v22 = vunpack.c.l.s8.bf16 %v1021_v16 }
  0x87   :  { %737 = vmatprep.subr.bf16.mxu1 %v4740_v36  ;;  %857 = vmatpush1.bf16.msra.mxu0 %v4807_v53  ;;  %v997_v36 = vld [vmem:[#allocation7 + $0xc0] sm:$0xff]  ;;  %v1010_v53 = vld [vmem:[#allocation7 + $0x188] sm:$0xff] }
  0x88   :  { %858 = vmatprep.subr.bf16.mxu0 %v4815_v54  ;;  %v1153_v42 = vunpack.c.l.s8.bf16 %v997_v36  ;;  %v4836_v54 = vld [vmem:[#allocation5 + $0x2fc] ss:$72 sps:$4 sm:$0xff]  }
  0x8a   :  { %738 = vmatpush1.bf16.msra.mxu1 %v4738_v39  ;;  %v4818_v39 = vld [vmem:[#allocation5 + $0x14c] ss:$72 sps:$4 sm:$0xff]  }
  0x8b   :  { %739 = vmatprep.subr.bf16.mxu1 %v4743_v40  ;;  %859 = vmatpush1.bf16.msra.mxu0 %v4813_v57  ;;  %v1154_v40 = vunpack.c.l.s8.bf16 %v998_v33  ;;  %v1178_v57 = vunpack.c.l.s8.bf16 %v1010_v53  ;;  %v999_v33 = vld [vmem:[#allocation7 + $0xd0] sm:$0xff] }
  0x8c   :  { %860 = vmatprep.subr.bf16.mxu0 %v4821_v58  ;;  %v1009_v58 = vld [vmem:[#allocation7 + $0x180] sm:$0xff] }
  0x8e   :  { %740 = vmatpush1.bf16.msra.mxu1 %v4741_v43  ;;  %v1004_v43 = vld [vmem:[#allocation7 + $0x128] sm:$0xff] }
  0x8f   :  { %741 = vmatprep.subr.bf16.mxu1 %v4746_v44  ;;  %861 = vmatpush1.bf16.msra.mxu0 %v4819_v61  ;;  %v4824_v44 = vld [vmem:[#allocation5 + $0x1dc] ss:$72 sps:$4 sm:$0xff]   ;;  %v1166_v50 = vunpack.c.l.s8.bf16 %v1004_v43  ;;  %v4840_v61 = vld [vmem:[#allocation5 + $0x388] ss:$72 sps:$4 sm:$0xff]  }
  0x90   :  { %862 = vmatprep.subr.bf16.mxu0 %v4827_v62  ;;  %v1177_v62 = vunpack.c.l.s8.bf16 %v1009_v58 }
  0x92   :  { %742 = vmatpush1.bf16.msra.mxu1 %v4744_v47  ;;  %v4822_v47 = vld [vmem:[#allocation5 + $0x1d8] ss:$72 sps:$4 sm:$0xff]  }
  0x93   :  { %743 = vmatprep.subr.bf16.mxu1 %v4749_v48  ;;  %863 = vmatpush1.bf16.msra.mxu0 %v4825_v2  ;;  %v1159_v48 = vunpack.c.h.s8.bf16 %v997_v36  ;;  %v1184_v2 = vunpack.c.h.s8.bf16 %v1010_v53 }
  0x94   :  { %864 = vmatprep.subr.bf16.mxu0 %v4833_v3  ;;  %v988_v3 = vld [vmem:[#allocation7 + $0x18] sm:$0xff] }
  0x96   :  { %744 = vmatpush1.bf16.msra.mxu1 %v4747_v51  ;;  %v4828_v51 = vld [vmem:[#allocation5 + $0x268] ss:$72 sps:$4 sm:$0xff]  }
  0x97   :  { %745 = vmatprep.subr.bf16.mxu1 %v4752_v52  ;;  %865 = vmatpush1.bf16.msra.mxu0 %v4831_v7  ;;  %v1165_v52 = vunpack.c.l.s8.bf16 %v1003_v46  ;;  %v4846_v7 = vld [vmem:[#allocation5 + $0x418] ss:$72 sps:$4 sm:$0xff]  }
  0x98   :  { %866 = vmatprep.subr.bf16.mxu0 %v4839_v9  ;;  %v987_v9 = vld [vmem:[#allocation7 + $0x10] sm:$0xff] }
  0x99   :  { %v1131_v13 = vunpack.c.l.s8.bf16 %v987_v9 }
  0x9a   :  { %746 = vmatpush1.bf16.msra.mxu1 %v4750_v55  ;;  %v1172_v55 = vunpack.c.h.s8.bf16 %v1004_v43 }
  0x9b   :  { %813 = vmatprep.subr.bf16.mxu1 %v4758_v56  ;;  %867 = vmatpush1.bf16.msra.mxu0 %v4837_v10  ;;  %v1171_v56 = vunpack.c.h.s8.bf16 %v1003_v46  ;;  %v1012_v46 = vld [vmem:[#allocation7 + $0x198] sm:$0xff] }
  0x9c   :  { %868 = vmatprep.subr.bf16.mxu0 %v4845_v11  ;;  %v1022_v11 = vld [vmem:[#allocation7 + $0x248] sm:$0xff]  ;;  %v1186_v53 = vunpack.c.h.s8.bf16 %v1012_v46 }
  0x9d   :  { %764 = vmatmul.mubr.bf16.vlgmr.msra.gmra.mrb[4].mxu1 %v5274_v25 }
  0x9e   :  { %814 = vmatpush1.bf16.msra.mxu1 %v4756_v59  ;;  %845 = vmatprep.mubr.bf16.mxu1 %v5172_v0  ;;  %v4834_v59 = vld [vmem:[#allocation5 + $0x2f8] ss:$72 sps:$4 sm:$0xff]  }
  0x9f   :  { %815 = vmatprep.subr.bf16.mxu1 %v4764_v60  ;;  %869 = vmatpush1.bf16.msra.mxu0 %v4843_v15  ;;  %v4842_v60 = vld [vmem:[#allocation5 + $0x38c] ss:$72 sps:$4 sm:$0xff]   ;;  %v1138_v15 = vunpack.c.h.s8.bf16 %v988_v3 }
  0xa0   :  { %1417 = vmatprep.subr.bf16.mxu0 %v1130_v19  ;;  %v1137_v19 = vunpack.c.h.s8.bf16 %v987_v9 }
  0xa2   :  { %816 = vmatpush1.bf16.msra.mxu1 %v4762_v63  ;;  %887 = vmatmul.mubr.bf16.vlgmr.msra.gmra.mrb[4].mxu0 %v5274_v25  ;;  %v1016_v63 = vld [vmem:[#allocation7 + $0x1e8] sm:$0xff] }
  0xa3   :  { %817 = vmatprep.subr.bf16.mxu1 %v4770_v1  ;;  %1418 = vmatpush1.bf16.msra.mxu0 %v1129_v21  ;;  %v4848_v1 = vld [vmem:[#allocation5 + $0x41c] ss:$72 sps:$4 sm:$0xff]   ;;  %v993_v21 = vld [vmem:[#allocation7 + $0x70] sm:$0xff] }
  0xa4   :  { %1419 = vmatprep.subr.bf16.mxu0 %v1136_v24  ;;  %v1208_v24 = vunpack.c.h.s8.bf16 %v1022_v11  ;;  %v1143_v26 = vunpack.c.l.s8.bf16 %v993_v21 }
  0xa6   :  { %818 = vmatpush1.bf16.msra.mxu1 %v4768_v4  ;;  %v1183_v4 = vunpack.c.h.s8.bf16 %v1009_v58 }
  0xa7   :  { %819 = vmatprep.subr.bf16.mxu1 %v4776_v5  ;;  %1420 = vmatpush1.bf16.msra.mxu0 %v1135_v28  ;;  %v1190_v5 = vunpack.c.l.s8.bf16 %v1016_v63 }
  0xa8   :  { %1421 = vmatprep.subr.bf16.mxu0 %v1142_v30 }
  0xaa   :  { %820 = vmatpush1.bf16.msra.mxu1 %v4774_v6  ;;  %v1015_v6 = vld [vmem:[#allocation7 + $0x1e0] sm:$0xff] }
  0xab   :  { %821 = vmatprep.subr.bf16.mxu1 %v4782_v8  ;;  %1422 = vmatpush1.bf16.msra.mxu0 %v1141_v32  ;;  %v1132_v8 = vunpack.c.l.s8.bf16 %v988_v3  ;;  %v1189_v10 = vunpack.c.l.s8.bf16 %v1015_v6 }
  0xac   :  { %1423 = vmatprep.subr.bf16.mxu0 %v1148_v35  ;;  %v5286_v35 = vld [vmem:[#allocation7 + $0x308] sm:$0xff] }
  0xae   :  { %822 = vmatpush1.bf16.msra.mxu1 %v4780_v12  ;;  %v1196_v12 = vunpack.c.h.s8.bf16 %v1016_v63 }
  0xaf   :  { %823 = vmatprep.subr.bf16.mxu1 %v4788_v14  ;;  %1424 = vmatpush1.bf16.msra.mxu0 %v1147_v38  ;;  %v994_v14 = vld [vmem:[#allocation7 + $0x78] sm:$0xff] }
  0xb0   :  { %1425 = vmatprep.subr.bf16.mxu0 %v1154_v40  ;;  %v1150_v28 = vunpack.c.h.s8.bf16 %v994_v14  ;;  %v1006_v38 = vld [vmem:[#allocation7 + $0x138] sm:$0xff] }
  0xb1   :  { %v1168_v43 = vunpack.c.l.s8.bf16 %v1006_v38 }
  0xb2   :  { %824 = vmatpush1.bf16.msra.mxu1 %v4786_v17  ;;  %v1195_v17 = vunpack.c.h.s8.bf16 %v1015_v6 }
  0xb3   :  { %825 = vmatprep.subr.bf16.mxu1 %v4794_v18  ;;  %1426 = vmatpush1.bf16.msra.mxu0 %v1153_v42  ;;  %v1202_v18 = vunpack.c.l.s8.bf16 %v1022_v11  ;;  %v1161_v42 = vunpack.c.h.s8.bf16 %v999_v33  ;;  %v937_v11 = vlaneseq }
  0xb4   :  { %1427 = vmatprep.subr.bf16.mxu0 %v1160_v45 }
  0xb6   :  { %826 = vmatpush1.bf16.msra.mxu1 %v4792_v20  ;;  %v1144_v20 = vunpack.c.l.s8.bf16 %v994_v14  ;;  %v90_v14 = vld [vmem:[#allocation10] ss:$8 sm:$0x30] }
  0xb7   :  { %827 = vmatprep.subr.bf16.mxu1 %v4800_v23  ;;  %1428 = vmatpush1.bf16.msra.mxu0 %v1159_v48  ;;  %v1028_v23 = vld [vmem:[#allocation7 + $0x2a8] sm:$0xff] }
  0xb8   :  { %1429 = vmatprep.subr.bf16.mxu0 %v1166_v50  ;;  %v1214_v30 = vunpack.c.l.s8.bf16 %v1028_v23  ;;  %v1220_v36 = vunpack.c.h.s8.bf16 %v1028_v23  ;;  %v1011_v50 = vld [vmem:[#allocation7 + $0x190] sm:$0xff] }
  0xba   :  { %828 = vmatpush1.bf16.msra.mxu1 %v4798_v27  ;;  %v1000_v27 = vld [vmem:[#allocation7 + $0xd8] sm:$0xff] }
  0xbb   :  { %895 = vmatprep.subr.bf16.mxu1 %v4806_v29  ;;  %1430 = vmatpush1.bf16.msra.mxu0 %v1165_v52  ;;  %v1027_v29 = vld [vmem:[#allocation7 + $0x2a0] sm:$0xff]  ;;  %v1156_v32 = vunpack.c.l.s8.bf16 %v1000_v27  ;;  %v1018_v52 = vld [vmem:[#allocation7 + $0x1f8] sm:$0xff] }
  0xbc   :  { %1431 = vmatprep.subr.bf16.mxu0 %v1172_v55  ;;  %v1219_v40 = vunpack.c.h.s8.bf16 %v1027_v29  ;;  %v1192_v55 = vunpack.c.l.s8.bf16 %v1018_v52  ;;  %v1198_v58 = vunpack.c.h.s8.bf16 %v1018_v52 }
  0xbd   :  { %846 = vmatmul.mubr.bf16.vlgmr.msra.gmra.mrb[8].mxu1 %v5274_v25 }
  0xbe   :  { %896 = vmatpush1.bf16.msra.mxu1 %v4804_v31  ;;  %927 = vmatprep.mubr.bf16.mxu1 %v5172_v0  ;;  %v1149_v31 = vunpack.c.h.s8.bf16 %v993_v21 }
  0xbf   :  { %897 = vmatprep.subr.bf16.mxu1 %v4812_v34  ;;  %1432 = vmatpush1.bf16.msra.mxu0 %v1171_v56  ;;  %v1213_v34 = vunpack.c.l.s8.bf16 %v1027_v29  ;;  %v1017_v56 = vld [vmem:[#allocation7 + $0x1f0] sm:$0xff] }
  0xc0   :  { %1433 = vmatprep.subr.bf16.mxu0 %v1178_v57  ;;  %v1191_v57 = vunpack.c.l.s8.bf16 %v1017_v56  ;;  %v1035_v29 = vld [vmem:[#allocation7 + $0x310] sm:$0xff] }
  0xc2   :  { %898 = vmatpush1.bf16.msra.mxu1 %v4810_v37  ;;  %v1155_v37 = vunpack.c.l.s8.bf16 %v999_v33 }
  0xc3   :  { %899 = vmatprep.subr.bf16.mxu1 %v4818_v39  ;;  %1434 = vmatpush1.bf16.msra.mxu0 %v1177_v62  ;;  %v1162_v39 = vunpack.c.h.s8.bf16 %v1000_v27  ;;  %v1023_v62 = vld [vmem:[#allocation7 + $0x250] sm:$0xff] }
  0xc4   :  { %1435 = vmatprep.subr.bf16.mxu0 %v1184_v2  ;;  %v1203_v63 = vunpack.c.l.s8.bf16 %v1023_v62  ;;  %v1030_v2 = vld [vmem:[#allocation7 + $0x2b8] sm:$0xff]  ;;  %v1209_v3 = vunpack.c.h.s8.bf16 %v1023_v62  ;;  %v1052_v62 = vld [vmem:[#allocation7 + $0x428] sm:$0xff] }
  0xc6   :  { %900 = vmatpush1.bf16.msra.mxu1 %v4816_v41  ;;  %v1226_v41 = vunpack.c.l.s8.bf16 %v5286_v35 }
  0xc7   :  { %901 = vmatprep.subr.bf16.mxu1 %v4824_v44  ;;  %1436 = vmatpush1.bf16.msra.mxu0 %v1183_v4  ;;  %v1005_v44 = vld [vmem:[#allocation7 + $0x130] sm:$0xff]  ;;  %v1216_v4 = vunpack.c.l.s8.bf16 %v1030_v2 }
  0xc8   :  { %1437 = vmatprep.subr.bf16.mxu0 %v1190_v5  ;;  %v1167_v45 = vunpack.c.l.s8.bf16 %v1005_v44  ;;  %v1173_v48 = vunpack.c.h.s8.bf16 %v1005_v44  ;;  %v1029_v5 = vld [vmem:[#allocation7 + $0x2b0] sm:$0xff] }
  0xc9   :  { %v1215_v6 = vunpack.c.l.s8.bf16 %v1029_v5  ;;  %v1221_v9 = vunpack.c.h.s8.bf16 %v1029_v5 }
  0xca   :  { %902 = vmatpush1.bf16.msra.mxu1 %v4822_v47  ;;  %v1174_v47 = vunpack.c.h.s8.bf16 %v1006_v38  ;;  %v1042_v38 = vld [vmem:[#allocation7 + $0x378] sm:$0xff] }
  0xcb   :  { %903 = vmatprep.subr.bf16.mxu1 %v4830_v49  ;;  %1438 = vmatpush1.bf16.msra.mxu0 %v1189_v10  ;;  %v1180_v49 = vunpack.c.l.s8.bf16 %v1012_v46 }
  0xcc   :  { %1439 = vmatprep.subr.bf16.mxu0 %v1196_v12  ;;  %v5290_v12 = vshrl.u32 %v937_v11, 7 }
  0xce   :  { %904 = vmatpush1.bf16.msra.mxu1 %v4828_v51  ;;  %v1179_v51 = vunpack.c.l.s8.bf16 %v1011_v50  ;;  %v5318_v5 = vsub.s32 3, %v5290_v12 }
  0xcf   :  { %905 = vmatprep.subr.bf16.mxu1 %v4836_v54  ;;  %1440 = vmatpush1.bf16.msra.mxu0 %v1195_v17  ;;  %v1185_v54 = vunpack.c.h.s8.bf16 %v1011_v50  ;;  %v5298_v17 = vsub.s32 1, %v5290_v12 }
  0xd0   :  { %1441 = vmatprep.subr.bf16.mxu0 %v1202_v18 }
  0xd2   :  { %906 = vmatpush1.bf16.msra.mxu1 %v4834_v59  ;;  %v1024_v59 = vld [vmem:[#allocation7 + $0x258] sm:$0xff] }
  0xd3   :  { %907 = vmatprep.subr.bf16.mxu1 %v4842_v60  ;;  %1442 = vmatpush1.bf16.msra.mxu0 %v1201_v22  ;;  %v1197_v60 = vunpack.c.h.s8.bf16 %v1017_v56 }
  0xd4   :  { %1443 = vmatprep.subr.bf16.mxu0 %v1208_v24 }
  0xd6   :  { %908 = vmatpush1.bf16.msra.mxu1 %v4840_v61  ;;  %v1204_v61 = vunpack.c.l.s8.bf16 %v1024_v59 }
  0xd7   :  { %909 = vmatprep.subr.bf16.mxu1 %v4848_v1  ;;  %v1210_v1 = vunpack.c.h.s8.bf16 %v1024_v59 }
  0xda   :  { %910 = vmatpush1.bf16.msra.mxu1 %v4846_v7  ;;  %v1222_v7 = vunpack.c.h.s8.bf16 %v1030_v2 }
  0xdb   :  { %1540 = vmatprep.subr.bf16.mxu1 %v1132_v8  ;;  %v1036_v8 = vld [vmem:[#allocation7 + $0x318] sm:$0xff] }
  0xdc   :  { %v1228_v10 = vunpack.c.l.s8.bf16 %v1036_v8 }
  0xdd   :  { %928 = vmatmul.mubr.bf16.vlgmr.msra.gmra.mrb[12].mxu1 %v5274_v25  ;;  %v1207_v25 = vunpack.c.h.s8.bf16 %v1021_v16  ;;  %v5295_v16 = vsub.s32 0, %v5290_v12 }
  0xde   :  { %1541 = vmatpush1.bf16.msra.mxu1 %v1131_v13  ;;  %v89_v13 = vld [vmem:[#allocation10] ss:$8 sm:$0xf] }
  0xdf   :  { %1542 = vmatprep.subr.bf16.mxu1 %v1138_v15  ;;  %1444 = vmatpush1.bf16.msra.mxu0 %v1207_v25  ;;  %v5292_v15 = vor.u32 %v90_v14, %v89_v13 }
  0xe0   :  { %1445 = vmatprep.subr.bf16.mxu0 %v1214_v30 }
  0xe1   :  { %v940_v18 = vrot.slane %v5292_v15, %v5295_v16  ;;  %v952_v14 = vrot.slane %v5292_v15, %v5318_v5 }
  0xe2   :  { %1543 = vmatpush1.bf16.msra.mxu1 %v1137_v19  ;;  %v944_v19 = vrot.slane %v5292_v15, %v5298_v17 }
  0xe3   :  { %1544 = vmatprep.subr.bf16.mxu1 %v1144_v20  ;;  %1446 = vmatpush1.bf16.msra.mxu0 %v1213_v34  ;;  %v1232_v34 = vunpack.c.h.s8.bf16 %v5286_v35  ;;  %v1039_v35 = vld [vmem:[#allocation7 + $0x360] sm:$0xff] }
  0xe4   :  { %1447 = vmatprep.subr.bf16.mxu0 %v1220_v36  ;;  %v1234_v36 = vunpack.c.h.s8.bf16 %v1036_v8  ;;  %v1237_v44 = vunpack.c.l.s8.bf16 %v1039_v35  ;;  %v1243_v50 = vunpack.c.h.s8.bf16 %v1039_v35  ;;  %v1051_v8 = vld [vmem:[#allocation7 + $0x420] sm:$0xff]  ;;  %v1066_v35 = vld [vmem:[#allocation7 + $0x4f8] sm:$0xff] }
  0xe6   :  { %1545 = vmatpush1.bf16.msra.mxu1 %v1143_v26 }
  0xe7   :  { %1546 = vmatprep.subr.bf16.mxu1 %v1150_v28  ;;  %1448 = vmatpush1.bf16.msra.mxu0 %v1219_v40  ;;  %v1033_v28 = vld [vmem:[#allocation7 + $0x300] sm:$0xff]  ;;  %v1233_v40 = vunpack.c.h.s8.bf16 %v1035_v29 }
  0xe8   :  { %1458 = vmatprep.subr.bf16.mxu0 %v1226_v41 }
  0xea   :  { %1547 = vmatpush1.bf16.msra.mxu1 %v1149_v31  ;;  %v1225_v31 = vunpack.c.l.s8.bf16 %v1033_v28 }
  0xeb   :  { %1548 = vmatprep.subr.bf16.mxu1 %v1156_v32  ;;  %v1227_v32 = vunpack.c.l.s8.bf16 %v1035_v29 }
  0xee   :  { %1549 = vmatpush1.bf16.msra.mxu1 %v1155_v37  ;;  %v1040_v37 = vld [vmem:[#allocation7 + $0x368] sm:$0xff] }
  0xef   :  { %1550 = vmatprep.subr.bf16.mxu1 %v1162_v39  ;;  %v1231_v39 = vunpack.c.h.s8.bf16 %v1033_v28  ;;  %v1238_v41 = vunpack.c.l.s8.bf16 %v1040_v37  ;;  %v1244_v46 = vunpack.c.h.s8.bf16 %v1040_v37 }
  0xf2   :  { %1551 = vmatpush1.bf16.msra.mxu1 %v1161_v42  ;;  %v1240_v42 = vunpack.c.l.s8.bf16 %v1042_v38 }
  0xf3   :  { %1552 = vmatprep.subr.bf16.mxu1 %v1168_v43  ;;  %v1041_v43 = vld [vmem:[#allocation7 + $0x370] sm:$0xff] }
  0xf6   :  { %1553 = vmatpush1.bf16.msra.mxu1 %v1167_v45  ;;  %v1239_v45 = vunpack.c.l.s8.bf16 %v1041_v43 }
  0xf7   :  { %1554 = vmatprep.subr.bf16.mxu1 %v1174_v47  ;;  %v1246_v47 = vunpack.c.h.s8.bf16 %v1042_v38 }
  0xfa   :  { %1555 = vmatpush1.bf16.msra.mxu1 %v1173_v48  ;;  %v1046_v48 = vld [vmem:[#allocation7 + $0x3c8] sm:$0xff] }
  0xfb   :  { %1556 = vmatprep.subr.bf16.mxu1 %v1180_v49  ;;  %v1048_v49 = vld [vmem:[#allocation7 + $0x3d8] sm:$0xff]  ;;  %v1250_v52 = vunpack.c.l.s8.bf16 %v1046_v48  ;;  %v1256_v59 = vunpack.c.h.s8.bf16 %v1046_v48  ;;  %v1065_v48 = vld [vmem:[#allocation7 + $0x4f0] sm:$0xff] }
  0xfe   :  { %1557 = vmatpush1.bf16.msra.mxu1 %v1179_v51  ;;  %v1245_v51 = vunpack.c.h.s8.bf16 %v1041_v43 }
  0xff   :  { %1558 = vmatprep.subr.bf16.mxu1 %v1186_v53  ;;  %v1252_v53 = vunpack.c.l.s8.bf16 %v1048_v49 }
 0x102   :  { %1559 = vmatpush1.bf16.msra.mxu1 %v1185_v54  ;;  %v1045_v54 = vld [vmem:[#allocation7 + $0x3c0] sm:$0xff] }
 0x103   :  { %1560 = vmatprep.subr.bf16.mxu1 %v1192_v55  ;;  %v1047_v55 = vld [vmem:[#allocation7 + $0x3d0] sm:$0xff]  ;;  %v1249_v56 = vunpack.c.l.s8.bf16 %v1045_v54 }
 0x106   :  { %1561 = vmatpush1.bf16.msra.mxu1 %v1191_v57  ;;  %v1251_v57 = vunpack.c.l.s8.bf16 %v1047_v55 }
 0x107   :  { %1562 = vmatprep.subr.bf16.mxu1 %v1198_v58 }
 0x10a   :  { %1563 = vmatpush1.bf16.msra.mxu1 %v1197_v60  ;;  %v1258_v60 = vunpack.c.h.s8.bf16 %v1048_v49 }
 0x10b   :  { %1564 = vmatprep.subr.bf16.mxu1 %v1204_v61 }
 0x10e   :  { %1565 = vmatpush1.bf16.msra.mxu1 %v1203_v63  ;;  %v1054_v63 = vld [vmem:[#allocation7 + $0x438] sm:$0xff] }
 0x10f   :  { %1566 = vmatprep.subr.bf16.mxu1 %v1210_v1 }
 0x112   :  { %1567 = vmatpush1.bf16.msra.mxu1 %v1209_v3  ;;  %v1255_v3 = vunpack.c.h.s8.bf16 %v1045_v54  ;;  %v1072_v54 = vld [vmem:[#allocation7 + $0x558] sm:$0xff] }
 0x113   :  { %1568 = vmatprep.subr.bf16.mxu1 %v1216_v4  ;;  %v1257_v4 = vunpack.c.h.s8.bf16 %v1047_v55 }
 0x116   :  { %1569 = vmatpush1.bf16.msra.mxu1 %v1215_v6  ;;  %v1262_v6 = vunpack.c.l.s8.bf16 %v1052_v62 }
 0x117   :  { %1570 = vmatprep.subr.bf16.mxu1 %v1222_v7  ;;  %v1264_v7 = vunpack.c.l.s8.bf16 %v1054_v63 }
 0x11a   :  { %1571 = vmatpush1.bf16.msra.mxu1 %v1221_v9  ;;  %v1053_v9 = vld [vmem:[#allocation7 + $0x430] sm:$0xff] }
 0x11b   :  { %1581 = vmatprep.subr.bf16.mxu1 %v1228_v10  ;;  %v1261_v10 = vunpack.c.l.s8.bf16 %v1051_v8  ;;  %v1263_v13 = vunpack.c.l.s8.bf16 %v1053_v9 }
 0x150   :  { %v724_v20 = vpop.f32.mrb[0].mxu1 }
 0x151   :  { %v967_v21 = vadd.f32 %v940_v18, %v724_v20  ;;  %v726_v22 = vpop.f32.mrb[1].mxu1  ;;  %v1268_v18 = vunpack.c.h.s8.bf16 %v1052_v62  ;;  %v1058_v20 = vld [vmem:[#allocation7 + $0x488] sm:$0xff]  ;;  %v1071_v62 = vld [vmem:[#allocation7 + $0x550] sm:$0xff] }
 0x152   :  { %v968_v23 = vadd.f32 %v944_v19, %v726_v22  ;;  %v728_v24 = vpop.f32.mrb[2].mxu1  ;;  %v1270_v19 = vunpack.c.h.s8.bf16 %v1054_v63  ;;  %v1274_v29 = vunpack.c.l.s8.bf16 %v1058_v20  ;;  %v5329_v63 = vsub.s32 2, %v5290_v12 }
 0x153   :  { %v973_v26 = vmax.f32 %v967_v21, 0.0  ;;  %v729_v27 = vpop.f32.mrb[3].mxu1  ;;  %v1060_v21 = vld [vmem:[#allocation7 + $0x498] sm:$0xff]  ;;  %v1267_v24 = vunpack.c.h.s8.bf16 %v1051_v8  ;;  %v1076_v8 = vld [vmem:[#allocation7 + $0x5a8] sm:$0xff] }
 0x154   :  { %v974_v25 = vmax.f32 %v968_v23, 0.0 }
 0x155   :  { %v5306_v33 = vpack.c.bf16 %v973_v26, %v973_v26  ;;  %v5313_v58 = vpop.f32.mrb[0].mxu0  ;;  %v1269_v26 = vunpack.c.h.s8.bf16 %v1053_v9  ;;  %v1078_v9 = vld [vmem:[#allocation7 + $0x5b8] sm:$0xff] }
 0x156   :  { %v5304_v30 = vpack.c.bf16 %v974_v25, %v974_v25  ;;  %v5315_v61 = vpop.f32.mrb[1].mxu0  ;;  %v1276_v25 = vunpack.c.l.s8.bf16 %v1060_v21 }
 0x157   :  { %v810_v1 = vpop.f32.mrb[2].mxu0 }
 0x158   :  { %1449 = vmatprep.mubr.bf16.mxu0 %v5304_v30  ;;  %1572 = vmatprep.mubr.bf16.mxu1 %v5304_v30  ;;  %v811_v2 = vpop.f32.mrb[3].mxu0 }
 0x159   :  { %1450 = vmatmul.mubr.bf16.vlgmr.msra.gmra.mrb[8].mxu0 %v5306_v33  ;;  %1573 = vmatmul.mubr.bf16.vlgmr.msra.gmra.mrb[16].mxu1 %v5306_v33  ;;  %v1299_v2 = vunpack.c.l.s8.bf16 %v1071_v62 }
 0x15a   :  { %1459 = vmatpush1.bf16.msra.mxu0 %v1225_v31  ;;  %1582 = vmatpush1.bf16.msra.mxu1 %v1227_v32  ;;  %v1057_v31 = vld [vmem:[#allocation7 + $0x480] sm:$0xff]  ;;  %v1059_v32 = vld [vmem:[#allocation7 + $0x490] sm:$0xff] }
 0x15b   :  { %1460 = vmatprep.subr.bf16.mxu0 %v1232_v34  ;;  %1583 = vmatprep.subr.bf16.mxu1 %v1234_v36  ;;  %v1273_v37 = vunpack.c.l.s8.bf16 %v1057_v31  ;;  %v1275_v38 = vunpack.c.l.s8.bf16 %v1059_v32  ;;  %v1279_v43 = vunpack.c.h.s8.bf16 %v1057_v31  ;;  %v1316_v31 = vunpack.c.h.s8.bf16 %v1076_v8 }
 0x15e   :  { %1461 = vmatpush1.bf16.msra.mxu0 %v1231_v39  ;;  %1584 = vmatpush1.bf16.msra.mxu1 %v1233_v40  ;;  %v1280_v40 = vunpack.c.h.s8.bf16 %v1058_v20  ;;  %v1305_v20 = vunpack.c.h.s8.bf16 %v1071_v62 }
 0x15f   :  { %1462 = vmatprep.subr.bf16.mxu0 %v1238_v41  ;;  %1585 = vmatprep.subr.bf16.mxu1 %v1240_v42  ;;  %v1282_v41 = vunpack.c.h.s8.bf16 %v1060_v21  ;;  %v1064_v42 = vld [vmem:[#allocation7 + $0x4e8] sm:$0xff]  ;;  %v1310_v21 = vunpack.c.l.s8.bf16 %v1076_v8 }
 0x162   :  { %1463 = vmatpush1.bf16.msra.mxu0 %v1237_v44  ;;  %1586 = vmatpush1.bf16.msra.mxu1 %v1239_v45  ;;  %v1281_v44 = vunpack.c.h.s8.bf16 %v1059_v32  ;;  %v1286_v45 = vunpack.c.l.s8.bf16 %v1064_v42  ;;  %v1318_v32 = vunpack.c.h.s8.bf16 %v1078_v9 }
 0x163   :  { %1464 = vmatprep.subr.bf16.mxu0 %v1244_v46  ;;  %1587 = vmatprep.subr.bf16.mxu1 %v1246_v47  ;;  %v1288_v46 = vunpack.c.l.s8.bf16 %v1066_v35  ;;  %v1063_v47 = vld [vmem:[#allocation7 + $0x4e0] sm:$0xff] }
 0x164   :  { %v1285_v49 = vunpack.c.l.s8.bf16 %v1063_v47  ;;  %v1291_v55 = vunpack.c.h.s8.bf16 %v1063_v47 }
 0x166   :  { %1465 = vmatpush1.bf16.msra.mxu0 %v1243_v50  ;;  %1588 = vmatpush1.bf16.msra.mxu1 %v1245_v51  ;;  %v1287_v50 = vunpack.c.l.s8.bf16 %v1065_v48  ;;  %v1292_v51 = vunpack.c.h.s8.bf16 %v1064_v42 }
 0x167   :  { %1466 = vmatprep.subr.bf16.mxu0 %v1250_v52  ;;  %1589 = vmatprep.subr.bf16.mxu1 %v1252_v53  ;;  %v1294_v52 = vunpack.c.h.s8.bf16 %v1066_v35  ;;  %v1070_v53 = vld [vmem:[#allocation7 + $0x548] sm:$0xff]  ;;  %v1081_v35 = vld [vmem:[#allocation7 + $0x600] sm:$0xff] }
 0x16a   :  { %1467 = vmatpush1.bf16.msra.mxu0 %v1249_v56  ;;  %1590 = vmatpush1.bf16.msra.mxu1 %v1251_v57  ;;  %v1293_v56 = vunpack.c.h.s8.bf16 %v1065_v48  ;;  %v1298_v57 = vunpack.c.l.s8.bf16 %v1070_v53 }
 0x16b   :  { %1468 = vmatprep.subr.bf16.mxu0 %v1256_v59  ;;  %1591 = vmatprep.subr.bf16.mxu1 %v1258_v60  ;;  %v1300_v59 = vunpack.c.l.s8.bf16 %v1072_v54  ;;  %v1069_v60 = vld [vmem:[#allocation7 + $0x540] sm:$0xff] }
 0x16c   :  { %v1297_v1 = vunpack.c.l.s8.bf16 %v1069_v60 }
 0x16e   :  { %1469 = vmatpush1.bf16.msra.mxu0 %v1255_v3  ;;  %1592 = vmatpush1.bf16.msra.mxu1 %v1257_v4  ;;  %v1304_v4 = vunpack.c.h.s8.bf16 %v1070_v53 }
 0x16f   :  { %1470 = vmatprep.subr.bf16.mxu0 %v1262_v6  ;;  %1593 = vmatprep.subr.bf16.mxu1 %v1264_v7  ;;  %v1306_v6 = vunpack.c.h.s8.bf16 %v1072_v54 }
 0x170   :  { %v5322_v22 = vpop.f32.mrb[4].mxu1 }
 0x171   :  { %v767_v23 = vpop.f32.mrb[5].mxu1 }
 0x172   :  { %1471 = vmatpush1.bf16.msra.mxu0 %v1261_v10  ;;  %1594 = vmatpush1.bf16.msra.mxu1 %v1263_v13  ;;  %v970_v27 = vadd.f32 %v952_v14, %v767_v23  ;;  %v769_v28 = vpop.f32.mrb[6].mxu1  ;;  %v5336_v10 = vsub.s32 5, %v5290_v12  ;;  %v948_v14 = vrot.slane %v5292_v15, %v5329_v63  ;;  %v1312_v23 = vunpack.c.l.s8.bf16 %v1078_v9 }
 0x173   :  { %1472 = vmatprep.subr.bf16.mxu0 %v1268_v18  ;;  %1595 = vmatprep.subr.bf16.mxu1 %v1270_v19  ;;  %v770_v34 = vpop.f32.mrb[7].mxu1  ;;  %v1303_v19 = vunpack.c.h.s8.bf16 %v1069_v60 }
 0x174   :  { %v976_v36 = vmax.f32 %v970_v27, 0.0  ;;  %v960_v27 = vrot.slane %v5292_v15, %v5336_v10  ;;  %v969_v28 = vadd.f32 %v948_v14, %v5322_v22  ;;  %v1082_v34 = vld [vmem:[#allocation7 + $0x608] sm:$0xff]  ;;  %v1093_v14 = vld [vmem:[#allocation7 + $0x6c0] sm:$0xff] }
 0x175   :  { %v5331_v3 = vpop.f32.mrb[4].mxu0  ;;  %v1322_v22 = vunpack.c.l.s8.bf16 %v1082_v34 }
 0x176   :  { %1473 = vmatpush1.bf16.msra.mxu0 %v1267_v24  ;;  %1596 = vmatpush1.bf16.msra.mxu1 %v1269_v26  ;;  %v5324_v39 = vpack.c.bf16 %v976_v36, %v976_v36  ;;  %v5333_v7 = vpop.f32.mrb[5].mxu0  ;;  %v1075_v24 = vld [vmem:[#allocation7 + $0x5a0] sm:$0xff]  ;;  %v1077_v26 = vld [vmem:[#allocation7 + $0x5b0] sm:$0xff]  ;;  %v1084_v36 = vld [vmem:[#allocation7 + $0x618] sm:$0xff] }
 0x177   :  { %1474 = vmatprep.subr.bf16.mxu0 %v1274_v29  ;;  %1597 = vmatprep.subr.bf16.mxu1 %v1276_v25  ;;  %v892_v13 = vpop.f32.mrb[6].mxu0  ;;  %v1309_v29 = vunpack.c.l.s8.bf16 %v1075_v24  ;;  %v1311_v25 = vunpack.c.l.s8.bf16 %v1077_v26  ;;  %v1324_v42 = vunpack.c.l.s8.bf16 %v1084_v36  ;;  %v1330_v48 = vunpack.c.h.s8.bf16 %v1084_v36 }
 0x178   :  { %1490 = vmatprep.mubr.bf16.mxu0 %v5324_v39  ;;  %1613 = vmatprep.mubr.bf16.mxu1 %v5324_v39  ;;  %v893_v18 = vpop.f32.mrb[7].mxu0 }
 0x179   :  { %v1095_v18 = vld [vmem:[#allocation7 + $0x6d0] sm:$0xff] }
 0x17a   :  { %1475 = vmatpush1.bf16.msra.mxu0 %v1273_v37  ;;  %1598 = vmatpush1.bf16.msra.mxu1 %v1275_v38  ;;  %v972_v37 = vadd.f32 %v960_v27, %v5315_v61  ;;  %v975_v38 = vmax.f32 %v969_v28, 0.0  ;;  %v1328_v61 = vunpack.c.h.s8.bf16 %v1082_v34  ;;  %v1351_v27 = vunpack.c.h.s8.bf16 %v1093_v14 }
 0x17b   :  { %1476 = vmatprep.subr.bf16.mxu0 %v1280_v40  ;;  %1599 = vmatprep.subr.bf16.mxu1 %v1282_v41  ;;  %v1315_v40 = vunpack.c.h.s8.bf16 %v1075_v24  ;;  %v1317_v41 = vunpack.c.h.s8.bf16 %v1077_v26  ;;  %v1100_v24 = vld [vmem:[#allocation7 + $0x728] sm:$0xff]  ;;  %v1102_v26 = vld [vmem:[#allocation7 + $0x738] sm:$0xff]  ;;  %v1353_v28 = vunpack.c.h.s8.bf16 %v1095_v18 }
 0x17e   :  { %1477 = vmatpush1.bf16.msra.mxu0 %v1279_v43  ;;  %1600 = vmatpush1.bf16.msra.mxu1 %v1281_v44  ;;  %v1083_v43 = vld [vmem:[#allocation7 + $0x610] sm:$0xff]  ;;  %v978_v44 = vmax.f32 %v972_v37, 0.0  ;;  %v1364_v37 = vunpack.c.h.s8.bf16 %v1100_v24 }
 0x17f   :  { %1478 = vmatprep.subr.bf16.mxu0 %v1286_v45  ;;  %1601 = vmatprep.subr.bf16.mxu1 %v1288_v46  ;;  %v5344_v45 = vpack.c.bf16 %v975_v38, %v975_v38  ;;  %v1321_v46 = vunpack.c.l.s8.bf16 %v1081_v35  ;;  %v1323_v47 = vunpack.c.l.s8.bf16 %v1083_v43  ;;  %v1329_v53 = vunpack.c.h.s8.bf16 %v1083_v43 }
 0x180   :  { %v1366_v38 = vunpack.c.h.s8.bf16 %v1102_v26 }
 0x182   :  { %1479 = vmatpush1.bf16.msra.mxu0 %v1285_v49  ;;  %1602 = vmatpush1.bf16.msra.mxu1 %v1287_v50  ;;  %v1088_v49 = vld [vmem:[#allocation7 + $0x668] sm:$0xff]  ;;  %v1090_v50 = vld [vmem:[#allocation7 + $0x678] sm:$0xff] }
 0x183   :  { %1480 = vmatprep.subr.bf16.mxu0 %v1292_v51  ;;  %1603 = vmatprep.subr.bf16.mxu1 %v1294_v52  ;;  %v5346_v51 = vpack.c.bf16 %v978_v44, %v978_v44  ;;  %v1327_v52 = vunpack.c.h.s8.bf16 %v1081_v35  ;;  %v1334_v54 = vunpack.c.l.s8.bf16 %v1088_v49  ;;  %v1340_v62 = vunpack.c.h.s8.bf16 %v1088_v49  ;;  %v1105_v44 = vld [vmem:[#allocation7 + $0x780] sm:$0xff] }
 0x186   :  { %1481 = vmatpush1.bf16.msra.mxu0 %v1291_v55  ;;  %1604 = vmatpush1.bf16.msra.mxu1 %v1293_v56  ;;  %v1336_v55 = vunpack.c.l.s8.bf16 %v1090_v50  ;;  %v1087_v56 = vld [vmem:[#allocation7 + $0x660] sm:$0xff] }
 0x187   :  { %1482 = vmatprep.subr.bf16.mxu0 %v1298_v57  ;;  %1605 = vmatprep.subr.bf16.mxu1 %v1300_v59  ;;  %v1089_v57 = vld [vmem:[#allocation7 + $0x670] sm:$0xff]  ;;  %v1333_v59 = vunpack.c.l.s8.bf16 %v1087_v56 }
 0x188   :  { %v1335_v60 = vunpack.c.l.s8.bf16 %v1089_v57  ;;  %v1341_v8 = vunpack.c.h.s8.bf16 %v1089_v57  ;;  %v1111_v57 = vld [vmem:[#allocation7 + $0x7e0] sm:$0xff] }
 0x18a   :  { %1483 = vmatpush1.bf16.msra.mxu0 %v1297_v1  ;;  %1606 = vmatpush1.bf16.msra.mxu1 %v1299_v2  ;;  %v1342_v1 = vunpack.c.h.s8.bf16 %v1090_v50  ;;  %v1094_v2 = vld [vmem:[#allocation7 + $0x6c8] sm:$0xff] }
 0x18b   :  { %1484 = vmatprep.subr.bf16.mxu0 %v1304_v4  ;;  %1607 = vmatprep.subr.bf16.mxu1 %v1306_v6  ;;  %v1096_v4 = vld [vmem:[#allocation7 + $0x6d8] sm:$0xff]  ;;  %v1339_v6 = vunpack.c.h.s8.bf16 %v1087_v56  ;;  %v1346_v9 = vunpack.c.l.s8.bf16 %v1094_v2  ;;  %v1112_v50 = vld [vmem:[#allocation7 + $0x7e8] sm:$0xff] }
 0x18c   :  { %v1348_v13 = vunpack.c.l.s8.bf16 %v1096_v4 }
 0x18e   :  { %1485 = vmatpush1.bf16.msra.mxu0 %v1303_v19  ;;  %1608 = vmatpush1.bf16.msra.mxu1 %v1305_v20  ;;  %v1345_v19 = vunpack.c.l.s8.bf16 %v1093_v14  ;;  %v1347_v20 = vunpack.c.l.s8.bf16 %v1095_v18  ;;  %v1117_v18 = vld [vmem:[#allocation7 + $0x840] sm:$0xff] }
 0x18f   :  { %1486 = vmatprep.subr.bf16.mxu0 %v1310_v21  ;;  %1609 = vmatprep.subr.bf16.mxu1 %v1312_v23  ;;  %v1352_v21 = vunpack.c.h.s8.bf16 %v1094_v2  ;;  %v1354_v23 = vunpack.c.h.s8.bf16 %v1096_v4  ;;  %v1118_v4 = vld [vmem:[#allocation7 + $0x848] sm:$0xff] }
 0x192   :  { %1487 = vmatpush1.bf16.msra.mxu0 %v1309_v29  ;;  %1610 = vmatpush1.bf16.msra.mxu1 %v1311_v25  ;;  %v1358_v29 = vunpack.c.l.s8.bf16 %v1100_v24  ;;  %v1360_v25 = vunpack.c.l.s8.bf16 %v1102_v26  ;;  %v1400_v24 = vunpack.c.h.s8.bf16 %v1118_v4 }
 0x193   :  { %1488 = vmatprep.subr.bf16.mxu0 %v1316_v31  ;;  %1611 = vmatprep.subr.bf16.mxu1 %v1318_v32  ;;  %v1099_v31 = vld [vmem:[#allocation7 + $0x720] sm:$0xff]  ;;  %v1101_v32 = vld [vmem:[#allocation7 + $0x730] sm:$0xff] }
 0x194   :  { %v1357_v34 = vunpack.c.l.s8.bf16 %v1099_v31  ;;  %v1359_v36 = vunpack.c.l.s8.bf16 %v1101_v32 }
 0x196   :  { %1489 = vmatpush1.bf16.msra.mxu0 %v1315_v40  ;;  %1612 = vmatpush1.bf16.msra.mxu1 %v1317_v41  ;;  %v1106_v40 = vld [vmem:[#allocation7 + $0x788] sm:$0xff]  ;;  %v1108_v41 = vld [vmem:[#allocation7 + $0x798] sm:$0xff] }
 0x197   :  { %1499 = vmatprep.subr.bf16.mxu0 %v1322_v22  ;;  %1622 = vmatprep.subr.bf16.mxu1 %v1324_v42  ;;  %v1363_v22 = vunpack.c.h.s8.bf16 %v1099_v31  ;;  %v1365_v42 = vunpack.c.h.s8.bf16 %v1101_v32  ;;  %v1370_v35 = vunpack.c.l.s8.bf16 %v1106_v40  ;;  %v1372_v43 = vunpack.c.l.s8.bf16 %v1108_v41 }
 0x198   :  { %v1378_v49 = vunpack.c.h.s8.bf16 %v1108_v41 }
 0x199   :  { %1491 = vmatmul.mubr.bf16.vlgmr.msra.gmra.mrb[8].mxu0 %v5344_v45  ;;  %1614 = vmatmul.mubr.bf16.vlgmr.msra.gmra.mrb[16].mxu1 %v5344_v45 }
 0x19a   :  { %1500 = vmatpush1.bf16.msra.mxu0 %v1321_v46  ;;  %1623 = vmatpush1.bf16.msra.mxu1 %v1323_v47  ;;  %v1107_v46 = vld [vmem:[#allocation7 + $0x790] sm:$0xff]  ;;  %v1369_v47 = vunpack.c.l.s8.bf16 %v1105_v44 }
 0x19b   :  { %1501 = vmatprep.subr.bf16.mxu0 %v1328_v61  ;;  %1624 = vmatprep.subr.bf16.mxu1 %v1330_v48  ;;  %v1371_v61 = vunpack.c.l.s8.bf16 %v1107_v46  ;;  %v1376_v48 = vunpack.c.h.s8.bf16 %v1106_v40 }
 0x19c   :  { %1531 = vmatprep.mubr.bf16.mxu0 %v5346_v51  ;;  %1654 = vmatprep.mubr.bf16.mxu1 %v5346_v51 }
 0x19e   :  { %1502 = vmatpush1.bf16.msra.mxu0 %v1327_v52  ;;  %1625 = vmatpush1.bf16.msra.mxu1 %v1329_v53  ;;  %v1114_v52 = vld [vmem:[#allocation7 + $0x7f8] sm:$0xff]  ;;  %v1375_v53 = vunpack.c.h.s8.bf16 %v1105_v44 }
 0x19f   :  { %1503 = vmatprep.subr.bf16.mxu0 %v1334_v54  ;;  %1626 = vmatprep.subr.bf16.mxu1 %v1336_v55  ;;  %v1377_v54 = vunpack.c.h.s8.bf16 %v1107_v46  ;;  %v1382_v55 = vunpack.c.l.s8.bf16 %v1112_v50  ;;  %v1384_v56 = vunpack.c.l.s8.bf16 %v1114_v52  ;;  %v1390_v2 = vunpack.c.h.s8.bf16 %v1114_v52  ;;  %v989_v46 = vld [vmem:[#allocation7 + $0x20] sm:$0xff] }
 0x1a0   :  { %v995_v52 = vld [vmem:[#allocation7 + $0x80] sm:$0xff] }
 0x1a2   :  { %1504 = vmatpush1.bf16.msra.mxu0 %v1333_v59  ;;  %1627 = vmatpush1.bf16.msra.mxu1 %v1335_v60  ;;  %v1113_v59 = vld [vmem:[#allocation7 + $0x7f0] sm:$0xff]  ;;  %v1381_v60 = vunpack.c.l.s8.bf16 %v1111_v57 }
 0x1a3   :  { %1505 = vmatprep.subr.bf16.mxu0 %v1340_v62  ;;  %1628 = vmatprep.subr.bf16.mxu1 %v1342_v1  ;;  %v1383_v62 = vunpack.c.l.s8.bf16 %v1113_v59  ;;  %v1388_v1 = vunpack.c.h.s8.bf16 %v1112_v50 }
 0x1a6   :  { %1506 = vmatpush1.bf16.msra.mxu0 %v1339_v6  ;;  %1629 = vmatpush1.bf16.msra.mxu1 %v1341_v8  ;;  %v1120_v6 = vld [vmem:[#allocation7 + $0x858] sm:$0xff]  ;;  %v1387_v8 = vunpack.c.h.s8.bf16 %v1111_v57 }
 0x1a7   :  { %1507 = vmatprep.subr.bf16.mxu0 %v1346_v9  ;;  %1630 = vmatprep.subr.bf16.mxu1 %v1348_v13  ;;  %v1389_v9 = vunpack.c.h.s8.bf16 %v1113_v59  ;;  %v1394_v13 = vunpack.c.l.s8.bf16 %v1118_v4  ;;  %v1396_v14 = vunpack.c.l.s8.bf16 %v1120_v6  ;;  %v1402_v26 = vunpack.c.h.s8.bf16 %v1120_v6  ;;  %v1001_v59 = vld [vmem:[#allocation7 + $0xe0] sm:$0xff] }
 0x1a8   :  { %v1007_v6 = vld [vmem:[#allocation7 + $0x140] sm:$0xff] }
 0x1aa   :  { %1508 = vmatpush1.bf16.msra.mxu0 %v1345_v19  ;;  %1631 = vmatpush1.bf16.msra.mxu1 %v1347_v20  ;;  %v1119_v19 = vld [vmem:[#allocation7 + $0x850] sm:$0xff]  ;;  %v1393_v20 = vunpack.c.l.s8.bf16 %v1117_v18 }
 0x1ab   :  { %1509 = vmatprep.subr.bf16.mxu0 %v1352_v21  ;;  %1632 = vmatprep.subr.bf16.mxu1 %v1354_v23  ;;  %v1395_v21 = vunpack.c.l.s8.bf16 %v1119_v19  ;;  %v5353_v23 = vsub.s32 4, %v5290_v12 }
 0x1ad   :  { %v956_v31 = vrot.slane %v5292_v15, %v5353_v23 }
 0x1ae   :  { %1510 = vmatpush1.bf16.msra.mxu0 %v1351_v27  ;;  %1633 = vmatpush1.bf16.msra.mxu1 %v1353_v28  ;;  %v1124_v27 = vld [vmem:[#allocation7 + $0x8a8] sm:$0xff]  ;;  %v1126_v28 = vld [vmem:[#allocation7 + $0x8b8] sm:$0xff] }
 0x1af   :  { %1511 = vmatprep.subr.bf16.mxu0 %v1358_v29  ;;  %1634 = vmatprep.subr.bf16.mxu1 %v1360_v25  ;;  %v1399_v29 = vunpack.c.h.s8.bf16 %v1117_v18  ;;  %v1401_v25 = vunpack.c.h.s8.bf16 %v1119_v19  ;;  %v1406_v32 = vunpack.c.l.s8.bf16 %v1124_v27  ;;  %v971_v40 = vadd.f32 %v956_v31, %v5313_v58  ;;  %v1014_v19 = vld [vmem:[#allocation7 + $0x1a8] sm:$0xff]  ;;  %v1019_v31 = vld [vmem:[#allocation7 + $0x200] sm:$0xff] }
 0x1b0   :  { %v1412_v41 = vunpack.c.h.s8.bf16 %v1124_v27  ;;  %v1188_v27 = vunpack.c.h.s8.bf16 %v1014_v19 }
 0x1b2   :  { %1512 = vmatpush1.bf16.msra.mxu0 %v1357_v34  ;;  %1635 = vmatpush1.bf16.msra.mxu1 %v1359_v36  ;;  %v1408_v34 = vunpack.c.l.s8.bf16 %v1126_v28  ;;  %v1123_v36 = vld [vmem:[#allocation7 + $0x8a0] sm:$0xff] }
 0x1b3   :  { %1513 = vmatprep.subr.bf16.mxu0 %v1364_v37  ;;  %1636 = vmatprep.subr.bf16.mxu1 %v1366_v38  ;;  %v1125_v37 = vld [vmem:[#allocation7 + $0x8b0] sm:$0xff]  ;;  %v1405_v12 = vunpack.c.l.s8.bf16 %v1123_v36  ;;  %v1411_v15 = vunpack.c.h.s8.bf16 %v1123_v36  ;;  %v1026_v36 = vld [vmem:[#allocation7 + $0x268] sm:$0xff] }
 0x1b4   :  { %v1407_v38 = vunpack.c.l.s8.bf16 %v1125_v37 }
 0x1b6   :  { %1514 = vmatpush1.bf16.msra.mxu0 %v1363_v22  ;;  %1637 = vmatpush1.bf16.msra.mxu1 %v1365_v42  ;;  %v1414_v22 = vunpack.c.h.s8.bf16 %v1126_v28  ;;  %v990_v42 = vld [vmem:[#allocation7 + $0x28] sm:$0xff] }
 0x1b7   :  { %1515 = vmatprep.subr.bf16.mxu0 %v1370_v35  ;;  %1638 = vmatprep.subr.bf16.mxu1 %v1372_v43  ;;  %v1413_v35 = vunpack.c.h.s8.bf16 %v1125_v37  ;;  %v977_v43 = vmax.f32 %v971_v40, 0.0  ;;  %v1134_v44 = vunpack.c.l.s8.bf16 %v990_v42  ;;  %v1140_v58 = vunpack.c.h.s8.bf16 %v990_v42  ;;  %v1020_v28 = vld [vmem:[#allocation7 + $0x208] sm:$0xff] }
 0x1b8   :  { %v1199_v37 = vunpack.c.h.s8.bf16 %v1019_v31 }
 0x1ba   :  { %1516 = vmatpush1.bf16.msra.mxu0 %v1369_v47  ;;  %1639 = vmatpush1.bf16.msra.mxu1 %v1371_v61  ;;  %v1133_v47 = vunpack.c.l.s8.bf16 %v989_v46  ;;  %v5358_v61 = vpack.c.bf16 %v977_v43, %v977_v43  ;;  %v1031_v43 = vld [vmem:[#allocation7 + $0x2c0] sm:$0xff] }
 0x1bb   :  { %1517 = vmatprep.subr.bf16.mxu0 %v1376_v48  ;;  %1640 = vmatprep.subr.bf16.mxu1 %v1378_v49  ;;  %v996_v48 = vld [vmem:[#allocation7 + $0x88] sm:$0xff]  ;;  %v1139_v49 = vunpack.c.h.s8.bf16 %v989_v46 }
 0x1bc   :  { %v1146_v50 = vunpack.c.l.s8.bf16 %v996_v48 }
 0x1be   :  { %1518 = vmatpush1.bf16.msra.mxu0 %v1375_v53  ;;  %1641 = vmatpush1.bf16.msra.mxu1 %v1377_v54  ;;  %v1145_v53 = vunpack.c.l.s8.bf16 %v995_v52  ;;  %v1152_v54 = vunpack.c.h.s8.bf16 %v996_v48 }
 0x1bf   :  { %1519 = vmatprep.subr.bf16.mxu0 %v1382_v55  ;;  %1642 = vmatprep.subr.bf16.mxu1 %v1384_v56  ;;  %v1002_v55 = vld [vmem:[#allocation7 + $0xe8] sm:$0xff]  ;;  %v1151_v56 = vunpack.c.h.s8.bf16 %v995_v52 }
 0x1c0   :  { %v1158_v57 = vunpack.c.l.s8.bf16 %v1002_v55 }
 0x1c2   :  { %1520 = vmatpush1.bf16.msra.mxu0 %v1381_v60  ;;  %1643 = vmatpush1.bf16.msra.mxu1 %v1383_v62  ;;  %v1157_v60 = vunpack.c.l.s8.bf16 %v1001_v59  ;;  %v1164_v62 = vunpack.c.h.s8.bf16 %v1002_v55  ;;  %v4850_v55 = vld [vmem:[#allocation8] ss:$8 sps:$4 sm:$0xff]  }
 0x1c3   :  { %1521 = vmatprep.subr.bf16.mxu0 %v1388_v1  ;;  %1644 = vmatprep.subr.bf16.mxu1 %v1390_v2  ;;  %v1008_v1 = vld [vmem:[#allocation7 + $0x148] sm:$0xff]  ;;  %v5363_v2 = vpop.f32.mrb[8].mxu1 }
 0x1c4   :  { %v1170_v4 = vunpack.c.l.s8.bf16 %v1008_v1  ;;  %v1176_v18 = vunpack.c.h.s8.bf16 %v1008_v1  ;;  %v4853_v1 = vld [vmem:[#allocation8 + $0xa0] ss:$8 sps:$4 sm:$0xff]  }
 0x1c6   :  { %1522 = vmatpush1.bf16.msra.mxu0 %v1387_v8  ;;  %1645 = vmatpush1.bf16.msra.mxu1 %v1389_v9  ;;  %v5365_v8 = vpop.f32.mrb[9].mxu1 }
 0x1c7   :  { %1523 = vmatprep.subr.bf16.mxu0 %v1394_v13  ;;  %1646 = vmatprep.subr.bf16.mxu1 %v1396_v14  ;;  %v851_v9 = vpop.f32.mrb[10].mxu1  ;;  %v1169_v14 = vunpack.c.l.s8.bf16 %v1007_v6 }
 0x1c8   :  { %v852_v13 = vpop.f32.mrb[11].mxu1  ;;  %v4854_v9 = vld [vmem:[#allocation8 + $0x20] ss:$8 sps:$4 sm:$0xff]  }
 0x1c9   :  { %v4855_v13 = vld [vmem:[#allocation8 + $0xb0] ss:$8 sps:$4 sm:$0xff]  }
 0x1ca   :  { %1524 = vmatpush1.bf16.msra.mxu0 %v1393_v20  ;;  %1647 = vmatpush1.bf16.msra.mxu1 %v1395_v21  ;;  %v1175_v20 = vunpack.c.h.s8.bf16 %v1007_v6  ;;  %v1182_v21 = vunpack.c.l.s8.bf16 %v1014_v19  ;;  %v1043_v6 = vld [vmem:[#allocation7 + $0x380] sm:$0xff]  ;;  %v1050_v19 = vld [vmem:[#allocation7 + $0x3e8] sm:$0xff] }
 0x1cb   :  { %1525 = vmatprep.subr.bf16.mxu0 %v1400_v24  ;;  %1648 = vmatprep.subr.bf16.mxu1 %v1402_v26  ;;  %v1013_v24 = vld [vmem:[#allocation7 + $0x1a0] sm:$0xff] }
 0x1cc   :  { %v1181_v26 = vunpack.c.l.s8.bf16 %v1013_v24 }
 0x1ce   :  { %1526 = vmatpush1.bf16.msra.mxu0 %v1399_v29  ;;  %1649 = vmatpush1.bf16.msra.mxu1 %v1401_v25  ;;  %v1187_v29 = vunpack.c.h.s8.bf16 %v1013_v24  ;;  %v1194_v25 = vunpack.c.l.s8.bf16 %v1020_v28  ;;  %v1049_v24 = vld [vmem:[#allocation7 + $0x3e0] sm:$0xff] }
 0x1cf   :  { %1527 = vmatprep.subr.bf16.mxu0 %v1406_v32  ;;  %1650 = vmatprep.subr.bf16.mxu1 %v1408_v34  ;;  %v1193_v32 = vunpack.c.l.s8.bf16 %v1019_v31  ;;  %v1200_v34 = vunpack.c.h.s8.bf16 %v1020_v28  ;;  %v1253_v28 = vunpack.c.l.s8.bf16 %v1049_v24  ;;  %v4860_v31 = vld [vmem:[#allocation8 + $0x50] ss:$8 sps:$4 sm:$0xff]  }
 0x1d2   :  { %1528 = vmatpush1.bf16.msra.mxu0 %v1405_v12  ;;  %1651 = vmatpush1.bf16.msra.mxu1 %v1407_v38  ;;  %v1206_v12 = vunpack.c.l.s8.bf16 %v1026_v36  ;;  %v1025_v38 = vld [vmem:[#allocation7 + $0x260] sm:$0xff] }
 0x1d3   :  { %1529 = vmatprep.subr.bf16.mxu0 %v1412_v41  ;;  %1652 = vmatprep.subr.bf16.mxu1 %v1414_v22  ;;  %v1205_v40 = vunpack.c.l.s8.bf16 %v1025_v38  ;;  %v1212_v41 = vunpack.c.h.s8.bf16 %v1026_v36  ;;  %v1032_v22 = vld [vmem:[#allocation7 + $0x2c8] sm:$0xff]  ;;  %v1211_v42 = vunpack.c.h.s8.bf16 %v1025_v38  ;;  %v1055_v36 = vld [vmem:[#allocation7 + $0x440] sm:$0xff] }
 0x1d4   :  { %v1224_v48 = vunpack.c.h.s8.bf16 %v1032_v22  ;;  %v1265_v38 = vunpack.c.l.s8.bf16 %v1055_v36 }
 0x1d6   :  { %1530 = vmatpush1.bf16.msra.mxu0 %v1411_v15  ;;  %1653 = vmatpush1.bf16.msra.mxu1 %v1413_v35  ;;  %v5367_v15 = vpop.f32.mrb[12].mxu1  ;;  %v1218_v35 = vunpack.c.l.s8.bf16 %v1032_v22  ;;  %v4863_v22 = vld [vmem:[#allocation8 + $0xf0] ss:$8 sps:$4 sm:$0xff]  }
 0x1d7   :  { %1663 = vmatprep.subr.bf16.mxu0 %v1134_v44  ;;  %v5369_v44 = vpop.f32.mrb[13].mxu1 }
 0x1d8   :  { %v933_v46 = vpop.f32.mrb[14].mxu1 }
 0x1d9   :  { %1532 = vmatmul.mubr.bf16.vlgmr.msra.gmra.mrb[8].mxu0 %v5358_v61  ;;  %1655 = vmatmul.mubr.bf16.vlgmr.msra.gmra.mrb[16].mxu1 %v5358_v61  ;;  %v1061_v46 = vld [vmem:[#allocation7 + $0x4a0] sm:$0xff] }
 0x1da   :  { %1664 = vmatpush1.bf16.msra.mxu0 %v1133_v47  ;;  %1695 = vmatprep.mubr.bf16.mxu0 %v5304_v30  ;;  %v1163_v30 = vunpack.c.h.s8.bf16 %v1001_v59  ;;  %v934_v47 = vpop.f32.mrb[15].mxu1  ;;  %v1044_v59 = vld [vmem:[#allocation7 + $0x388] sm:$0xff] }
 0x1db   :  { %1665 = vmatprep.subr.bf16.mxu0 %v1140_v58  ;;  %v1217_v58 = vunpack.c.l.s8.bf16 %v1031_v43  ;;  %v4865_v47 = vld [vmem:[#allocation8 + $0x180] ss:$8 sps:$4 sm:$0xff]  }
 0x1de   :  { %1666 = vmatpush1.bf16.msra.mxu0 %v1139_v49  ;;  %v1038_v49 = vld [vmem:[#allocation7 + $0x328] sm:$0xff] }
 0x1df   :  { %1667 = vmatprep.subr.bf16.mxu0 %v1146_v50  ;;  %v1223_v50 = vunpack.c.h.s8.bf16 %v1031_v43  ;;  %v1230_v52 = vunpack.c.l.s8.bf16 %v1038_v49 }
 0x1e2   :  { %1668 = vmatpush1.bf16.msra.mxu0 %v1145_v53  ;;  %v1037_v53 = vld [vmem:[#allocation7 + $0x320] sm:$0xff] }
 0x1e3   :  { %1669 = vmatprep.subr.bf16.mxu0 %v1152_v54  ;;  %v4849_v54 = vld [vmem:[#allocation8 + $0x80] ss:$8 sps:$4 sm:$0xff]  }
 0x1e4   :  { %4511 = vmatprep.subr.bf16.mxu1 %v4849_v54 }
 0x1e5   :  { %4512 = vmatpush3.bf16.msra.mxu1 %v4850_v55 }
 0x1e6   :  { %1670 = vmatpush1.bf16.msra.mxu0 %v1151_v56  ;;  %v1229_v56 = vunpack.c.l.s8.bf16 %v1037_v53 }
 0x1e7   :  { %1671 = vmatprep.subr.bf16.mxu0 %v1158_v57  ;;  %v1236_v57 = vunpack.c.h.s8.bf16 %v1038_v49  ;;  %v1068_v49 = vld [vmem:[#allocation7 + $0x508] sm:$0xff] }
 0x1e8   :  { %v1296_v55 = vunpack.c.h.s8.bf16 %v1068_v49 }
 0x1ea   :  { %1672 = vmatpush1.bf16.msra.mxu0 %v1157_v60  ;;  %v4851_v60 = vld [vmem:[#allocation8 + $0x90] ss:$8 sps:$4 sm:$0xff]  }
 0x1eb   :  { %1673 = vmatprep.subr.bf16.mxu0 %v1164_v62  ;;  %v4852_v62 = vld [vmem:[#allocation8 + $0x10] ss:$8 sps:$4 sm:$0xff]   ;;  %4513 = vmatprep.subr.bf16.mxu1 %v4851_v60  ;;  %v1073_v60 = vld [vmem:[#allocation7 + $0x560] sm:$0xff] }
 0x1ec   :  { %4514 = vmatpush3.bf16.msra.mxu1 %v4852_v62  ;;  %v1301_v62 = vunpack.c.l.s8.bf16 %v1073_v60 }
 0x1ed   :  { %4515 = vmatprep.subr.bf16.mxu1 %v4853_v1 }
 0x1ee   :  { %1674 = vmatpush1.bf16.msra.mxu0 %v1163_v30  ;;  %v1235_v30 = vunpack.c.h.s8.bf16 %v1037_v53  ;;  %v1067_v53 = vld [vmem:[#allocation7 + $0x500] sm:$0xff] }
 0x1ef   :  { %1675 = vmatprep.subr.bf16.mxu0 %v1170_v4  ;;  %v1242_v4 = vunpack.c.l.s8.bf16 %v1044_v59  ;;  %v1289_v54 = vunpack.c.l.s8.bf16 %v1067_v53 }
 0x1f0   :  { %4516 = vmatpush3.bf16.msra.mxu1 %v4854_v9  ;;  %v1079_v9 = vld [vmem:[#allocation7 + $0x5c0] sm:$0xff] }
 0x1f1   :  { %4517 = vmatprep.subr.bf16.mxu1 %v4855_v13  ;;  %v1313_v13 = vunpack.c.l.s8.bf16 %v1079_v9 }
 0x1f2   :  { %1676 = vmatpush1.bf16.msra.mxu0 %v1169_v14  ;;  %v1241_v14 = vunpack.c.l.s8.bf16 %v1043_v6 }
 0x1f3   :  { %1677 = vmatprep.subr.bf16.mxu0 %v1176_v18  ;;  %v1248_v18 = vunpack.c.h.s8.bf16 %v1044_v59 }
 0x1f6   :  { %1678 = vmatpush1.bf16.msra.mxu0 %v1175_v20  ;;  %v4857_v20 = vld [vmem:[#allocation8 + $0xc0] ss:$8 sps:$4 sm:$0xff]  }
 0x1f7   :  { %1679 = vmatprep.subr.bf16.mxu0 %v1182_v21  ;;  %v1254_v21 = vunpack.c.l.s8.bf16 %v1050_v19 }
 0x1fa   :  { %1680 = vmatpush1.bf16.msra.mxu0 %v1181_v26  ;;  %v4858_v26 = vld [vmem:[#allocation8 + $0x40] ss:$8 sps:$4 sm:$0xff]  }
 0x1fb   :  { %1681 = vmatprep.subr.bf16.mxu0 %v1188_v27  ;;  %v4859_v27 = vld [vmem:[#allocation8 + $0xd0] ss:$8 sps:$4 sm:$0xff]  }
 0x1fe   :  { %1682 = vmatpush1.bf16.msra.mxu0 %v1187_v29  ;;  %v1260_v29 = vunpack.c.h.s8.bf16 %v1050_v19  ;;  %v1319_v19 = vunpack.c.h.s8.bf16 %v1079_v9 }
 0x1ff   :  { %1683 = vmatprep.subr.bf16.mxu0 %v1194_v25  ;;  %v1056_v25 = vld [vmem:[#allocation7 + $0x448] sm:$0xff] }
 0x202   :  { %1684 = vmatpush1.bf16.msra.mxu0 %v1193_v32  ;;  %v1259_v32 = vunpack.c.h.s8.bf16 %v1049_v24  ;;  %v1092_v24 = vld [vmem:[#allocation7 + $0x688] sm:$0xff] }
 0x203   :  { %1685 = vmatprep.subr.bf16.mxu0 %v1200_v34  ;;  %v1266_v34 = vunpack.c.l.s8.bf16 %v1056_v25 }
 0x206   :  { %1686 = vmatpush1.bf16.msra.mxu0 %v1199_v37  ;;  %v4861_v37 = vld [vmem:[#allocation8 + $0xe0] ss:$8 sps:$4 sm:$0xff]  }
 0x207   :  { %1687 = vmatprep.subr.bf16.mxu0 %v1206_v12  ;;  %v4862_v12 = vld [vmem:[#allocation8 + $0x60] ss:$8 sps:$4 sm:$0xff]  }
 0x20a   :  { %1688 = vmatpush1.bf16.msra.mxu0 %v1205_v40  ;;  %v1272_v40 = vunpack.c.h.s8.bf16 %v1056_v25  ;;  %v1344_v25 = vunpack.c.h.s8.bf16 %v1092_v24 }
 0x20b   :  { %1689 = vmatprep.subr.bf16.mxu0 %v1212_v41  ;;  %v1062_v41 = vld [vmem:[#allocation7 + $0x4a8] sm:$0xff] }
 0x20c   :  { %v1278_v43 = vunpack.c.l.s8.bf16 %v1062_v41 }
 0x20e   :  { %1690 = vmatpush1.bf16.msra.mxu0 %v1211_v42  ;;  %v4864_v42 = vld [vmem:[#allocation8 + $0x70] ss:$8 sps:$4 sm:$0xff]  }
 0x20f   :  { %1691 = vmatprep.subr.bf16.mxu0 %v1218_v35  ;;  %v1271_v35 = vunpack.c.h.s8.bf16 %v1055_v36  ;;  %v1097_v36 = vld [vmem:[#allocation7 + $0x6e0] sm:$0xff] }
 0x212   :  { %1692 = vmatpush1.bf16.msra.mxu0 %v1217_v58  ;;  %v1277_v58 = vunpack.c.l.s8.bf16 %v1061_v46 }
 0x213   :  { %1693 = vmatprep.subr.bf16.mxu0 %v1224_v48  ;;  %v1284_v48 = vunpack.c.h.s8.bf16 %v1062_v41 }
 0x216   :  { %1694 = vmatpush1.bf16.msra.mxu0 %v1223_v50  ;;  %v1283_v50 = vunpack.c.h.s8.bf16 %v1061_v46  ;;  %v1109_v46 = vld [vmem:[#allocation7 + $0x7a0] sm:$0xff] }
 0x217   :  { %1704 = vmatprep.subr.bf16.mxu0 %v1230_v52  ;;  %v1290_v52 = vunpack.c.l.s8.bf16 %v1068_v49  ;;  %v1379_v49 = vunpack.c.h.s8.bf16 %v1109_v46 }
 0x219   :  { %1696 = vmatmul.mubr.bf16.vlgmr.msra.gmra.mrb[12].mxu0 %v5306_v33  ;;  %v4856_v33 = vld [vmem:[#allocation8 + $0x30] ss:$8 sps:$4 sm:$0xff]  }
 0x21a   :  { %1705 = vmatpush1.bf16.msra.mxu0 %v1229_v56  ;;  %1736 = vmatprep.mubr.bf16.mxu0 %v5324_v39  ;;  %v1247_v39 = vunpack.c.h.s8.bf16 %v1043_v6  ;;  %v1074_v56 = vld [vmem:[#allocation7 + $0x568] sm:$0xff] }
 0x21b   :  { %1706 = vmatprep.subr.bf16.mxu0 %v1236_v57  ;;  %4518 = vmatpush3.bf16.msra.mxu1 %v4856_v33  ;;  %v1295_v57 = vunpack.c.h.s8.bf16 %v1067_v53  ;;  %v1302_v59 = vunpack.c.l.s8.bf16 %v1074_v56  ;;  %v1308_v1 = vunpack.c.h.s8.bf16 %v1074_v56 }
 0x21c   :  { %4519 = vmatprep.subr.bf16.mxu1 %v4857_v20  ;;  %v1085_v20 = vld [vmem:[#allocation7 + $0x620] sm:$0xff] }
 0x21e   :  { %1707 = vmatpush1.bf16.msra.mxu0 %v1235_v30  ;;  %v1080_v30 = vld [vmem:[#allocation7 + $0x5c8] sm:$0xff] }
 0x21f   :  { %1708 = vmatprep.subr.bf16.mxu0 %v1242_v4  ;;  %4520 = vmatpush3.bf16.msra.mxu1 %v4858_v26  ;;  %v1307_v4 = vunpack.c.h.s8.bf16 %v1073_v60  ;;  %v1314_v6 = vunpack.c.l.s8.bf16 %v1080_v30  ;;  %v1331_v26 = vunpack.c.h.s8.bf16 %v1085_v20 }
 0x220   :  { %4521 = vmatprep.subr.bf16.mxu1 %v4859_v27  ;;  %v1338_v27 = vunpack.c.l.s8.bf16 %v1092_v24 }
 0x222   :  { %1709 = vmatpush1.bf16.msra.mxu0 %v1241_v14  ;;  %v1320_v14 = vunpack.c.h.s8.bf16 %v1080_v30 }
 0x223   :  { %1710 = vmatprep.subr.bf16.mxu0 %v1248_v18  ;;  %4522 = vmatpush3.bf16.msra.mxu1 %v4860_v31  ;;  %v1086_v18 = vld [vmem:[#allocation7 + $0x628] sm:$0xff] }
 0x224   :  { %4523 = vmatprep.subr.bf16.mxu1 %v4861_v37  ;;  %v1326_v33 = vunpack.c.l.s8.bf16 %v1086_v18  ;;  %v1098_v31 = vld [vmem:[#allocation7 + $0x6e8] sm:$0xff]  ;;  %v1349_v37 = vunpack.c.l.s8.bf16 %v1097_v36 }
 0x226   :  { %1711 = vmatpush1.bf16.msra.mxu0 %v1247_v39  ;;  %v1325_v39 = vunpack.c.l.s8.bf16 %v1085_v20  ;;  %v94_v20 = vld [vmem:[#allocation10 + $0x1] ss:$8 sm:$0x30] }
 0x227   :  { %1712 = vmatprep.subr.bf16.mxu0 %v1254_v21  ;;  %4524 = vmatpush3.bf16.msra.mxu1 %v4862_v12  ;;  %v1332_v21 = vunpack.c.h.s8.bf16 %v1086_v18  ;;  %v1104_v12 = vld [vmem:[#allocation7 + $0x748] sm:$0xff] }
 0x228   :  { %4525 = vmatprep.subr.bf16.mxu1 %v4863_v22  ;;  %v1368_v22 = vunpack.c.h.s8.bf16 %v1104_v12  ;;  %v107_v18 = vld [vmem:[#allocation10 + $0x6] ss:$8 sm:$0xf] }
 0x22a   :  { %1713 = vmatpush1.bf16.msra.mxu0 %v1253_v28  ;;  %v1091_v28 = vld [vmem:[#allocation7 + $0x680] sm:$0xff] }
 0x22b   :  { %1714 = vmatprep.subr.bf16.mxu0 %v1260_v29  ;;  %4526 = vmatpush3.bf16.msra.mxu1 %v4864_v42  ;;  %v1337_v29 = vunpack.c.l.s8.bf16 %v1091_v28  ;;  %v1110_v42 = vld [vmem:[#allocation7 + $0x7a8] sm:$0xff] }
 0x22c   :  { %4533 = vmatprep.subr.bf16.mxu1 %v4865_v47  ;;  %v1373_v47 = vunpack.c.l.s8.bf16 %v1109_v46 }
 0x22e   :  { %1715 = vmatpush1.bf16.msra.mxu0 %v1259_v32  ;;  %v1343_v32 = vunpack.c.h.s8.bf16 %v1091_v28 }
 0x22f   :  { %1716 = vmatprep.subr.bf16.mxu0 %v1266_v34  ;;  %v1350_v34 = vunpack.c.l.s8.bf16 %v1098_v31 }
 0x232   :  { %1717 = vmatpush1.bf16.msra.mxu0 %v1265_v38  ;;  %v1362_v38 = vunpack.c.l.s8.bf16 %v1104_v12 }
 0x233   :  { %1718 = vmatprep.subr.bf16.mxu0 %v1272_v40  ;;  %v1103_v40 = vld [vmem:[#allocation7 + $0x740] sm:$0xff] }
 0x234   :  { %v1361_v41 = vunpack.c.l.s8.bf16 %v1103_v40 }
 0x236   :  { %1719 = vmatpush1.bf16.msra.mxu0 %v1271_v35  ;;  %v1367_v35 = vunpack.c.h.s8.bf16 %v1103_v40 }
 0x237   :  { %1720 = vmatprep.subr.bf16.mxu0 %v1278_v43  ;;  %v1374_v43 = vunpack.c.l.s8.bf16 %v1110_v42 }
 0x23a   :  { %1721 = vmatpush1.bf16.msra.mxu0 %v1277_v58  ;;  %v1380_v58 = vunpack.c.h.s8.bf16 %v1110_v42 }
 0x23b   :  { %1722 = vmatprep.subr.bf16.mxu0 %v1284_v48  ;;  %v1116_v48 = vld [vmem:[#allocation7 + $0x808] sm:$0xff] }
 0x23e   :  { %1723 = vmatpush1.bf16.msra.mxu0 %v1283_v50  ;;  %v1386_v50 = vunpack.c.l.s8.bf16 %v1116_v48 }
 0x23f   :  { %1724 = vmatprep.subr.bf16.mxu0 %v1290_v52  ;;  %v1115_v52 = vld [vmem:[#allocation7 + $0x800] sm:$0xff] }
 0x240   :  { %v1385_v53 = vunpack.c.l.s8.bf16 %v1115_v52  ;;  %v1391_v56 = vunpack.c.h.s8.bf16 %v1115_v52  ;;  %v4868_v52 = vld [vmem:[#allocation8 + $0x110] ss:$8 sps:$4 sm:$0xff]  }
 0x242   :  { %1725 = vmatpush1.bf16.msra.mxu0 %v1289_v54  ;;  %v1392_v54 = vunpack.c.h.s8.bf16 %v1116_v48 }
 0x243   :  { %1726 = vmatprep.subr.bf16.mxu0 %v1296_v55  ;;  %v1122_v55 = vld [vmem:[#allocation7 + $0x868] sm:$0xff] }
 0x246   :  { %1727 = vmatpush1.bf16.msra.mxu0 %v1295_v57  ;;  %v1398_v57 = vunpack.c.l.s8.bf16 %v1122_v55 }
 0x247   :  { %1728 = vmatprep.subr.bf16.mxu0 %v1302_v59  ;;  %v1121_v59 = vld [vmem:[#allocation7 + $0x860] sm:$0xff] }
 0x248   :  { %v1397_v60 = vunpack.c.l.s8.bf16 %v1121_v59  ;;  %v1403_v30 = vunpack.c.h.s8.bf16 %v1121_v59  ;;  %v4874_v59 = vld [vmem:[#allocation8 + $0x140] ss:$8 sps:$4 sm:$0xff]  }
 0x24a   :  { %1729 = vmatpush1.bf16.msra.mxu0 %v1301_v62  ;;  %v1404_v62 = vunpack.c.h.s8.bf16 %v1122_v55  ;;  %v4871_v55 = vld [vmem:[#allocation8 + $0x1b0] ss:$8 sps:$4 sm:$0xff]  }
 0x24b   :  { %1730 = vmatprep.subr.bf16.mxu0 %v1308_v1  ;;  %v1128_v1 = vld [vmem:[#allocation7 + $0x8c8] sm:$0xff] }
 0x24e   :  { %1731 = vmatpush1.bf16.msra.mxu0 %v1307_v4  ;;  %v1410_v4 = vunpack.c.l.s8.bf16 %v1128_v1 }
 0x24f   :  { %1732 = vmatprep.subr.bf16.mxu0 %v1314_v6  ;;  %v1127_v6 = vld [vmem:[#allocation7 + $0x8c0] sm:$0xff] }
 0x250   :  { %v1409_v9 = vunpack.c.l.s8.bf16 %v1127_v6 }
 0x252   :  { %1733 = vmatpush1.bf16.msra.mxu0 %v1313_v13  ;;  %v1416_v13 = vunpack.c.h.s8.bf16 %v1128_v1  ;;  %v4876_v1 = vld [vmem:[#allocation8 + $0x150] ss:$8 sps:$4 sm:$0xff]  }
 0x253   :  { %1734 = vmatprep.subr.bf16.mxu0 %v1320_v14  ;;  %v1415_v14 = vunpack.c.h.s8.bf16 %v1127_v6  ;;  %v4877_v6 = vld [vmem:[#allocation8 + $0x1e0] ss:$8 sps:$4 sm:$0xff]  }
 0x256   :  { %1735 = vmatpush1.bf16.msra.mxu0 %v1319_v19  ;;  %v108_v19 = vld [vmem:[#allocation10 + $0x6] ss:$8 sm:$0x30] }
 0x257   :  { %1745 = vmatprep.subr.bf16.mxu0 %v1326_v33  ;;  %v93_v33 = vld [vmem:[#allocation10 + $0x1] ss:$8 sm:$0xf] }
 0x259   :  { %1737 = vmatmul.mubr.bf16.vlgmr.msra.gmra.mrb[12].mxu0 %v5344_v45  ;;  %v1356_v45 = vunpack.c.h.s8.bf16 %v1098_v31 }
 0x25a   :  { %1746 = vmatpush1.bf16.msra.mxu0 %v1325_v39  ;;  %1777 = vmatprep.mubr.bf16.mxu0 %v5346_v51  ;;  %v1355_v51 = vunpack.c.h.s8.bf16 %v1097_v36  ;;  %v5376_v39 = vor.u32 %v108_v19, %v107_v18  ;;  %v4880_v18 = vld [vmem:[#allocation8 + $0x170] ss:$8 sps:$4 sm:$0xff]  }
 0x25b   :  { %1747 = vmatprep.subr.bf16.mxu0 %v1332_v21  ;;  %v5378_v21 = vor.u32 %v94_v20, %v93_v33  ;;  %v4881_v33 = vld [vmem:[#allocation8 + $0x280] ss:$8 sps:$4 sm:$0xff]  }
 0x25c   :  { %v1790_v24 = vrot.slane %v5376_v39, %v5295_v16  ;;  %v4882_v20 = vld [vmem:[#allocation8 + $0x200] ss:$8 sps:$4 sm:$0xff]  }
 0x25d   :  { %v1839_v31 = vrot.slane %v5378_v21, %v5318_v5 }
 0x25e   :  { %1748 = vmatpush1.bf16.msra.mxu0 %v1331_v26  ;;  %v1794_v26 = vrot.slane %v5376_v39, %v5298_v17 }
 0x25f   :  { %1749 = vmatprep.subr.bf16.mxu0 %v1338_v27  ;;  %v1802_v27 = vrot.slane %v5376_v39, %v5318_v5 }
 0x262   :  { %1750 = vmatpush1.bf16.msra.mxu0 %v1337_v29 }
 0x263   :  { %1751 = vmatprep.subr.bf16.mxu0 %v1344_v25  ;;  %v1831_v25 = vrot.slane %v5378_v21, %v5298_v17 }
 0x266   :  { %1752 = vmatpush1.bf16.msra.mxu0 %v1343_v32 }
 0x267   :  { %1753 = vmatprep.subr.bf16.mxu0 %v1350_v34 }
 0x26a   :  { %1754 = vmatpush1.bf16.msra.mxu0 %v1349_v37 }
 0x26b   :  { %1755 = vmatprep.subr.bf16.mxu0 %v1356_v45 }
 0x26e   :  { %1756 = vmatpush1.bf16.msra.mxu0 %v1355_v51 }
 0x26f   :  { %1757 = vmatprep.subr.bf16.mxu0 %v1362_v38 }
 0x272   :  { %1758 = vmatpush1.bf16.msra.mxu0 %v1361_v41 }
 0x273   :  { %1759 = vmatprep.subr.bf16.mxu0 %v1368_v22 }
 0x276   :  { %1760 = vmatpush1.bf16.msra.mxu0 %v1367_v35 }
 0x277   :  { %1761 = vmatprep.subr.bf16.mxu0 %v1374_v43 }
 0x27a   :  { %1762 = vmatpush1.bf16.msra.mxu0 %v1373_v47 }
 0x27b   :  { %1763 = vmatprep.subr.bf16.mxu0 %v1380_v58  ;;  %v4866_v58 = vld [vmem:[#allocation8 + $0x100] ss:$8 sps:$4 sm:$0xff]  }
 0x27e   :  { %1764 = vmatpush1.bf16.msra.mxu0 %v1379_v49  ;;  %v4867_v49 = vld [vmem:[#allocation8 + $0x190] ss:$8 sps:$4 sm:$0xff]  }
 0x27f   :  { %1765 = vmatprep.subr.bf16.mxu0 %v1386_v50 }
 0x282   :  { %1766 = vmatpush1.bf16.msra.mxu0 %v1385_v53  ;;  %v4869_v53 = vld [vmem:[#allocation8 + $0x1a0] ss:$8 sps:$4 sm:$0xff]  }
 0x283   :  { %1767 = vmatprep.subr.bf16.mxu0 %v1392_v54  ;;  %v4870_v54 = vld [vmem:[#allocation8 + $0x120] ss:$8 sps:$4 sm:$0xff]  }
 0x286   :  { %1768 = vmatpush1.bf16.msra.mxu0 %v1391_v56  ;;  %v4872_v56 = vld [vmem:[#allocation8 + $0x130] ss:$8 sps:$4 sm:$0xff]  }
 0x287   :  { %1769 = vmatprep.subr.bf16.mxu0 %v1398_v57  ;;  %v4873_v57 = vld [vmem:[#allocation8 + $0x1c0] ss:$8 sps:$4 sm:$0xff]  }
 0x28a   :  { %1770 = vmatpush1.bf16.msra.mxu0 %v1397_v60  ;;  %v1798_v60 = vrot.slane %v5376_v39, %v5329_v63 }
 0x28b   :  { %1771 = vmatprep.subr.bf16.mxu0 %v1404_v62  ;;  %v4875_v62 = vld [vmem:[#allocation8 + $0x1d0] ss:$8 sps:$4 sm:$0xff]  }
 0x28e   :  { %1772 = vmatpush1.bf16.msra.mxu0 %v1403_v30 }
 0x28f   :  { %1773 = vmatprep.subr.bf16.mxu0 %v1410_v4  ;;  %v1835_v4 = vrot.slane %v5378_v21, %v5329_v63 }
 0x292   :  { %1774 = vmatpush1.bf16.msra.mxu0 %v1409_v9  ;;  %v4878_v9 = vld [vmem:[#allocation8 + $0x160] ss:$8 sps:$4 sm:$0xff]  }
 0x293   :  { %1775 = vmatprep.subr.bf16.mxu0 %v1416_v13 }
 0x296   :  { %1776 = vmatpush1.bf16.msra.mxu0 %v1415_v14  ;;  %v4879_v14 = vld [vmem:[#allocation8 + $0x1f0] ss:$8 sps:$4 sm:$0xff]  }
 0x299   :  { %1778 = vmatmul.mubr.bf16.vlgmr.msra.gmra.mrb[12].mxu0 %v5358_v61  ;;  %v1827_v61 = vrot.slane %v5378_v21, %v5295_v16 }
 0x2ac   :  { %v1533_v28 = vpop.f32.mrb[8].mxu0  ;;  %v1656_v29 = vpop.f32.mrb[16].mxu1 }
 0x2ad   :  { %v1817_v32 = vmul.f32 %v1790_v24, %v1533_v28  ;;  %v1535_v34 = vpop.f32.mrb[9].mxu0  ;;  %v1658_v36 = vpop.f32.mrb[17].mxu1  ;;  %v1819_v30 = vmul.f32 %v1798_v60, %v1656_v29  ;;  %v4886_v28 = vld [vmem:[#allocation8 + $0x220] ss:$8 sps:$4 sm:$0xff]   ;;  %v4887_v29 = vld [vmem:[#allocation8 + $0x2b0] ss:$8 sps:$4 sm:$0xff]  }
 0x2ae   :  { %v1818_v37 = vmul.f32 %v1794_v26, %v1535_v34  ;;  %v1820_v45 = vmul.f32 %v1802_v27, %v1658_v36  ;;  %v1537_v12 = vpop.f32.mrb[10].mxu0  ;;  %v1660_v51 = vpop.f32.mrb[18].mxu1  ;;  %v4883_v26 = vld [vmem:[#allocation8 + $0x290] ss:$8 sps:$4 sm:$0xff]  }
 0x2af   :  { %v1854_v38 = vadd.f32 %v1827_v61, %v1817_v32  ;;  %v1538_v40 = vpop.f32.mrb[11].mxu0  ;;  %v1661_v41 = vpop.f32.mrb[19].mxu1  ;;  %v1856_v13 = vadd.f32 %v1835_v4, %v1819_v30  ;;  %v4884_v27 = vld [vmem:[#allocation8 + $0x210] ss:$8 sps:$4 sm:$0xff]   ;;  %v4885_v61 = vld [vmem:[#allocation8 + $0x2a0] ss:$8 sps:$4 sm:$0xff]  }
 0x2b0   :  { %v1855_v22 = vadd.f32 %v1831_v25, %v1818_v37  ;;  %v1857_v42 = vadd.f32 %v1839_v31, %v1820_v45  ;;  %v4888_v25 = vld [vmem:[#allocation8 + $0x230] ss:$8 sps:$4 sm:$0xff]   ;;  %v4889_v31 = vld [vmem:[#allocation8 + $0x2c0] ss:$8 sps:$4 sm:$0xff]   ;;  %v1810_v40 = vrot.slane %v5376_v39, %v5336_v10  ;;  %v1843_v41 = vrot.slane %v5378_v21, %v5353_v23 }
 0x2b1   :  { %v1860_v35 = vmax.f32 %v1854_v38, 0.0  ;;  %v1862_v19 = vmax.f32 %v1856_v13, 0.0  ;;  %v4890_v32 = vld [vmem:[#allocation8 + $0x240] ss:$8 sps:$4 sm:$0xff]   ;;  %v4891_v34 = vld [vmem:[#allocation8 + $0x2d0] ss:$8 sps:$4 sm:$0xff]   ;;  %v1806_v38 = vrot.slane %v5376_v39, %v5353_v23 }
 0x2b2   :  { %v1861_v43 = vmax.f32 %v1855_v22, 0.0  ;;  %v1863_v46 = vmax.f32 %v1857_v42, 0.0  ;;  %v4892_v36 = vld [vmem:[#allocation8 + $0x250] ss:$8 sps:$4 sm:$0xff]   ;;  %v4893_v37 = vld [vmem:[#allocation8 + $0x2e0] ss:$8 sps:$4 sm:$0xff]   ;;  %v1847_v42 = vrot.slane %v5378_v21, %v5336_v10 }
 0x2b3   :  { %v1866_v48 = vpack.c.bf16 %v1860_v35, %v1860_v35  ;;  %v1868_v24 = vpack.c.bf16 %v1862_v19, %v1862_v19  ;;  %v4894_v45 = vld [vmem:[#allocation8 + $0x260] ss:$8 sps:$4 sm:$0xff]   ;;  %v4895_v12 = vld [vmem:[#allocation8 + $0x2f0] ss:$8 sps:$4 sm:$0xff]  }
 0x2b4   :  { %v1867_v47 = vpack.c.bf16 %v1861_v43, %v1861_v43  ;;  %v1869_v50 = vpack.c.bf16 %v1863_v46, %v1863_v46  ;;  %v4896_v51 = vld [vmem:[#allocation8 + $0x270] ss:$8 sps:$4 sm:$0xff]   ;;  %v4900_v19 = vld [vmem:[#allocation5 + $0xc0] ss:$72 sps:$4 sm:$0xff]  }
 0x2b5   :  { %v4897_v13 = vld [vmem:[#allocation5 + $0x30] ss:$72 sps:$4 sm:$0xff]  }
 0x2b6   :  { %2288 = vmatprep.mubr.bf16.mxu1 %v1867_v47 }
 0x2b7   :  { %2289 = vmatmul.mubr.bf16.vlgmr.msra.gmra.mrb[20].mxu1 %v1866_v48 }
 0x2b8   :  { %4534 = vmatpush3.bf16.msra.mxu1 %v4866_v58  ;;  %2328 = vmatprep.mubr.bf16.mxu1 %v1869_v50 }
 0x2b9   :  { %4535 = vmatprep.subr.bf16.mxu1 %v4867_v49 }
 0x2bc   :  { %4536 = vmatpush3.bf16.msra.mxu1 %v4868_v52 }
 0x2bd   :  { %4537 = vmatprep.subr.bf16.mxu1 %v4869_v53 }
 0x2c0   :  { %4538 = vmatpush3.bf16.msra.mxu1 %v4870_v54 }
 0x2c1   :  { %4539 = vmatprep.subr.bf16.mxu1 %v4871_v55 }
 0x2c4   :  { %4540 = vmatpush3.bf16.msra.mxu1 %v4872_v56 }
 0x2c5   :  { %4541 = vmatprep.subr.bf16.mxu1 %v4873_v57 }
 0x2c8   :  { %4542 = vmatpush3.bf16.msra.mxu1 %v4874_v59  ;;  %v104_v59 = vld [vmem:[#allocation10 + $0x4] ss:$0 sm:$0xff] }
 0x2c9   :  { %4543 = vmatprep.subr.bf16.mxu1 %v4875_v62 }
 0x2cc   :  { %4544 = vmatpush3.bf16.msra.mxu1 %v4876_v1 }
 0x2cd   :  { %4545 = vmatprep.subr.bf16.mxu1 %v4877_v6 }
 0x2d0   :  { %4546 = vmatpush3.bf16.msra.mxu1 %v4878_v9 }
 0x2d1   :  { %4547 = vmatprep.subr.bf16.mxu1 %v4879_v14  ;;  %v4899_v14 = vld [vmem:[#allocation5 + $0x34] ss:$72 sps:$4 sm:$0xff]  }
 0x2d4   :  { %4548 = vmatpush3.bf16.msra.mxu1 %v4880_v18  ;;  %v4902_v18 = vld [vmem:[#allocation5 + $0xc4] ss:$72 sps:$4 sm:$0xff]  }
 0x2d5   :  { %4555 = vmatprep.subr.bf16.mxu1 %v4881_v33  ;;  %v4905_v33 = vld [vmem:[#allocation5 + $0x154] ss:$72 sps:$4 sm:$0xff]  }
 0x2d7   :  { %2329 = vmatmul.mubr.bf16.vlgmr.msra.gmra.mrb[24].mxu1 %v1868_v24  ;;  %v4908_v24 = vld [vmem:[#allocation5 + $0x1e4] ss:$72 sps:$4 sm:$0xff]  }
 0x2d8   :  { %4556 = vmatpush3.bf16.msra.mxu1 %v4882_v20  ;;  %v4903_v20 = vld [vmem:[#allocation5 + $0x150] ss:$72 sps:$4 sm:$0xff]  }
 0x2d9   :  { %4557 = vmatprep.subr.bf16.mxu1 %v4883_v26  ;;  %v4906_v26 = vld [vmem:[#allocation5 + $0x1e0] ss:$72 sps:$4 sm:$0xff]  }
 0x2dc   :  { %4558 = vmatpush3.bf16.msra.mxu1 %v4884_v27  ;;  %v4911_v27 = vld [vmem:[#allocation5 + $0x274] ss:$72 sps:$4 sm:$0xff]  }
 0x2dd   :  { %4559 = vmatprep.subr.bf16.mxu1 %v4885_v61  ;;  %v4909_v61 = vld [vmem:[#allocation5 + $0x270] ss:$72 sps:$4 sm:$0xff]  }
 0x2e0   :  { %4560 = vmatpush3.bf16.msra.mxu1 %v4886_v28  ;;  %v4914_v28 = vld [vmem:[#allocation5 + $0x304] ss:$72 sps:$4 sm:$0xff]  }
 0x2e1   :  { %4561 = vmatprep.subr.bf16.mxu1 %v4887_v29  ;;  %v4912_v29 = vld [vmem:[#allocation5 + $0x300] ss:$72 sps:$4 sm:$0xff]  }
 0x2e4   :  { %4562 = vmatpush3.bf16.msra.mxu1 %v4888_v25  ;;  %v4917_v25 = vld [vmem:[#allocation5 + $0x394] ss:$72 sps:$4 sm:$0xff]  }
 0x2e5   :  { %4563 = vmatprep.subr.bf16.mxu1 %v4889_v31  ;;  %v4915_v31 = vld [vmem:[#allocation5 + $0x390] ss:$72 sps:$4 sm:$0xff]  }
 0x2e8   :  { %4564 = vmatpush3.bf16.msra.mxu1 %v4890_v32 }
 0x2e9   :  { %4565 = vmatprep.subr.bf16.mxu1 %v4891_v34 }
 0x2ec   :  { %4566 = vmatpush3.bf16.msra.mxu1 %v4892_v36 }
 0x2ed   :  { %4567 = vmatprep.subr.bf16.mxu1 %v4893_v37 }
 0x2f0   :  { %4568 = vmatpush3.bf16.msra.mxu1 %v4894_v45 }
 0x2f1   :  { %4569 = vmatprep.subr.bf16.mxu1 %v4895_v12 }
 0x2f4   :  { %4570 = vmatpush3.bf16.msra.mxu1 %v4896_v51 }
 0x2f5   :  { %2673 = vmatprep.subr.bf16.mxu1 %v4899_v14  ;;  %v2876_v14 = vld [vmem:[#allocation7 + $0x1b8] sm:$0xff] }
 0x36c   :  { %v1779_v22 = vpop.f32.mrb[12].mxu0 }
 0x36d   :  { %v1821_v35 = vmul.f32 %v1806_v38, %v1779_v22  ;;  %v1781_v43 = vpop.f32.mrb[13].mxu0  ;;  %v4918_v22 = vld [vmem:[#allocation5 + $0x420] ss:$72 sps:$4 sm:$0xff]  }
 0x36e   :  { %v1822_v46 = vmul.f32 %v1810_v40, %v1781_v43  ;;  %v1783_v47 = vpop.f32.mrb[14].mxu0  ;;  %v2852_v43 = vld [vmem:[#allocation7 + $0x38] sm:$0xff] }
 0x36f   :  { %v1858_v58 = vadd.f32 %v1843_v41, %v1821_v35  ;;  %v1784_v48 = vpop.f32.mrb[15].mxu0  ;;  %v4920_v41 = vld [vmem:[#allocation5 + $0x424] ss:$72 sps:$4 sm:$0xff]   ;;  %v2996_v47 = vunpack.c.l.s8.bf16 %v2852_v43 }
 0x370   :  { %v1859_v49 = vadd.f32 %v1847_v42, %v1822_v46  ;;  %v4923_v42 = vld [vmem:[#allocation5 + $0x3c] ss:$72 sps:$4 sm:$0xff]   ;;  %v2851_v46 = vld [vmem:[#allocation7 + $0x30] sm:$0xff]  ;;  %v3002_v48 = vunpack.c.h.s8.bf16 %v2852_v43 }
 0x371   :  { %v1864_v50 = vmax.f32 %v1858_v58, 0.0  ;;  %v2995_v58 = vunpack.c.l.s8.bf16 %v2851_v46  ;;  %3283 = vmatprep.subr.bf16.mxu0 %v2996_v47  ;;  %v4926_v43 = vld [vmem:[#allocation5 + $0xcc] ss:$72 sps:$4 sm:$0xff]   ;;  %v4929_v47 = vld [vmem:[#allocation5 + $0x15c] ss:$72 sps:$4 sm:$0xff]  }
 0x372   :  { %v1865_v52 = vmax.f32 %v1859_v49, 0.0  ;;  %v3001_v49 = vunpack.c.h.s8.bf16 %v2851_v46  ;;  %v4924_v46 = vld [vmem:[#allocation5 + $0xc8] ss:$72 sps:$4 sm:$0xff]  }
 0x373   :  { %v1870_v54 = vpack.c.bf16 %v1864_v50, %v1864_v50  ;;  %3284 = vmatpush1.bf16.msra.mxu0 %v2995_v58  ;;  %v2858_v50 = vld [vmem:[#allocation7 + $0x98] sm:$0xff] }
 0x374   :  { %v1871_v53 = vpack.c.bf16 %v1865_v52, %v1865_v52  ;;  %3285 = vmatprep.subr.bf16.mxu0 %v3002_v48  ;;  %v3008_v52 = vunpack.c.l.s8.bf16 %v2858_v50  ;;  %v4927_v58 = vld [vmem:[#allocation5 + $0x158] ss:$72 sps:$4 sm:$0xff]   ;;  %v4932_v48 = vld [vmem:[#allocation5 + $0x1ec] ss:$72 sps:$4 sm:$0xff]  }
 0x376   :  { %2368 = vmatprep.mubr.bf16.mxu1 %v1871_v53  ;;  %v2857_v53 = vld [vmem:[#allocation7 + $0x90] sm:$0xff] }
 0x377   :  { %2369 = vmatmul.mubr.bf16.vlgmr.msra.gmra.mrb[28].mxu1 %v1870_v54  ;;  %3286 = vmatpush1.bf16.msra.mxu0 %v3001_v49  ;;  %v3007_v54 = vunpack.c.l.s8.bf16 %v2857_v53  ;;  %v4930_v49 = vld [vmem:[#allocation5 + $0x1e8] ss:$72 sps:$4 sm:$0xff]  }
 0x378   :  { %2705 = vmatprep.mubr.bf16.mxu1 %v5172_v0  ;;  %2674 = vmatpush1.bf16.msra.mxu1 %v4897_v13 }
 0x379   :  { %2675 = vmatprep.subr.bf16.mxu1 %v4902_v18  ;;  %3287 = vmatprep.subr.bf16.mxu0 %v3008_v52  ;;  %v3044_v18 = vunpack.c.l.s8.bf16 %v2876_v14  ;;  %v4933_v52 = vld [vmem:[#allocation5 + $0x278] ss:$72 sps:$4 sm:$0xff]  }
 0x37b   :  { %3288 = vmatpush1.bf16.msra.mxu0 %v3007_v54  ;;  %v4936_v54 = vld [vmem:[#allocation5 + $0x308] ss:$72 sps:$4 sm:$0xff]  }
 0x37c   :  { %2676 = vmatpush1.bf16.msra.mxu1 %v4900_v19  ;;  %v2875_v19 = vld [vmem:[#allocation7 + $0x1b0] sm:$0xff] }
 0x37d   :  { %2677 = vmatprep.subr.bf16.mxu1 %v4905_v33  ;;  %v3043_v33 = vunpack.c.l.s8.bf16 %v2875_v19 }
 0x380   :  { %2678 = vmatpush1.bf16.msra.mxu1 %v4903_v20  ;;  %v3050_v20 = vunpack.c.h.s8.bf16 %v2876_v14  ;;  %v4962_v14 = vld [vmem:[#allocation5 + $0x314] ss:$72 sps:$4 sm:$0xff]  }
 0x381   :  { %2679 = vmatprep.subr.bf16.mxu1 %v4908_v24  ;;  %v3049_v24 = vunpack.c.h.s8.bf16 %v2875_v19  ;;  %v4965_v19 = vld [vmem:[#allocation5 + $0x3a4] ss:$72 sps:$4 sm:$0xff]  }
 0x384   :  { %2680 = vmatpush1.bf16.msra.mxu1 %v4906_v26  ;;  %v2882_v26 = vld [vmem:[#allocation7 + $0x218] sm:$0xff] }
 0x385   :  { %2681 = vmatprep.subr.bf16.mxu1 %v4911_v27  ;;  %v3056_v27 = vunpack.c.l.s8.bf16 %v2882_v26 }
 0x388   :  { %2682 = vmatpush1.bf16.msra.mxu1 %v4909_v61  ;;  %v2881_v61 = vld [vmem:[#allocation7 + $0x210] sm:$0xff] }
 0x389   :  { %2683 = vmatprep.subr.bf16.mxu1 %v4914_v28  ;;  %v3055_v28 = vunpack.c.l.s8.bf16 %v2881_v61 }
 0x38a   :  { %v4527_v39 = vpop.f32.mrb[20].mxu1 }
 0x38b   :  { %v4528_v55 = vpop.f32.mrb[21].mxu1 }
 0x38c   :  { %v4529_v56 = vadd.f32 %v4528_v55, %v4527_v39  ;;  %v4530_v57 = vpop.f32.mrb[22].mxu1  ;;  %2684 = vmatpush1.bf16.msra.mxu1 %v4912_v29  ;;  %v3014_v39 = vunpack.c.h.s8.bf16 %v2858_v50  ;;  %v3013_v55 = vunpack.c.h.s8.bf16 %v2857_v53  ;;  %v3062_v29 = vunpack.c.h.s8.bf16 %v2882_v26  ;;  %v4935_v50 = vld [vmem:[#allocation5 + $0x27c] ss:$72 sps:$4 sm:$0xff]   ;;  %v4938_v53 = vld [vmem:[#allocation5 + $0x30c] ss:$72 sps:$4 sm:$0xff]  }
 0x38d   :  { %v4531_v21 = vpop.f32.mrb[23].mxu1  ;;  %2685 = vmatprep.subr.bf16.mxu1 %v4917_v25  ;;  %v3061_v25 = vunpack.c.h.s8.bf16 %v2881_v61 }
 0x38e   :  { %v2291_v1 = vadd.f32 %v4529_v56, %v104_v59  ;;  %3289 = vmatprep.subr.bf16.mxu0 %v3014_v39  ;;  %v2864_v56 = vld [vmem:[#allocation7 + $0xf8] sm:$0xff]  ;;  %v2863_v21 = vld [vmem:[#allocation7 + $0xf0] sm:$0xff] }
 0x38f   :  { %v3020_v57 = vunpack.c.l.s8.bf16 %v2864_v56  ;;  %3290 = vmatpush1.bf16.msra.mxu0 %v3013_v55  ;;  %v3019_v59 = vunpack.c.l.s8.bf16 %v2863_v21  ;;  %v4941_v39 = vld [vmem:[#allocation5 + $0x39c] ss:$72 sps:$4 sm:$0xff]   ;;  %v4939_v55 = vld [vmem:[#allocation5 + $0x398] ss:$72 sps:$4 sm:$0xff]  }
 0x390   :  { %2686 = vmatpush1.bf16.msra.mxu1 %v4915_v31  ;;  %v2888_v31 = vld [vmem:[#allocation7 + $0x278] sm:$0xff] }
 0x391   :  { %2687 = vmatprep.subr.bf16.mxu1 %v4920_v41  ;;  %3291 = vmatprep.subr.bf16.mxu0 %v3020_v57  ;;  %v4942_v57 = vld [vmem:[#allocation5 + $0x428] ss:$72 sps:$4 sm:$0xff]  }
 0x393   :  { %3292 = vmatpush1.bf16.msra.mxu0 %v3019_v59  ;;  %v4945_v59 = vld [vmem:[#allocation5 + $0x40] ss:$72 sps:$4 sm:$0xff]  }
 0x394   :  { %2688 = vmatpush1.bf16.msra.mxu1 %v4918_v22  ;;  %v4921_v22 = vld [vmem:[#allocation5 + $0x38] ss:$72 sps:$4 sm:$0xff]  }
 0x395   :  { %2714 = vmatprep.subr.bf16.mxu1 %v4923_v42 }
 0x3aa   :  { %v4549_v60 = vpop.f32.mrb[24].mxu1 }
 0x3ab   :  { %v4550_v62 = vpop.f32.mrb[25].mxu1 }
 0x3ac   :  { %v4551_v30 = vadd.f32 %v4550_v62, %v4549_v60  ;;  %v4552_v4 = vpop.f32.mrb[26].mxu1  ;;  %v3026_v60 = vunpack.c.h.s8.bf16 %v2864_v56  ;;  %v3025_v62 = vunpack.c.h.s8.bf16 %v2863_v21  ;;  %v4944_v56 = vld [vmem:[#allocation5 + $0x42c] ss:$72 sps:$4 sm:$0xff]  }
 0x3ad   :  { %v4553_v6 = vpop.f32.mrb[27].mxu1  ;;  %v2869_v4 = vld [vmem:[#allocation7 + $0x150] sm:$0xff]  ;;  %v4947_v21 = vld [vmem:[#allocation5 + $0x44] ss:$72 sps:$4 sm:$0xff]  }
 0x3ae   :  { %v2331_v9 = vadd.f32 %v4551_v30, %v2291_v1  ;;  %3293 = vmatprep.subr.bf16.mxu0 %v3026_v60  ;;  %v2870_v1 = vld [vmem:[#allocation7 + $0x158] sm:$0xff]  ;;  %v3031_v6 = vunpack.c.l.s8.bf16 %v2869_v4  ;;  %v3037_v13 = vunpack.c.h.s8.bf16 %v2869_v4 }
 0x3af   :  { %v3032_v30 = vunpack.c.l.s8.bf16 %v2870_v1  ;;  %3294 = vmatpush1.bf16.msra.mxu0 %v3025_v62  ;;  %v4950_v60 = vld [vmem:[#allocation5 + $0xd4] ss:$72 sps:$4 sm:$0xff]   ;;  %v4948_v62 = vld [vmem:[#allocation5 + $0xd0] ss:$72 sps:$4 sm:$0xff]  }
 0x3b0   :  { %v4956_v4 = vld [vmem:[#allocation5 + $0x1f4] ss:$72 sps:$4 sm:$0xff]  }
 0x3b1   :  { %3295 = vmatprep.subr.bf16.mxu0 %v3032_v30  ;;  %v4951_v30 = vld [vmem:[#allocation5 + $0x160] ss:$72 sps:$4 sm:$0xff]  }
 0x3b3   :  { %3296 = vmatpush1.bf16.msra.mxu0 %v3031_v6  ;;  %v4954_v6 = vld [vmem:[#allocation5 + $0x1f0] ss:$72 sps:$4 sm:$0xff]  }
 0x44a   :  { %v4571_v32 = vpop.f32.mrb[28].mxu1 }
 0x44b   :  { %v4572_v34 = vpop.f32.mrb[29].mxu1 }
 0x44c   :  { %v4573_v36 = vadd.f32 %v4572_v34, %v4571_v32  ;;  %v4574_v37 = vpop.f32.mrb[30].mxu1  ;;  %v3068_v32 = vunpack.c.l.s8.bf16 %v2888_v31  ;;  %v2887_v34 = vld [vmem:[#allocation7 + $0x270] sm:$0xff] }
 0x44d   :  { %v4575_v45 = vpop.f32.mrb[31].mxu1  ;;  %v3074_v37 = vunpack.c.h.s8.bf16 %v2888_v31 }
 0x44e   :  { %v5405_v12 = vadd.f32 %v4573_v36, %v2331_v9  ;;  %v3038_v9 = vunpack.c.h.s8.bf16 %v2870_v1  ;;  %v3067_v36 = vunpack.c.l.s8.bf16 %v2887_v34  ;;  %v3073_v45 = vunpack.c.h.s8.bf16 %v2887_v34  ;;  %v4953_v1 = vld [vmem:[#allocation5 + $0x164] ss:$72 sps:$4 sm:$0xff]  }
 0x450   :  { %v2376_v51 = vmax.f32 %v5405_v12, -4.0  ;;  %3297 = vmatprep.subr.bf16.mxu0 %v3038_v9  ;;  %v4959_v9 = vld [vmem:[#allocation5 + $0x284] ss:$72 sps:$4 sm:$0xff]  }
 0x451   :  { %3298 = vmatpush1.bf16.msra.mxu0 %v3037_v13  ;;  %v4957_v13 = vld [vmem:[#allocation5 + $0x280] ss:$72 sps:$4 sm:$0xff]  }
 0x452   :  { %v2377_v38 = vmin.f32 %v2376_v51, 15.0  ;;  %3299 = vmatprep.subr.bf16.mxu0 %v3044_v18  ;;  %v87_v51 = vld [vmem:[#allocation2 + $0x8] sm:$0xff] }
 0x453   :  { %v4960_v18 = vld [vmem:[#allocation5 + $0x310] ss:$72 sps:$4 sm:$0xff]  }
 0x454   :  { %v2378_v40 = vmul.f32 1.442695, %v2377_v38 }
 0x455   :  { %3300 = vmatpush1.bf16.msra.mxu0 %v3043_v33  ;;  %v4968_v33 = vld [vmem:[#allocation5 + $0x434] ss:$72 sps:$4 sm:$0xff]  }
 0x456   :  { %5017 = vpow2.f32 %v2378_v40  ;;  %3301 = vmatprep.subr.bf16.mxu0 %v3050_v20  ;;  %v2854_v20 = vld [vmem:[#allocation7 + $0x48] sm:$0xff] }
 0x457   :  { %v2998_v26 = vunpack.c.l.s8.bf16 %v2854_v20 }
 0x459   :  { %3302 = vmatpush1.bf16.msra.mxu0 %v3049_v24  ;;  %v4966_v24 = vld [vmem:[#allocation5 + $0x430] ss:$72 sps:$4 sm:$0xff]  }
 0x45a   :  { %3303 = vmatprep.subr.bf16.mxu0 %v3056_v27  ;;  %v2853_v27 = vld [vmem:[#allocation7 + $0x40] sm:$0xff] }
 0x45b   :  { %v2997_v61 = vunpack.c.l.s8.bf16 %v2853_v27 }
 0x45d   :  { %3304 = vmatpush1.bf16.msra.mxu0 %v3055_v28  ;;  %v3004_v28 = vunpack.c.h.s8.bf16 %v2854_v20 }
 0x45e   :  { %3305 = vmatprep.subr.bf16.mxu0 %v3062_v29  ;;  %v2860_v29 = vld [vmem:[#allocation7 + $0xa8] sm:$0xff] }
 0x45f   :  { %v3010_v31 = vunpack.c.l.s8.bf16 %v2860_v29 }
 0x460   :  { %v5408_v35 = vpop.eup %5017 }
 0x461   :  { %2380 = vrot.lane.b32.xlu0 %v5408_v35, %s5173_s4  ;;  %3306 = vmatpush1.bf16.msra.mxu0 %v3061_v25  ;;  %v3003_v25 = vunpack.c.h.s8.bf16 %v2853_v27 }
 0x462   :  { %3307 = vmatprep.subr.bf16.mxu0 %v3068_v32  ;;  %v2859_v32 = vld [vmem:[#allocation7 + $0xa0] sm:$0xff] }
 0x463   :  { %v3009_v34 = vunpack.c.l.s8.bf16 %v2859_v32 }
 0x465   :  { %3308 = vmatpush1.bf16.msra.mxu0 %v3067_v36  ;;  %v3016_v36 = vunpack.c.h.s8.bf16 %v2860_v29 }
 0x466   :  { %3309 = vmatprep.subr.bf16.mxu0 %v3074_v37  ;;  %v2866_v37 = vld [vmem:[#allocation7 + $0x108] sm:$0xff] }
 0x469   :  { %3310 = vmatpush1.bf16.msra.mxu0 %v3073_v45  ;;  %v3015_v45 = vunpack.c.h.s8.bf16 %v2859_v32 }
 0x4d3   :  { %v2381_v38 = vpop.permute.xlu0 %2380 }
 0x4d4   :  { %v2382_v40 = vmul.f32 %v2381_v38, %v87_v51  ;;  %v3022_v51 = vunpack.c.l.s8.bf16 %v2866_v37  ;;  %v2865_v38 = vld [vmem:[#allocation7 + $0x100] sm:$0xff] }
 0x4d6   :  { %v2383_v41 = vadd.f32 %v2382_v40, %v5405_v12  ;;  %v3021_v40 = vunpack.c.l.s8.bf16 %v2865_v38 }
 0x4d8   :  { %v5412_v42 = vpack.c.bf16 %v2383_v41, %v2383_v41  ;;  %v3028_v41 = vunpack.c.h.s8.bf16 %v2866_v37 }
 0x4da   :  { %2706 = vmatmul.mubr.bf16.vlgmr.msra.gmra.mrb[32].mxu1 %v5412_v42 }
 0x4db   :  { %2715 = vmatpush1.bf16.msra.mxu1 %v4921_v22  ;;  %2746 = vmatprep.mubr.bf16.mxu1 %v5172_v0  ;;  %v2872_v22 = vld [vmem:[#allocation7 + $0x168] sm:$0xff] }
 0x4dc   :  { %2716 = vmatprep.subr.bf16.mxu1 %v4926_v43  ;;  %v3034_v43 = vunpack.c.l.s8.bf16 %v2872_v22 }
 0x4df   :  { %2717 = vmatpush1.bf16.msra.mxu1 %v4924_v46  ;;  %v2871_v46 = vld [vmem:[#allocation7 + $0x160] sm:$0xff] }
 0x4e0   :  { %2718 = vmatprep.subr.bf16.mxu1 %v4929_v47  ;;  %v2894_v47 = vld [vmem:[#allocation7 + $0x2d8] sm:$0xff] }
 0x4e3   :  { %2719 = vmatpush1.bf16.msra.mxu1 %v4927_v58  ;;  %v3080_v58 = vunpack.c.l.s8.bf16 %v2894_v47 }
 0x4e4   :  { %2720 = vmatprep.subr.bf16.mxu1 %v4932_v48  ;;  %v2893_v48 = vld [vmem:[#allocation7 + $0x2d0] sm:$0xff] }
 0x4e5   :  { %3311 = vmatprep.subr.bf16.mxu0 %v3080_v58 }
 0x4e7   :  { %2721 = vmatpush1.bf16.msra.mxu1 %v4930_v49  ;;  %v3033_v49 = vunpack.c.l.s8.bf16 %v2871_v46 }
 0x4e8   :  { %2722 = vmatprep.subr.bf16.mxu1 %v4935_v50  ;;  %v3079_v50 = vunpack.c.l.s8.bf16 %v2893_v48 }
 0x4ea   :  { %3312 = vmatpush1.bf16.msra.mxu0 %v3079_v50 }
 0x4eb   :  { %2723 = vmatpush1.bf16.msra.mxu1 %v4933_v52  ;;  %v3040_v52 = vunpack.c.h.s8.bf16 %v2872_v22 }
 0x4ec   :  { %2724 = vmatprep.subr.bf16.mxu1 %v4938_v53  ;;  %v2878_v53 = vld [vmem:[#allocation7 + $0x1c8] sm:$0xff] }
 0x4ef   :  { %2725 = vmatpush1.bf16.msra.mxu1 %v4936_v54  ;;  %v3086_v54 = vunpack.c.h.s8.bf16 %v2894_v47 }
 0x4f0   :  { %2726 = vmatprep.subr.bf16.mxu1 %v4941_v39  ;;  %v3039_v39 = vunpack.c.h.s8.bf16 %v2871_v46 }
 0x4f1   :  { %3313 = vmatprep.subr.bf16.mxu0 %v3086_v54 }
 0x4f3   :  { %2727 = vmatpush1.bf16.msra.mxu1 %v4939_v55  ;;  %v3085_v55 = vunpack.c.h.s8.bf16 %v2893_v48  ;;  %v2899_v48 = vld [vmem:[#allocation7 + $0x330] sm:$0xff] }
 0x4f4   :  { %2728 = vmatprep.subr.bf16.mxu1 %v4944_v56  ;;  %v3046_v56 = vunpack.c.l.s8.bf16 %v2878_v53 }
 0x4f5   :  { %3314 = vmatpush1.bf16.msra.mxu0 %v3085_v55 }
 0x4f7   :  { %2729 = vmatpush1.bf16.msra.mxu1 %v4942_v57  ;;  %v2877_v57 = vld [vmem:[#allocation7 + $0x1c0] sm:$0xff] }
 0x4f8   :  { %2755 = vmatprep.subr.bf16.mxu1 %v4947_v21  ;;  %v5419_v21 = vld [vmem:[#allocation7 + $0x338] sm:$0xff] }
 0x4f9   :  { %v3098_v55 = vunpack.c.h.s8.bf16 %v5419_v21 }
 0x4fa   :  { %2747 = vmatmul.mubr.bf16.vlgmr.msra.gmra.mrb[36].mxu1 %v5412_v42 }
 0x4fb   :  { %2756 = vmatpush1.bf16.msra.mxu1 %v4945_v59  ;;  %2787 = vmatprep.mubr.bf16.mxu1 %v5172_v0  ;;  %v4963_v0 = vld [vmem:[#allocation5 + $0x3a0] ss:$72 sps:$4 sm:$0xff]   ;;  %v3092_v59 = vunpack.c.l.s8.bf16 %v5419_v21  ;;  %v2905_v21 = vld [vmem:[#allocation7 + $0x390] sm:$0xff] }
 0x4fc   :  { %2757 = vmatprep.subr.bf16.mxu1 %v4950_v60  ;;  %v3045_v60 = vunpack.c.l.s8.bf16 %v2877_v57 }
 0x4fd   :  { %3324 = vmatprep.subr.bf16.mxu0 %v3092_v59 }
 0x4ff   :  { %2758 = vmatpush1.bf16.msra.mxu1 %v4948_v62  ;;  %v3052_v62 = vunpack.c.h.s8.bf16 %v2878_v53  ;;  %v3091_v53 = vunpack.c.l.s8.bf16 %v2899_v48 }
 0x500   :  { %2759 = vmatprep.subr.bf16.mxu1 %v4953_v1  ;;  %v2884_v1 = vld [vmem:[#allocation7 + $0x228] sm:$0xff] }
 0x503   :  { %2760 = vmatpush1.bf16.msra.mxu1 %v4951_v30  ;;  %v3051_v30 = vunpack.c.h.s8.bf16 %v2877_v57  ;;  %v3097_v57 = vunpack.c.h.s8.bf16 %v2899_v48 }
 0x504   :  { %2761 = vmatprep.subr.bf16.mxu1 %v4956_v4  ;;  %v3058_v4 = vunpack.c.l.s8.bf16 %v2884_v1 }
 0x507   :  { %2762 = vmatpush1.bf16.msra.mxu1 %v4954_v6  ;;  %v2883_v6 = vld [vmem:[#allocation7 + $0x220] sm:$0xff] }
 0x508   :  { %2763 = vmatprep.subr.bf16.mxu1 %v4959_v9  ;;  %v3057_v9 = vunpack.c.l.s8.bf16 %v2883_v6 }
 0x50b   :  { %2764 = vmatpush1.bf16.msra.mxu1 %v4957_v13  ;;  %v3064_v13 = vunpack.c.h.s8.bf16 %v2884_v1  ;;  %v2907_v1 = vld [vmem:[#allocation7 + $0x3a0] sm:$0xff] }
 0x50c   :  { %2765 = vmatprep.subr.bf16.mxu1 %v4962_v14  ;;  %v2890_v14 = vld [vmem:[#allocation7 + $0x288] sm:$0xff] }
 0x50d   :  { %v3076_v20 = vunpack.c.h.s8.bf16 %v2890_v14 }
 0x50f   :  { %2766 = vmatpush1.bf16.msra.mxu1 %v4960_v18  ;;  %v3063_v18 = vunpack.c.h.s8.bf16 %v2883_v6 }
 0x510   :  { %2767 = vmatprep.subr.bf16.mxu1 %v4965_v19  ;;  %v3070_v19 = vunpack.c.l.s8.bf16 %v2890_v14  ;;  %v2914_v14 = vld [vmem:[#allocation7 + $0x408] sm:$0xff] }
 0x513   :  { %2768 = vmatpush1.bf16.msra.mxu1 %v4963_v0  ;;  %v2889_v0 = vld [vmem:[#allocation7 + $0x280] sm:$0xff] }
 0x514   :  { %2769 = vmatprep.subr.bf16.mxu1 %v4968_v33  ;;  %v3069_v33 = vunpack.c.l.s8.bf16 %v2889_v0 }
 0x517   :  { %2770 = vmatpush1.bf16.msra.mxu1 %v4966_v24  ;;  %v2896_v24 = vld [vmem:[#allocation7 + $0x2e8] sm:$0xff] }
 0x518   :  { %3406 = vmatprep.subr.bf16.mxu1 %v2998_v26  ;;  %v3075_v26 = vunpack.c.h.s8.bf16 %v2889_v0  ;;  %v3082_v27 = vunpack.c.l.s8.bf16 %v2896_v24  ;;  %v3088_v29 = vunpack.c.h.s8.bf16 %v2896_v24  ;;  %v2913_v24 = vld [vmem:[#allocation7 + $0x400] sm:$0xff] }
 0x51a   :  { %2788 = vmatmul.mubr.bf16.vlgmr.msra.gmra.mrb[40].mxu1 %v5412_v42  ;;  %v3027_v42 = vunpack.c.h.s8.bf16 %v2865_v38 }
 0x51b   :  { %3407 = vmatpush1.bf16.msra.mxu1 %v2997_v61  ;;  %v2895_v61 = vld [vmem:[#allocation7 + $0x2e0] sm:$0xff] }
 0x51c   :  { %3408 = vmatprep.subr.bf16.mxu1 %v3004_v28  ;;  %v3081_v28 = vunpack.c.l.s8.bf16 %v2895_v61 }
 0x51f   :  { %3409 = vmatpush1.bf16.msra.mxu1 %v3003_v25  ;;  %v2902_v25 = vld [vmem:[#allocation7 + $0x348] sm:$0xff] }
 0x520   :  { %3410 = vmatprep.subr.bf16.mxu1 %v3010_v31  ;;  %v3087_v31 = vunpack.c.h.s8.bf16 %v2895_v61  ;;  %v3094_v32 = vunpack.c.l.s8.bf16 %v2902_v25 }
 0x523   :  { %3411 = vmatpush1.bf16.msra.mxu1 %v3009_v34  ;;  %v97_v34 = vld [vmem:[#allocation10 + $0x2] ss:$8 sm:$0xf] }
 0x524   :  { %3412 = vmatprep.subr.bf16.mxu1 %v3016_v36  ;;  %v98_v36 = vld [vmem:[#allocation10 + $0x2] ss:$8 sm:$0x30] }
 0x525   :  { %v5422_v37 = vor.u32 %v98_v36, %v97_v34 }
 0x527   :  { %3413 = vmatpush1.bf16.msra.mxu1 %v3015_v45  ;;  %v2806_v45 = vrot.slane %v5422_v37, %v5295_v16  ;;  %v2810_v38 = vrot.slane %v5422_v37, %v5298_v17 }
 0x528   :  { %3414 = vmatprep.subr.bf16.mxu1 %v3022_v51 }
 0x52b   :  { %3415 = vmatpush1.bf16.msra.mxu1 %v3021_v40 }
 0x52c   :  { %3416 = vmatprep.subr.bf16.mxu1 %v3028_v41 }
 0x52f   :  { %3417 = vmatpush1.bf16.msra.mxu1 %v3027_v42 }
 0x530   :  { %3418 = vmatprep.subr.bf16.mxu1 %v3034_v43 }
 0x533   :  { %3419 = vmatpush1.bf16.msra.mxu1 %v3033_v49  ;;  %v2901_v49 = vld [vmem:[#allocation7 + $0x340] sm:$0xff] }
 0x534   :  { %3420 = vmatprep.subr.bf16.mxu1 %v3040_v52  ;;  %v3093_v54 = vunpack.c.l.s8.bf16 %v2901_v49  ;;  %v3099_v59 = vunpack.c.h.s8.bf16 %v2901_v49  ;;  %v2924_v49 = vld [vmem:[#allocation7 + $0x4b8] sm:$0xff] }
 0x537   :  { %3421 = vmatpush1.bf16.msra.mxu1 %v3039_v39 }
 0x538   :  { %3422 = vmatprep.subr.bf16.mxu1 %v3046_v56  ;;  %v2908_v56 = vld [vmem:[#allocation7 + $0x3a8] sm:$0xff] }
 0x53b   :  { %3423 = vmatpush1.bf16.msra.mxu1 %v3045_v60 }
 0x53c   :  { %3424 = vmatprep.subr.bf16.mxu1 %v3052_v62  ;;  %v3106_v62 = vunpack.c.l.s8.bf16 %v2908_v56 }
 0x53f   :  { %3425 = vmatpush1.bf16.msra.mxu1 %v3051_v30  ;;  %v3103_v30 = vunpack.c.l.s8.bf16 %v2905_v21 }
 0x540   :  { %3426 = vmatprep.subr.bf16.mxu1 %v3058_v4  ;;  %v3105_v4 = vunpack.c.l.s8.bf16 %v2907_v1 }
 0x543   :  { %3427 = vmatpush1.bf16.msra.mxu1 %v3057_v9  ;;  %v3112_v9 = vunpack.c.h.s8.bf16 %v2908_v56  ;;  %v2923_v56 = vld [vmem:[#allocation7 + $0x4b0] sm:$0xff] }
 0x544   :  { %3428 = vmatprep.subr.bf16.mxu1 %v3064_v13  ;;  %v2912_v13 = vld [vmem:[#allocation7 + $0x3f8] sm:$0xff] }
 0x545   :  { %v3116_v0 = vunpack.c.l.s8.bf16 %v2912_v13  ;;  %v3122_v61 = vunpack.c.h.s8.bf16 %v2912_v13 }
 0x547   :  { %3429 = vmatpush1.bf16.msra.mxu1 %v3063_v18  ;;  %v3109_v18 = vunpack.c.h.s8.bf16 %v2905_v21  ;;  %v3146_v21 = vunpack.c.h.s8.bf16 %v2924_v49 }
 0x548   :  { %3430 = vmatprep.subr.bf16.mxu1 %v3070_v19  ;;  %v3111_v19 = vunpack.c.h.s8.bf16 %v2907_v1 }
 0x54b   :  { %3431 = vmatpush1.bf16.msra.mxu1 %v3069_v33  ;;  %v3118_v33 = vunpack.c.l.s8.bf16 %v2914_v14 }
 0x54c   :  { %3432 = vmatprep.subr.bf16.mxu1 %v3076_v20  ;;  %v2911_v20 = vld [vmem:[#allocation7 + $0x3f0] sm:$0xff] }
 0x54f   :  { %3433 = vmatpush1.bf16.msra.mxu1 %v3075_v26  ;;  %v3115_v26 = vunpack.c.l.s8.bf16 %v2911_v20 }
 0x550   :  { %3434 = vmatprep.subr.bf16.mxu1 %v3082_v27  ;;  %v3117_v27 = vunpack.c.l.s8.bf16 %v2913_v24 }
 0x553   :  { %3435 = vmatpush1.bf16.msra.mxu1 %v3081_v28  ;;  %v3124_v28 = vunpack.c.h.s8.bf16 %v2914_v14 }
 0x554   :  { %3436 = vmatprep.subr.bf16.mxu1 %v3088_v29  ;;  %v2918_v29 = vld [vmem:[#allocation7 + $0x458] sm:$0xff] }
 0x555   :  { %v3128_v34 = vunpack.c.l.s8.bf16 %v2918_v29 }
 0x557   :  { %3437 = vmatpush1.bf16.msra.mxu1 %v3087_v31  ;;  %v3121_v31 = vunpack.c.h.s8.bf16 %v2911_v20 }
 0x558   :  { %3447 = vmatprep.subr.bf16.mxu1 %v3094_v32  ;;  %v3123_v32 = vunpack.c.h.s8.bf16 %v2913_v24 }
 0x5ad   :  { %v2707_v51 = vpop.f32.mrb[32].mxu1 }
 0x5ae   :  { %v2796_v40 = vadd.f32 %v2707_v51, %v5363_v2  ;;  %v2709_v41 = vpop.f32.mrb[33].mxu1  ;;  %v3100_v2 = vunpack.c.h.s8.bf16 %v2902_v25  ;;  %v2920_v25 = vld [vmem:[#allocation7 + $0x468] sm:$0xff]  ;;  %v2919_v51 = vld [vmem:[#allocation7 + $0x460] sm:$0xff] }
 0x5af   :  { %v2797_v22 = vadd.f32 %v2709_v41, %v5365_v8  ;;  %v2711_v42 = vpop.f32.mrb[34].mxu1  ;;  %v2906_v8 = vld [vmem:[#allocation7 + $0x398] sm:$0xff]  ;;  %v3130_v36 = vunpack.c.l.s8.bf16 %v2920_v25 }
 0x5b0   :  { %v2833_v43 = vadd.f32 %v2806_v45, %v2796_v40  ;;  %v2712_v46 = vpop.f32.mrb[35].mxu1  ;;  %v3104_v60 = vunpack.c.l.s8.bf16 %v2906_v8  ;;  %v3110_v6 = vunpack.c.h.s8.bf16 %v2906_v8  ;;  %v2917_v45 = vld [vmem:[#allocation7 + $0x450] sm:$0xff]  ;;  %v2818_v40 = vrot.slane %v5422_v37, %v5318_v5 }
 0x5b1   :  { %v2834_v47 = vadd.f32 %v2810_v38, %v2797_v22  ;;  %v3127_v41 = vunpack.c.l.s8.bf16 %v2917_v45  ;;  %v3129_v22 = vunpack.c.l.s8.bf16 %v2919_v51  ;;  %v3134_v46 = vunpack.c.h.s8.bf16 %v2918_v29 }
 0x5b2   :  { %v2839_v58 = vmax.f32 %v2833_v43, 0.0 }
 0x5b3   :  { %v2840_v50 = vmax.f32 %v2834_v47, 0.0  ;;  %v3136_v47 = vunpack.c.h.s8.bf16 %v2920_v25 }
 0x5b4   :  { %v5432_v39 = vpack.c.bf16 %v2839_v58, %v2839_v58 }
 0x5b5   :  { %v5430_v52 = vpack.c.bf16 %v2840_v50, %v2840_v50  ;;  %v2926_v50 = vld [vmem:[#allocation7 + $0x4c8] sm:$0xff] }
 0x5b6   :  { %v3142_v8 = vunpack.c.l.s8.bf16 %v2926_v50  ;;  %v3148_v1 = vunpack.c.h.s8.bf16 %v2926_v50  ;;  %v2826_v50 = vrot.slane %v5422_v37, %v5336_v10 }
 0x5b7   :  { %3315 = vmatprep.mubr.bf16.mxu0 %v5430_v52  ;;  %3438 = vmatprep.mubr.bf16.mxu1 %v5430_v52 }
 0x5b8   :  { %3316 = vmatmul.mubr.bf16.vlgmr.msra.gmra.mrb[16].mxu0 %v5432_v39  ;;  %3439 = vmatmul.mubr.bf16.vlgmr.msra.gmra.mrb[44].mxu1 %v5432_v39 }
 0x5b9   :  { %3325 = vmatpush1.bf16.msra.mxu0 %v3091_v53  ;;  %3448 = vmatpush1.bf16.msra.mxu1 %v3093_v54 }
 0x5ba   :  { %3326 = vmatprep.subr.bf16.mxu0 %v3098_v55  ;;  %3449 = vmatprep.subr.bf16.mxu1 %v3100_v2  ;;  %v3133_v55 = vunpack.c.h.s8.bf16 %v2917_v45  ;;  %v3135_v2 = vunpack.c.h.s8.bf16 %v2919_v51 }
 0x5bd   :  { %3327 = vmatpush1.bf16.msra.mxu0 %v3097_v57  ;;  %3450 = vmatpush1.bf16.msra.mxu1 %v3099_v59  ;;  %v2925_v57 = vld [vmem:[#allocation7 + $0x4c0] sm:$0xff] }
 0x5be   :  { %3328 = vmatprep.subr.bf16.mxu0 %v3104_v60  ;;  %3451 = vmatprep.subr.bf16.mxu1 %v3106_v62  ;;  %v3141_v62 = vunpack.c.l.s8.bf16 %v2925_v57 }
 0x5c1   :  { %3329 = vmatpush1.bf16.msra.mxu0 %v3103_v30  ;;  %3452 = vmatpush1.bf16.msra.mxu1 %v3105_v4  ;;  %v2930_v30 = vld [vmem:[#allocation7 + $0x518] sm:$0xff]  ;;  %v2932_v4 = vld [vmem:[#allocation7 + $0x528] sm:$0xff] }
 0x5c2   :  { %3330 = vmatprep.subr.bf16.mxu0 %v3110_v6  ;;  %3453 = vmatprep.subr.bf16.mxu1 %v3112_v9  ;;  %v3145_v6 = vunpack.c.h.s8.bf16 %v2923_v56  ;;  %v3147_v9 = vunpack.c.h.s8.bf16 %v2925_v57  ;;  %v3152_v13 = vunpack.c.l.s8.bf16 %v2930_v30  ;;  %v3154_v14 = vunpack.c.l.s8.bf16 %v2932_v4 }
 0x5c3   :  { %v3158_v20 = vunpack.c.h.s8.bf16 %v2930_v30  ;;  %v3160_v24 = vunpack.c.h.s8.bf16 %v2932_v4 }
 0x5c5   :  { %3331 = vmatpush1.bf16.msra.mxu0 %v3109_v18  ;;  %3454 = vmatpush1.bf16.msra.mxu1 %v3111_v19  ;;  %v2929_v18 = vld [vmem:[#allocation7 + $0x510] sm:$0xff]  ;;  %v2931_v19 = vld [vmem:[#allocation7 + $0x520] sm:$0xff] }
 0x5c6   :  { %3332 = vmatprep.subr.bf16.mxu0 %v3116_v0  ;;  %3455 = vmatprep.subr.bf16.mxu1 %v3118_v33  ;;  %v3151_v0 = vunpack.c.l.s8.bf16 %v2929_v18  ;;  %v3153_v33 = vunpack.c.l.s8.bf16 %v2931_v19 }
 0x5c9   :  { %3333 = vmatpush1.bf16.msra.mxu0 %v3115_v26  ;;  %3456 = vmatpush1.bf16.msra.mxu1 %v3117_v27  ;;  %v2936_v26 = vld [vmem:[#allocation7 + $0x578] sm:$0xff]  ;;  %v2938_v27 = vld [vmem:[#allocation7 + $0x588] sm:$0xff] }
 0x5ca   :  { %3334 = vmatprep.subr.bf16.mxu0 %v3122_v61  ;;  %3457 = vmatprep.subr.bf16.mxu1 %v3124_v28  ;;  %v3157_v61 = vunpack.c.h.s8.bf16 %v2929_v18  ;;  %v3159_v28 = vunpack.c.h.s8.bf16 %v2931_v19  ;;  %v3164_v29 = vunpack.c.l.s8.bf16 %v2936_v26  ;;  %v3166_v25 = vunpack.c.l.s8.bf16 %v2938_v27 }
 0x5cb   :  { %v3170_v45 = vunpack.c.h.s8.bf16 %v2936_v26  ;;  %v3172_v51 = vunpack.c.h.s8.bf16 %v2938_v27  ;;  %v2956_v26 = vld [vmem:[#allocation7 + $0x6a8] sm:$0xff] }
 0x5cd   :  { %v2748_v38 = vpop.f32.mrb[36].mxu1  ;;  %3335 = vmatpush1.bf16.msra.mxu0 %v3121_v31  ;;  %3458 = vmatpush1.bf16.msra.mxu1 %v3123_v32  ;;  %v2935_v31 = vld [vmem:[#allocation7 + $0x570] sm:$0xff]  ;;  %v2937_v32 = vld [vmem:[#allocation7 + $0x580] sm:$0xff] }
 0x5ce   :  { %v5442_v42 = vadd.f32 %v2748_v38, %v5331_v3  ;;  %v2750_v43 = vpop.f32.mrb[37].mxu1  ;;  %3336 = vmatprep.subr.bf16.mxu0 %v3128_v34  ;;  %3459 = vmatprep.subr.bf16.mxu1 %v3130_v36  ;;  %v3140_v3 = vunpack.c.l.s8.bf16 %v2924_v49  ;;  %v3163_v34 = vunpack.c.l.s8.bf16 %v2935_v31  ;;  %v3165_v36 = vunpack.c.l.s8.bf16 %v2937_v32  ;;  %v2942_v38 = vld [vmem:[#allocation7 + $0x5d8] sm:$0xff] }
 0x5cf   :  { %v2799_v58 = vadd.f32 %v2750_v43, %v5333_v7  ;;  %v2752_v48 = vpop.f32.mrb[38].mxu1  ;;  %v3139_v7 = vunpack.c.l.s8.bf16 %v2923_v56  ;;  %v2814_v43 = vrot.slane %v5422_v37, %v5329_v63 }
 0x5d0   :  { %v2753_v53 = vpop.f32.mrb[39].mxu1  ;;  %v2943_v48 = vld [vmem:[#allocation7 + $0x5e0] sm:$0xff] }
 0x5d1   :  { %v2836_v54 = vadd.f32 %v2818_v40, %v2799_v58  ;;  %3337 = vmatpush1.bf16.msra.mxu0 %v3127_v41  ;;  %3460 = vmatpush1.bf16.msra.mxu1 %v3129_v22  ;;  %v2944_v40 = vld [vmem:[#allocation7 + $0x5e8] sm:$0xff]  ;;  %v3169_v41 = vunpack.c.h.s8.bf16 %v2935_v31  ;;  %v3171_v22 = vunpack.c.h.s8.bf16 %v2937_v32  ;;  %v2941_v58 = vld [vmem:[#allocation7 + $0x5d0] sm:$0xff]  ;;  %v3183_v4 = vunpack.c.h.s8.bf16 %v2943_v48  ;;  %v2955_v31 = vld [vmem:[#allocation7 + $0x6a0] sm:$0xff] }
 0x5d2   :  { %3338 = vmatprep.subr.bf16.mxu0 %v3134_v46  ;;  %3461 = vmatprep.subr.bf16.mxu1 %v3136_v47  ;;  %v3176_v46 = vunpack.c.l.s8.bf16 %v2942_v38  ;;  %v3178_v47 = vunpack.c.l.s8.bf16 %v2944_v40  ;;  %v3175_v53 = vunpack.c.l.s8.bf16 %v2941_v58  ;;  %v3184_v56 = vunpack.c.h.s8.bf16 %v2944_v40 }
 0x5d3   :  { %v2842_v59 = vmax.f32 %v2836_v54, 0.0  ;;  %v3177_v54 = vunpack.c.l.s8.bf16 %v2943_v48  ;;  %v3181_v30 = vunpack.c.h.s8.bf16 %v2941_v58 }
 0x5d5   :  { %v5445_v60 = vpack.c.bf16 %v2842_v59, %v2842_v59  ;;  %3339 = vmatpush1.bf16.msra.mxu0 %v3133_v55  ;;  %3462 = vmatpush1.bf16.msra.mxu1 %v3135_v2  ;;  %v2835_v55 = vadd.f32 %v2814_v43, %v5442_v42  ;;  %v2959_v43 = vld [vmem:[#allocation7 + $0x6f0] sm:$0xff] }
 0x5d6   :  { %3340 = vmatprep.subr.bf16.mxu0 %v3140_v3  ;;  %3463 = vmatprep.subr.bf16.mxu1 %v3142_v8  ;;  %v3182_v8 = vunpack.c.h.s8.bf16 %v2942_v38  ;;  %v2962_v38 = vld [vmem:[#allocation7 + $0x708] sm:$0xff]  ;;  %v3211_v58 = vunpack.c.l.s8.bf16 %v2959_v43 }
 0x5d7   :  { %3356 = vmatprep.mubr.bf16.mxu0 %v5445_v60  ;;  %3479 = vmatprep.mubr.bf16.mxu1 %v5445_v60  ;;  %v2841_v42 = vmax.f32 %v2835_v55, 0.0  ;;  %v3217_v55 = vunpack.c.h.s8.bf16 %v2959_v43  ;;  %v2983_v43 = vld [vmem:[#allocation7 + $0x870] sm:$0xff] }
 0x5d9   :  { %3341 = vmatpush1.bf16.msra.mxu0 %v3139_v7  ;;  %3464 = vmatpush1.bf16.msra.mxu1 %v3141_v62  ;;  %v2948_v7 = vld [vmem:[#allocation7 + $0x638] sm:$0xff]  ;;  %v2950_v62 = vld [vmem:[#allocation7 + $0x648] sm:$0xff]  ;;  %v5458_v18 = vpack.c.bf16 %v2841_v42, %v2841_v42 }
 0x5da   :  { %3342 = vmatprep.subr.bf16.mxu0 %v3146_v21  ;;  %3465 = vmatprep.subr.bf16.mxu1 %v3148_v1 }
 0x5dd   :  { %3343 = vmatpush1.bf16.msra.mxu0 %v3145_v6  ;;  %3466 = vmatpush1.bf16.msra.mxu1 %v3147_v9  ;;  %v3190_v6 = vunpack.c.l.s8.bf16 %v2950_v62  ;;  %v2947_v9 = vld [vmem:[#allocation7 + $0x630] sm:$0xff] }
 0x5de   :  { %3344 = vmatprep.subr.bf16.mxu0 %v3152_v13  ;;  %3467 = vmatprep.subr.bf16.mxu1 %v3154_v14  ;;  %v2949_v14 = vld [vmem:[#allocation7 + $0x640] sm:$0xff]  ;;  %v3193_v27 = vunpack.c.h.s8.bf16 %v2947_v9 }
 0x5df   :  { %v3189_v19 = vunpack.c.l.s8.bf16 %v2949_v14 }
 0x5e1   :  { %3345 = vmatpush1.bf16.msra.mxu0 %v3151_v0  ;;  %3468 = vmatpush1.bf16.msra.mxu1 %v3153_v33  ;;  %v3194_v33 = vunpack.c.h.s8.bf16 %v2948_v7 }
 0x5e2   :  { %3346 = vmatprep.subr.bf16.mxu0 %v3158_v20  ;;  %3469 = vmatprep.subr.bf16.mxu1 %v3160_v24  ;;  %v3196_v20 = vunpack.c.h.s8.bf16 %v2950_v62  ;;  %v2954_v24 = vld [vmem:[#allocation7 + $0x698] sm:$0xff] }
 0x5e5   :  { %3347 = vmatpush1.bf16.msra.mxu0 %v3157_v61  ;;  %3470 = vmatpush1.bf16.msra.mxu1 %v3159_v28  ;;  %v3195_v61 = vunpack.c.h.s8.bf16 %v2949_v14  ;;  %v3200_v28 = vunpack.c.l.s8.bf16 %v2954_v24  ;;  %v2973_v14 = vld [vmem:[#allocation7 + $0x7c0] sm:$0xff] }
 0x5e6   :  { %3348 = vmatprep.subr.bf16.mxu0 %v3164_v29  ;;  %3471 = vmatprep.subr.bf16.mxu1 %v3166_v25  ;;  %v2953_v29 = vld [vmem:[#allocation7 + $0x690] sm:$0xff]  ;;  %v3202_v25 = vunpack.c.l.s8.bf16 %v2956_v26 }
 0x5e7   :  { %v3199_v32 = vunpack.c.l.s8.bf16 %v2953_v29  ;;  %v3205_v40 = vunpack.c.h.s8.bf16 %v2953_v29  ;;  %v2977_v29 = vld [vmem:[#allocation7 + $0x810] sm:$0xff] }
 0x5e9   :  { %3349 = vmatpush1.bf16.msra.mxu0 %v3163_v34  ;;  %3472 = vmatpush1.bf16.msra.mxu1 %v3165_v36  ;;  %v3201_v34 = vunpack.c.l.s8.bf16 %v2955_v31  ;;  %v3206_v36 = vunpack.c.h.s8.bf16 %v2954_v24  ;;  %v2978_v24 = vld [vmem:[#allocation7 + $0x818] sm:$0xff] }
 0x5ea   :  { %3350 = vmatprep.subr.bf16.mxu0 %v3170_v45  ;;  %3473 = vmatprep.subr.bf16.mxu1 %v3172_v51  ;;  %v3208_v45 = vunpack.c.h.s8.bf16 %v2956_v26  ;;  %v2960_v51 = vld [vmem:[#allocation7 + $0x6f8] sm:$0xff]  ;;  %v2980_v26 = vld [vmem:[#allocation7 + $0x828] sm:$0xff] }
 0x5ed   :  { %v2789_v49 = vpop.f32.mrb[40].mxu1  ;;  %3351 = vmatpush1.bf16.msra.mxu0 %v3169_v41  ;;  %3474 = vmatpush1.bf16.msra.mxu1 %v3171_v22  ;;  %v3207_v41 = vunpack.c.h.s8.bf16 %v2955_v31  ;;  %v3212_v22 = vunpack.c.l.s8.bf16 %v2960_v51  ;;  %v2979_v31 = vld [vmem:[#allocation7 + $0x820] sm:$0xff] }
 0x5ee   :  { %v5455_v2 = vadd.f32 %v2789_v49, %v5367_v15  ;;  %v2791_v3 = vpop.f32.mrb[41].mxu1  ;;  %3352 = vmatprep.subr.bf16.mxu0 %v3176_v46  ;;  %3475 = vmatprep.subr.bf16.mxu1 %v3178_v47  ;;  %v3188_v15 = vunpack.c.l.s8.bf16 %v2948_v7  ;;  %v3214_v46 = vunpack.c.l.s8.bf16 %v2962_v38  ;;  %v2961_v47 = vld [vmem:[#allocation7 + $0x700] sm:$0xff]  ;;  %v3218_v49 = vunpack.c.h.s8.bf16 %v2960_v51  ;;  %v2984_v51 = vld [vmem:[#allocation7 + $0x878] sm:$0xff] }
 0x5ef   :  { %v2801_v57 = vadd.f32 %v2791_v3, %v5369_v44  ;;  %v2793_v59 = vpop.f32.mrb[42].mxu1  ;;  %v3187_v44 = vunpack.c.l.s8.bf16 %v2947_v9  ;;  %v3213_v48 = vunpack.c.l.s8.bf16 %v2961_v47  ;;  %v3219_v3 = vunpack.c.h.s8.bf16 %v2961_v47  ;;  %v2971_v9 = vld [vmem:[#allocation7 + $0x7b0] sm:$0xff]  ;;  %v2985_v47 = vld [vmem:[#allocation7 + $0x880] sm:$0xff] }
 0x5f0   :  { %v2794_v21 = vpop.f32.mrb[43].mxu1  ;;  %v2967_v59 = vld [vmem:[#allocation7 + $0x760] sm:$0xff] }
 0x5f1   :  { %v2838_v1 = vadd.f32 %v2826_v50, %v2801_v57  ;;  %3353 = vmatpush1.bf16.msra.mxu0 %v3175_v53  ;;  %3476 = vmatpush1.bf16.msra.mxu1 %v3177_v54  ;;  %v3220_v50 = vunpack.c.h.s8.bf16 %v2962_v38  ;;  %v2966_v53 = vld [vmem:[#allocation7 + $0x758] sm:$0xff]  ;;  %v2968_v54 = vld [vmem:[#allocation7 + $0x768] sm:$0xff]  ;;  %v3225_v62 = vunpack.c.l.s8.bf16 %v2967_v59 }
 0x5f2   :  { %3354 = vmatprep.subr.bf16.mxu0 %v3182_v8  ;;  %3477 = vmatprep.subr.bf16.mxu1 %v3184_v56  ;;  %v3224_v8 = vunpack.c.l.s8.bf16 %v2966_v53  ;;  %v2965_v56 = vld [vmem:[#allocation7 + $0x750] sm:$0xff]  ;;  %v3226_v57 = vunpack.c.l.s8.bf16 %v2968_v54  ;;  %v3230_v21 = vunpack.c.h.s8.bf16 %v2966_v53  ;;  %v2986_v38 = vld [vmem:[#allocation7 + $0x888] sm:$0xff]  ;;  %v2990_v53 = vld [vmem:[#allocation7 + $0x8d8] sm:$0xff] }
 0x5f3   :  { %v2844_v13 = vmax.f32 %v2838_v1, 0.0  ;;  %v3223_v7 = vunpack.c.l.s8.bf16 %v2965_v56  ;;  %v3232_v1 = vunpack.c.h.s8.bf16 %v2968_v54  ;;  %v3229_v42 = vunpack.c.h.s8.bf16 %v2965_v56  ;;  %v2992_v54 = vld [vmem:[#allocation7 + $0x8e8] sm:$0xff] }
 0x5f4   :  { %v3272_v56 = vunpack.c.l.s8.bf16 %v2990_v53 }
 0x5f5   :  { %3355 = vmatpush1.bf16.msra.mxu0 %v3181_v30  ;;  %3478 = vmatpush1.bf16.msra.mxu1 %v3183_v4  ;;  %v5460_v0 = vpack.c.bf16 %v2844_v13, %v2844_v13  ;;  %v2972_v30 = vld [vmem:[#allocation7 + $0x7b8] sm:$0xff]  ;;  %v2974_v4 = vld [vmem:[#allocation7 + $0x7c8] sm:$0xff] }
 0x5f6   :  { %3365 = vmatprep.subr.bf16.mxu0 %v3188_v15  ;;  %3488 = vmatprep.subr.bf16.mxu1 %v3190_v6  ;;  %v3231_v15 = vunpack.c.h.s8.bf16 %v2967_v59  ;;  %v3236_v6 = vunpack.c.l.s8.bf16 %v2972_v30  ;;  %v3238_v13 = vunpack.c.l.s8.bf16 %v2974_v4  ;;  %v3274_v59 = vunpack.c.l.s8.bf16 %v2992_v54 }
 0x5f8   :  { %3357 = vmatmul.mubr.bf16.vlgmr.msra.gmra.mrb[16].mxu0 %v5458_v18  ;;  %3480 = vmatmul.mubr.bf16.vlgmr.msra.gmra.mrb[44].mxu1 %v5458_v18 }
 0x5f9   :  { %3366 = vmatpush1.bf16.msra.mxu0 %v3187_v44  ;;  %3397 = vmatprep.mubr.bf16.mxu0 %v5460_v0  ;;  %v3235_v44 = vunpack.c.l.s8.bf16 %v2971_v9 }
 0x5fa   :  { %3489 = vmatpush1.bf16.msra.mxu1 %v3189_v19  ;;  %3520 = vmatprep.mubr.bf16.mxu1 %v5460_v0  ;;  %v3237_v19 = vunpack.c.l.s8.bf16 %v2973_v14 }
 0x5fb   :  { %3367 = vmatprep.subr.bf16.mxu0 %v3194_v33  ;;  %3490 = vmatprep.subr.bf16.mxu1 %v3196_v20  ;;  %v3242_v33 = vunpack.c.h.s8.bf16 %v2972_v30  ;;  %v3244_v20 = vunpack.c.h.s8.bf16 %v2974_v4  ;;  %v3278_v30 = vunpack.c.h.s8.bf16 %v2990_v53  ;;  %v3280_v4 = vunpack.c.h.s8.bf16 %v2992_v54 }
 0x5fd   :  { %3368 = vmatpush1.bf16.msra.mxu0 %v3193_v27  ;;  %v3241_v27 = vunpack.c.h.s8.bf16 %v2971_v9 }
 0x5fe   :  { %3491 = vmatpush1.bf16.msra.mxu1 %v3195_v61  ;;  %3369 = vmatprep.subr.bf16.mxu0 %v3200_v28  ;;  %v3243_v61 = vunpack.c.h.s8.bf16 %v2973_v14  ;;  %v3248_v28 = vunpack.c.l.s8.bf16 %v2978_v24 }
 0x5ff   :  { %3492 = vmatprep.subr.bf16.mxu1 %v3202_v25  ;;  %v3250_v25 = vunpack.c.l.s8.bf16 %v2980_v26 }
 0x601   :  { %3370 = vmatpush1.bf16.msra.mxu0 %v3199_v32  ;;  %v3247_v32 = vunpack.c.l.s8.bf16 %v2977_v29 }
 0x602   :  { %3493 = vmatpush1.bf16.msra.mxu1 %v3201_v34  ;;  %3371 = vmatprep.subr.bf16.mxu0 %v3206_v36  ;;  %v3249_v34 = vunpack.c.l.s8.bf16 %v2979_v31  ;;  %v3254_v36 = vunpack.c.h.s8.bf16 %v2978_v24  ;;  %v2861_v24 = vld [vmem:[#allocation7 + $0xb0] sm:$0xff] }
 0x603   :  { %3494 = vmatprep.subr.bf16.mxu1 %v3208_v45  ;;  %v3256_v45 = vunpack.c.h.s8.bf16 %v2980_v26  ;;  %v3011_v26 = vunpack.c.l.s8.bf16 %v2861_v24 }
 0x605   :  { %3372 = vmatpush1.bf16.msra.mxu0 %v3205_v40  ;;  %v3253_v40 = vunpack.c.h.s8.bf16 %v2977_v29 }
 0x606   :  { %3495 = vmatpush1.bf16.msra.mxu1 %v3207_v41  ;;  %3373 = vmatprep.subr.bf16.mxu0 %v3212_v22  ;;  %v3255_v41 = vunpack.c.h.s8.bf16 %v2979_v31  ;;  %v3260_v22 = vunpack.c.l.s8.bf16 %v2984_v51 }
 0x607   :  { %3496 = vmatprep.subr.bf16.mxu1 %v3214_v46  ;;  %v3262_v46 = vunpack.c.l.s8.bf16 %v2986_v38 }
 0x609   :  { %3374 = vmatpush1.bf16.msra.mxu0 %v3211_v58  ;;  %v3259_v58 = vunpack.c.l.s8.bf16 %v2983_v43 }
 0x60a   :  { %3497 = vmatpush1.bf16.msra.mxu1 %v3213_v48  ;;  %3375 = vmatprep.subr.bf16.mxu0 %v3218_v49  ;;  %v3261_v48 = vunpack.c.l.s8.bf16 %v2985_v47  ;;  %v3266_v49 = vunpack.c.h.s8.bf16 %v2984_v51 }
 0x60b   :  { %3498 = vmatprep.subr.bf16.mxu1 %v3220_v50  ;;  %v3268_v50 = vunpack.c.h.s8.bf16 %v2986_v38 }
 0x60d   :  { %3376 = vmatpush1.bf16.msra.mxu0 %v3217_v55  ;;  %v3265_v55 = vunpack.c.h.s8.bf16 %v2983_v43  ;;  %v2879_v43 = vld [vmem:[#allocation7 + $0x1d0] sm:$0xff] }
 0x60e   :  { %3499 = vmatpush1.bf16.msra.mxu1 %v3219_v3  ;;  %3377 = vmatprep.subr.bf16.mxu0 %v3224_v8  ;;  %v2822_v3 = vrot.slane %v5422_v37, %v5353_v23  ;;  %v3267_v8 = vunpack.c.h.s8.bf16 %v2985_v47 }
 0x60f   :  { %3500 = vmatprep.subr.bf16.mxu1 %v3226_v57  ;;  %v2989_v57 = vld [vmem:[#allocation7 + $0x8d0] sm:$0xff] }
 0x610   :  { %v3277_v37 = vunpack.c.h.s8.bf16 %v2989_v57 }
 0x611   :  { %3378 = vmatpush1.bf16.msra.mxu0 %v3223_v7  ;;  %v2991_v7 = vld [vmem:[#allocation7 + $0x8e0] sm:$0xff] }
 0x612   :  { %3501 = vmatpush1.bf16.msra.mxu1 %v3225_v62  ;;  %3379 = vmatprep.subr.bf16.mxu0 %v3230_v21  ;;  %v3271_v62 = vunpack.c.l.s8.bf16 %v2989_v57  ;;  %v2837_v21 = vadd.f32 %v2822_v3, %v5455_v2 }
 0x613   :  { %3502 = vmatprep.subr.bf16.mxu1 %v3232_v1  ;;  %v3273_v1 = vunpack.c.l.s8.bf16 %v2991_v7 }
 0x615   :  { %3380 = vmatpush1.bf16.msra.mxu0 %v3229_v42  ;;  %v2856_v42 = vld [vmem:[#allocation7 + $0x58] sm:$0xff] }
 0x616   :  { %3503 = vmatpush1.bf16.msra.mxu1 %v3231_v15  ;;  %3381 = vmatprep.subr.bf16.mxu0 %v3236_v6  ;;  %v2843_v15 = vmax.f32 %v2837_v21, 0.0  ;;  %v3279_v6 = vunpack.c.h.s8.bf16 %v2991_v7  ;;  %v3000_v9 = vunpack.c.l.s8.bf16 %v2856_v42  ;;  %v3006_v2 = vunpack.c.h.s8.bf16 %v2856_v42  ;;  %v2898_v7 = vld [vmem:[#allocation7 + $0x2f8] sm:$0xff] }
 0x617   :  { %3504 = vmatprep.subr.bf16.mxu1 %v3238_v13  ;;  %v2855_v13 = vld [vmem:[#allocation7 + $0x50] sm:$0xff]  ;;  %v3084_v21 = vunpack.c.l.s8.bf16 %v2898_v7  ;;  %v2904_v42 = vld [vmem:[#allocation7 + $0x358] sm:$0xff] }
 0x618   :  { %v2999_v14 = vunpack.c.l.s8.bf16 %v2855_v13 }
 0x619   :  { %3382 = vmatpush1.bf16.msra.mxu0 %v3235_v44  ;;  %v5469_v44 = vpack.c.bf16 %v2843_v15, %v2843_v15  ;;  %v3096_v15 = vunpack.c.l.s8.bf16 %v2904_v42 }
 0x61a   :  { %3505 = vmatpush1.bf16.msra.mxu1 %v3237_v19  ;;  %3383 = vmatprep.subr.bf16.mxu0 %v3242_v33  ;;  %v2862_v19 = vld [vmem:[#allocation7 + $0xb8] sm:$0xff]  ;;  %v3005_v33 = vunpack.c.h.s8.bf16 %v2855_v13 }
 0x61b   :  { %3506 = vmatprep.subr.bf16.mxu1 %v3244_v20  ;;  %v3012_v20 = vunpack.c.l.s8.bf16 %v2862_v19 }
 0x61d   :  { %3384 = vmatpush1.bf16.msra.mxu0 %v3241_v27  ;;  %v3018_v27 = vunpack.c.h.s8.bf16 %v2862_v19  ;;  %v2910_v19 = vld [vmem:[#allocation7 + $0x3b8] sm:$0xff] }
 0x61e   :  { %3507 = vmatpush1.bf16.msra.mxu1 %v3243_v61  ;;  %3385 = vmatprep.subr.bf16.mxu0 %v3248_v28  ;;  %v2868_v61 = vld [vmem:[#allocation7 + $0x118] sm:$0xff]  ;;  %v3017_v28 = vunpack.c.h.s8.bf16 %v2861_v24  ;;  %v4973_v24 = vld [vmem:[#allocation8 + $0xa4] ss:$8 sps:$4 sm:$0xff]  }
 0x61f   :  { %3508 = vmatprep.subr.bf16.mxu1 %v3250_v25  ;;  %v3024_v29 = vunpack.c.l.s8.bf16 %v2868_v61  ;;  %v2867_v25 = vld [vmem:[#allocation7 + $0x110] sm:$0xff] }
 0x620   :  { %v3023_v31 = vunpack.c.l.s8.bf16 %v2867_v25 }
 0x621   :  { %3386 = vmatpush1.bf16.msra.mxu0 %v3247_v32  ;;  %v3030_v32 = vunpack.c.h.s8.bf16 %v2868_v61  ;;  %v2909_v61 = vld [vmem:[#allocation7 + $0x3b0] sm:$0xff] }
 0x622   :  { %3509 = vmatpush1.bf16.msra.mxu1 %v3249_v34  ;;  %3387 = vmatprep.subr.bf16.mxu0 %v3254_v36  ;;  %v2874_v34 = vld [vmem:[#allocation7 + $0x178] sm:$0xff] }
 0x623   :  { %3510 = vmatprep.subr.bf16.mxu1 %v3256_v45  ;;  %v3036_v36 = vunpack.c.l.s8.bf16 %v2874_v34  ;;  %v2873_v45 = vld [vmem:[#allocation7 + $0x170] sm:$0xff]  ;;  %v3042_v38 = vunpack.c.h.s8.bf16 %v2874_v34  ;;  %v4977_v34 = vld [vmem:[#allocation8 + $0xc4] ss:$8 sps:$4 sm:$0xff]  }
 0x624   :  { %v3035_v51 = vunpack.c.l.s8.bf16 %v2873_v45 }
 0x625   :  { %3388 = vmatpush1.bf16.msra.mxu0 %v3253_v40  ;;  %v2880_v40 = vld [vmem:[#allocation7 + $0x1d8] sm:$0xff] }
 0x626   :  { %3511 = vmatpush1.bf16.msra.mxu1 %v3255_v41  ;;  %3389 = vmatprep.subr.bf16.mxu0 %v3260_v22  ;;  %v3041_v41 = vunpack.c.h.s8.bf16 %v2873_v45  ;;  %v3048_v22 = vunpack.c.l.s8.bf16 %v2880_v40  ;;  %v3054_v47 = vunpack.c.h.s8.bf16 %v2880_v40  ;;  %v4978_v45 = vld [vmem:[#allocation8 + $0x44] ss:$8 sps:$4 sm:$0xff]  }
 0x627   :  { %3512 = vmatprep.subr.bf16.mxu1 %v3262_v46  ;;  %v3047_v46 = vunpack.c.l.s8.bf16 %v2879_v43 }
 0x629   :  { %3390 = vmatpush1.bf16.msra.mxu0 %v3259_v58  ;;  %v2886_v58 = vld [vmem:[#allocation7 + $0x238] sm:$0xff] }
 0x62a   :  { %3513 = vmatpush1.bf16.msra.mxu1 %v3261_v48  ;;  %3391 = vmatprep.subr.bf16.mxu0 %v3266_v49  ;;  %v3053_v48 = vunpack.c.h.s8.bf16 %v2879_v43  ;;  %v3060_v49 = vunpack.c.l.s8.bf16 %v2886_v58  ;;  %v3066_v54 = vunpack.c.h.s8.bf16 %v2886_v58  ;;  %v4981_v58 = vld [vmem:[#allocation8 + $0xe4] ss:$8 sps:$4 sm:$0xff]  }
 0x62b   :  { %3514 = vmatprep.subr.bf16.mxu1 %v3268_v50  ;;  %v2885_v50 = vld [vmem:[#allocation7 + $0x230] sm:$0xff] }
 0x62c   :  { %v3059_v53 = vunpack.c.l.s8.bf16 %v2885_v50  ;;  %v3065_v3 = vunpack.c.h.s8.bf16 %v2885_v50 }
 0x62d   :  { %3392 = vmatpush1.bf16.msra.mxu0 %v3265_v55  ;;  %v2892_v55 = vld [vmem:[#allocation7 + $0x298] sm:$0xff] }
 0x62e   :  { %3515 = vmatpush1.bf16.msra.mxu1 %v3267_v8  ;;  %3393 = vmatprep.subr.bf16.mxu0 %v3272_v56  ;;  %v3072_v8 = vunpack.c.l.s8.bf16 %v2892_v55  ;;  %v2891_v56 = vld [vmem:[#allocation7 + $0x290] sm:$0xff] }
 0x62f   :  { %3516 = vmatprep.subr.bf16.mxu1 %v3274_v59  ;;  %v3071_v57 = vunpack.c.l.s8.bf16 %v2891_v56  ;;  %v3078_v59 = vunpack.c.h.s8.bf16 %v2892_v55 }
 0x631   :  { %3394 = vmatpush1.bf16.msra.mxu0 %v3271_v62  ;;  %v3077_v62 = vunpack.c.h.s8.bf16 %v2891_v56  ;;  %v2927_v56 = vld [vmem:[#allocation7 + $0x4d0] sm:$0xff] }
 0x632   :  { %3517 = vmatpush1.bf16.msra.mxu1 %v3273_v1  ;;  %3395 = vmatprep.subr.bf16.mxu0 %v3278_v30  ;;  %v2897_v1 = vld [vmem:[#allocation7 + $0x2f0] sm:$0xff] }
 0x633   :  { %3518 = vmatprep.subr.bf16.mxu1 %v3280_v4  ;;  %v3083_v30 = vunpack.c.l.s8.bf16 %v2897_v1  ;;  %v3090_v4 = vunpack.c.h.s8.bf16 %v2898_v7 }
 0x635   :  { %3396 = vmatpush1.bf16.msra.mxu0 %v3277_v37  ;;  %v3089_v37 = vunpack.c.h.s8.bf16 %v2897_v1 }
 0x636   :  { %3519 = vmatpush1.bf16.msra.mxu1 %v3279_v6  ;;  %3529 = vmatprep.subr.bf16.mxu0 %v3000_v9  ;;  %v2903_v6 = vld [vmem:[#allocation7 + $0x350] sm:$0xff]  ;;  %v4969_v9 = vld [vmem:[#allocation8 + $0x84] ss:$8 sps:$4 sm:$0xff]  }
 0x637   :  { %v3095_v13 = vunpack.c.l.s8.bf16 %v2903_v6  ;;  %4577 = vmatprep.subr.bf16.mxu1 %v4969_v9  ;;  %v2939_v9 = vld [vmem:[#allocation7 + $0x590] sm:$0xff] }
 0x638   :  { %3398 = vmatmul.mubr.bf16.vlgmr.msra.gmra.mrb[16].mxu0 %v5469_v44 }
 0x639   :  { %3521 = vmatmul.mubr.bf16.vlgmr.msra.gmra.mrb[44].mxu1 %v5469_v44  ;;  %3530 = vmatpush1.bf16.msra.mxu0 %v2999_v14  ;;  %v4970_v14 = vld [vmem:[#allocation8 + $0x4] ss:$8 sps:$4 sm:$0xff]  }
 0x63a   :  { %3561 = vmatprep.mubr.bf16.mxu0 %v5430_v52  ;;  %3531 = vmatprep.subr.bf16.mxu0 %v3006_v2  ;;  %v3029_v52 = vunpack.c.h.s8.bf16 %v2867_v25  ;;  %v3102_v2 = vunpack.c.h.s8.bf16 %v2904_v42  ;;  %v3107_v25 = vunpack.c.l.s8.bf16 %v2909_v61 }
 0x63b   :  { %4578 = vmatpush3.bf16.msra.mxu1 %v4970_v14 }
 0x63d   :  { %3532 = vmatpush1.bf16.msra.mxu0 %v3005_v33  ;;  %v4971_v33 = vld [vmem:[#allocation8 + $0x94] ss:$8 sps:$4 sm:$0xff]  }
 0x63e   :  { %3533 = vmatprep.subr.bf16.mxu0 %v3012_v20  ;;  %v4972_v20 = vld [vmem:[#allocation8 + $0x14] ss:$8 sps:$4 sm:$0xff]   ;;  %4579 = vmatprep.subr.bf16.mxu1 %v4971_v33 }
 0x63f   :  { %4580 = vmatpush3.bf16.msra.mxu1 %v4972_v20  ;;  %v2945_v20 = vld [vmem:[#allocation7 + $0x5f0] sm:$0xff] }
 0x640   :  { %4581 = vmatprep.subr.bf16.mxu1 %v4973_v24  ;;  %v3179_v24 = vunpack.c.l.s8.bf16 %v2945_v20 }
 0x641   :  { %3534 = vmatpush1.bf16.msra.mxu0 %v3011_v26  ;;  %v3101_v26 = vunpack.c.h.s8.bf16 %v2903_v6 }
 0x642   :  { %3535 = vmatprep.subr.bf16.mxu0 %v3018_v27  ;;  %v3108_v27 = vunpack.c.l.s8.bf16 %v2910_v19 }
 0x645   :  { %3536 = vmatpush1.bf16.msra.mxu0 %v3017_v28  ;;  %v4974_v28 = vld [vmem:[#allocation8 + $0x24] ss:$8 sps:$4 sm:$0xff]  }
 0x646   :  { %3537 = vmatprep.subr.bf16.mxu0 %v3024_v29  ;;  %v4975_v29 = vld [vmem:[#allocation8 + $0xb4] ss:$8 sps:$4 sm:$0xff]   ;;  %4582 = vmatpush3.bf16.msra.mxu1 %v4974_v28 }
 0x647   :  { %4583 = vmatprep.subr.bf16.mxu1 %v4975_v29  ;;  %v2951_v29 = vld [vmem:[#allocation7 + $0x650] sm:$0xff] }
 0x649   :  { %3538 = vmatpush1.bf16.msra.mxu0 %v3023_v31  ;;  %v3114_v31 = vunpack.c.h.s8.bf16 %v2910_v19  ;;  %v3173_v19 = vunpack.c.h.s8.bf16 %v2939_v9 }
 0x64a   :  { %3539 = vmatprep.subr.bf16.mxu0 %v3030_v32  ;;  %v4976_v32 = vld [vmem:[#allocation8 + $0x34] ss:$8 sps:$4 sm:$0xff]  }
 0x64b   :  { %4584 = vmatpush3.bf16.msra.mxu1 %v4976_v32  ;;  %v3197_v32 = vunpack.c.h.s8.bf16 %v2951_v29 }
 0x64c   :  { %4585 = vmatprep.subr.bf16.mxu1 %v4977_v34 }
 0x64d   :  { %3540 = vmatpush1.bf16.msra.mxu0 %v3029_v52 }
 0x64e   :  { %3541 = vmatprep.subr.bf16.mxu0 %v3036_v36  ;;  %v2915_v36 = vld [vmem:[#allocation7 + $0x410] sm:$0xff] }
 0x64f   :  { %4586 = vmatpush3.bf16.msra.mxu1 %v4978_v45  ;;  %v3125_v43 = vunpack.c.h.s8.bf16 %v2915_v36  ;;  %v2964_v45 = vld [vmem:[#allocation7 + $0x718] sm:$0xff] }
 0x651   :  { %3542 = vmatpush1.bf16.msra.mxu0 %v3035_v51  ;;  %v4979_v51 = vld [vmem:[#allocation8 + $0xd4] ss:$8 sps:$4 sm:$0xff]  }
 0x652   :  { %3543 = vmatprep.subr.bf16.mxu0 %v3042_v38  ;;  %v3119_v38 = vunpack.c.l.s8.bf16 %v2915_v36  ;;  %4587 = vmatprep.subr.bf16.mxu1 %v4979_v51 }
 0x655   :  { %3544 = vmatpush1.bf16.msra.mxu0 %v3041_v41  ;;  %v2922_v41 = vld [vmem:[#allocation7 + $0x478] sm:$0xff] }
 0x656   :  { %3545 = vmatprep.subr.bf16.mxu0 %v3048_v22  ;;  %v4980_v22 = vld [vmem:[#allocation8 + $0x54] ss:$8 sps:$4 sm:$0xff]   ;;  %v3138_v50 = vunpack.c.h.s8.bf16 %v2922_v41 }
 0x657   :  { %4588 = vmatpush3.bf16.msra.mxu1 %v4980_v22  ;;  %v2970_v22 = vld [vmem:[#allocation7 + $0x778] sm:$0xff] }
 0x658   :  { %4589 = vmatprep.subr.bf16.mxu1 %v4981_v58  ;;  %v3234_v58 = vunpack.c.h.s8.bf16 %v2970_v22 }
 0x659   :  { %3546 = vmatpush1.bf16.msra.mxu0 %v3047_v46  ;;  %v3132_v46 = vunpack.c.l.s8.bf16 %v2922_v41 }
 0x65a   :  { %3547 = vmatprep.subr.bf16.mxu0 %v3054_v47  ;;  %v2921_v47 = vld [vmem:[#allocation7 + $0x470] sm:$0xff] }
 0x65b   :  { %v3137_v55 = vunpack.c.h.s8.bf16 %v2921_v47 }
 0x65d   :  { %3548 = vmatpush1.bf16.msra.mxu0 %v3053_v48  ;;  %v3131_v48 = vunpack.c.l.s8.bf16 %v2921_v47 }
 0x65e   :  { %3549 = vmatprep.subr.bf16.mxu0 %v3060_v49  ;;  %v4982_v49 = vld [vmem:[#allocation8 + $0x64] ss:$8 sps:$4 sm:$0xff]  }
 0x65f   :  { %4590 = vmatpush3.bf16.msra.mxu1 %v4982_v49 }
 0x661   :  { %3550 = vmatpush1.bf16.msra.mxu0 %v3059_v53  ;;  %v2928_v53 = vld [vmem:[#allocation7 + $0x4d8] sm:$0xff] }
 0x662   :  { %3551 = vmatprep.subr.bf16.mxu0 %v3066_v54  ;;  %v4983_v54 = vld [vmem:[#allocation8 + $0xf4] ss:$8 sps:$4 sm:$0xff]   ;;  %v3150_v7 = vunpack.c.h.s8.bf16 %v2928_v53 }
 0x663   :  { %4591 = vmatprep.subr.bf16.mxu1 %v4983_v54 }
 0x665   :  { %3552 = vmatpush1.bf16.msra.mxu0 %v3065_v3  ;;  %v4984_v3 = vld [vmem:[#allocation8 + $0x74] ss:$8 sps:$4 sm:$0xff]  }
 0x666   :  { %3553 = vmatprep.subr.bf16.mxu0 %v3072_v8  ;;  %v3144_v8 = vunpack.c.l.s8.bf16 %v2928_v53  ;;  %4592 = vmatpush3.bf16.msra.mxu1 %v4984_v3  ;;  %v2975_v53 = vld [vmem:[#allocation7 + $0x7d0] sm:$0xff]  ;;  %v2982_v3 = vld [vmem:[#allocation7 + $0x838] sm:$0xff] }
 0x667   :  { %v3239_v54 = vunpack.c.l.s8.bf16 %v2975_v53 }
 0x669   :  { %3554 = vmatpush1.bf16.msra.mxu0 %v3071_v57  ;;  %v4985_v57 = vld [vmem:[#allocation8 + $0x184] ss:$8 sps:$4 sm:$0xff]  }
 0x66a   :  { %3555 = vmatprep.subr.bf16.mxu0 %v3078_v59  ;;  %v3143_v59 = vunpack.c.l.s8.bf16 %v2927_v56  ;;  %4599 = vmatprep.subr.bf16.mxu1 %v4985_v57  ;;  %v2981_v57 = vld [vmem:[#allocation7 + $0x830] sm:$0xff] }
 0x66d   :  { %3556 = vmatpush1.bf16.msra.mxu0 %v3077_v62  ;;  %v2934_v62 = vld [vmem:[#allocation7 + $0x538] sm:$0xff] }
 0x66e   :  { %3557 = vmatprep.subr.bf16.mxu0 %v3084_v21  ;;  %v3149_v21 = vunpack.c.h.s8.bf16 %v2927_v56  ;;  %v3156_v1 = vunpack.c.l.s8.bf16 %v2934_v62  ;;  %v3162_v42 = vunpack.c.h.s8.bf16 %v2934_v62  ;;  %v3252_v56 = vunpack.c.l.s8.bf16 %v2982_v3  ;;  %v2988_v62 = vld [vmem:[#allocation7 + $0x898] sm:$0xff] }
 0x671   :  { %3558 = vmatpush1.bf16.msra.mxu0 %v3083_v30  ;;  %v2933_v30 = vld [vmem:[#allocation7 + $0x530] sm:$0xff] }
 0x672   :  { %3559 = vmatprep.subr.bf16.mxu0 %v3090_v4  ;;  %v3155_v4 = vunpack.c.l.s8.bf16 %v2933_v30 }
 0x675   :  { %3560 = vmatpush1.bf16.msra.mxu0 %v3089_v37  ;;  %v2940_v37 = vld [vmem:[#allocation7 + $0x598] sm:$0xff] }
 0x676   :  { %3570 = vmatprep.subr.bf16.mxu0 %v3096_v15  ;;  %v3161_v15 = vunpack.c.h.s8.bf16 %v2933_v30  ;;  %v3168_v6 = vunpack.c.l.s8.bf16 %v2940_v37  ;;  %v3174_v14 = vunpack.c.h.s8.bf16 %v2940_v37  ;;  %v2987_v30 = vld [vmem:[#allocation7 + $0x890] sm:$0xff]  ;;  %v2994_v37 = vld [vmem:[#allocation7 + $0x8f8] sm:$0xff] }
 0x678   :  { %3562 = vmatmul.mubr.bf16.vlgmr.msra.gmra.mrb[20].mxu0 %v5432_v39  ;;  %v2916_v39 = vld [vmem:[#allocation7 + $0x418] sm:$0xff] }
 0x679   :  { %3571 = vmatpush1.bf16.msra.mxu0 %v3095_v13  ;;  %3602 = vmatprep.mubr.bf16.mxu0 %v5445_v60  ;;  %v3113_v60 = vunpack.c.h.s8.bf16 %v2909_v61  ;;  %v3120_v52 = vunpack.c.l.s8.bf16 %v2916_v39  ;;  %v3126_v40 = vunpack.c.h.s8.bf16 %v2916_v39  ;;  %v3167_v13 = vunpack.c.l.s8.bf16 %v2939_v9  ;;  %v2958_v39 = vld [vmem:[#allocation7 + $0x6b8] sm:$0xff]  ;;  %v2993_v9 = vld [vmem:[#allocation7 + $0x8f0] sm:$0xff] }
 0x67a   :  { %3572 = vmatprep.subr.bf16.mxu0 %v3102_v2  ;;  %v2946_v2 = vld [vmem:[#allocation7 + $0x5f8] sm:$0xff]  ;;  %v3185_v61 = vunpack.c.h.s8.bf16 %v2945_v20  ;;  %v3204_v34 = vunpack.c.l.s8.bf16 %v2958_v39  ;;  %v3210_v36 = vunpack.c.h.s8.bf16 %v2958_v39 }
 0x67b   :  { %v3180_v33 = vunpack.c.l.s8.bf16 %v2946_v2  ;;  %v101_v20 = vld [vmem:[#allocation10 + $0x3] ss:$8 sm:$0xf] }
 0x67d   :  { %3573 = vmatpush1.bf16.msra.mxu0 %v3101_v26  ;;  %v3186_v26 = vunpack.c.h.s8.bf16 %v2946_v2  ;;  %v3281_v2 = vunpack.c.h.s8.bf16 %v2993_v9 }
 0x67e   :  { %3574 = vmatprep.subr.bf16.mxu0 %v3108_v27  ;;  %v2952_v27 = vld [vmem:[#allocation7 + $0x658] sm:$0xff] }
 0x67f   :  { %v3192_v28 = vunpack.c.l.s8.bf16 %v2952_v27 }
 0x681   :  { %3575 = vmatpush1.bf16.msra.mxu0 %v3107_v25  ;;  %v3191_v25 = vunpack.c.l.s8.bf16 %v2951_v29 }
 0x682   :  { %3576 = vmatprep.subr.bf16.mxu0 %v3114_v31  ;;  %v3198_v31 = vunpack.c.h.s8.bf16 %v2952_v27 }
 0x685   :  { %3577 = vmatpush1.bf16.msra.mxu0 %v3113_v60  ;;  %v2957_v60 = vld [vmem:[#allocation7 + $0x6b0] sm:$0xff] }
 0x686   :  { %3578 = vmatprep.subr.bf16.mxu0 %v3120_v52  ;;  %v3203_v52 = vunpack.c.l.s8.bf16 %v2957_v60  ;;  %v3209_v51 = vunpack.c.h.s8.bf16 %v2957_v60 }
 0x689   :  { %3579 = vmatpush1.bf16.msra.mxu0 %v3119_v38  ;;  %v3216_v38 = vunpack.c.l.s8.bf16 %v2964_v45 }
 0x68a   :  { %3580 = vmatprep.subr.bf16.mxu0 %v3126_v40  ;;  %v2963_v40 = vld [vmem:[#allocation7 + $0x710] sm:$0xff] }
 0x68b   :  { %v3215_v41 = vunpack.c.l.s8.bf16 %v2963_v40 }
 0x68d   :  { %3581 = vmatpush1.bf16.msra.mxu0 %v3125_v43  ;;  %v3228_v43 = vunpack.c.l.s8.bf16 %v2970_v22 }
 0x68e   :  { %3582 = vmatprep.subr.bf16.mxu0 %v3132_v46  ;;  %v2969_v46 = vld [vmem:[#allocation7 + $0x770] sm:$0xff] }
 0x68f   :  { %v3227_v47 = vunpack.c.l.s8.bf16 %v2969_v46  ;;  %v3233_v49 = vunpack.c.h.s8.bf16 %v2969_v46 }
 0x691   :  { %3583 = vmatpush1.bf16.msra.mxu0 %v3131_v48  ;;  %v2976_v48 = vld [vmem:[#allocation7 + $0x7d8] sm:$0xff] }
 0x692   :  { %3584 = vmatprep.subr.bf16.mxu0 %v3138_v50  ;;  %v3240_v50 = vunpack.c.l.s8.bf16 %v2976_v48 }
 0x695   :  { %3585 = vmatpush1.bf16.msra.mxu0 %v3137_v55  ;;  %v3246_v55 = vunpack.c.h.s8.bf16 %v2976_v48  ;;  %v4987_v48 = vld [vmem:[#allocation8 + $0x194] ss:$8 sps:$4 sm:$0xff]  }
 0x696   :  { %3586 = vmatprep.subr.bf16.mxu0 %v3144_v8  ;;  %v3245_v8 = vunpack.c.h.s8.bf16 %v2975_v53  ;;  %v4990_v53 = vld [vmem:[#allocation8 + $0x124] ss:$8 sps:$4 sm:$0xff]  }
 0x699   :  { %3587 = vmatpush1.bf16.msra.mxu0 %v3143_v59  ;;  %v3251_v59 = vunpack.c.l.s8.bf16 %v2981_v57 }
 0x69a   :  { %3588 = vmatprep.subr.bf16.mxu0 %v3150_v7  ;;  %v3258_v7 = vunpack.c.h.s8.bf16 %v2982_v3  ;;  %v4993_v3 = vld [vmem:[#allocation8 + $0x1c4] ss:$8 sps:$4 sm:$0xff]  }
 0x69d   :  { %3589 = vmatpush1.bf16.msra.mxu0 %v3149_v21  ;;  %v3257_v21 = vunpack.c.h.s8.bf16 %v2981_v57  ;;  %v4995_v57 = vld [vmem:[#allocation8 + $0x1d4] ss:$8 sps:$4 sm:$0xff]  }
 0x69e   :  { %3590 = vmatprep.subr.bf16.mxu0 %v3156_v1  ;;  %v3264_v1 = vunpack.c.l.s8.bf16 %v2988_v62 }
 0x6a1   :  { %3591 = vmatpush1.bf16.msra.mxu0 %v3155_v4  ;;  %v3263_v4 = vunpack.c.l.s8.bf16 %v2987_v30 }
 0x6a2   :  { %3592 = vmatprep.subr.bf16.mxu0 %v3162_v42  ;;  %v3270_v42 = vunpack.c.h.s8.bf16 %v2988_v62 }
 0x6a5   :  { %3593 = vmatpush1.bf16.msra.mxu0 %v3161_v15  ;;  %v3269_v15 = vunpack.c.h.s8.bf16 %v2987_v30 }
 0x6a6   :  { %3594 = vmatprep.subr.bf16.mxu0 %v3168_v6  ;;  %v3276_v6 = vunpack.c.l.s8.bf16 %v2994_v37 }
 0x6a9   :  { %3595 = vmatpush1.bf16.msra.mxu0 %v3167_v13  ;;  %v3275_v13 = vunpack.c.l.s8.bf16 %v2993_v9 }
 0x6aa   :  { %3596 = vmatprep.subr.bf16.mxu0 %v3174_v14  ;;  %v3282_v14 = vunpack.c.h.s8.bf16 %v2994_v37 }
 0x6ad   :  { %3597 = vmatpush1.bf16.msra.mxu0 %v3173_v19  ;;  %v111_v19 = vld [vmem:[#allocation10 + $0x7] ss:$8 sm:$0xf] }
 0x6ae   :  { %3598 = vmatprep.subr.bf16.mxu0 %v3180_v33  ;;  %v112_v33 = vld [vmem:[#allocation10 + $0x7] ss:$8 sm:$0x30] }
 0x6b1   :  { %3599 = vmatpush1.bf16.msra.mxu0 %v3179_v24  ;;  %v102_v24 = vld [vmem:[#allocation10 + $0x3] ss:$8 sm:$0x30] }
 0x6b2   :  { %3600 = vmatprep.subr.bf16.mxu0 %v3186_v26  ;;  %v5479_v26 = vor.u32 %v112_v33, %v111_v19  ;;  %v5481_v27 = vor.u32 %v102_v24, %v101_v20  ;;  %v5007_v19 = vld [vmem:[#allocation8 + $0x2b4] ss:$8 sps:$4 sm:$0xff]   ;;  %v5009_v20 = vld [vmem:[#allocation8 + $0x2c4] ss:$8 sps:$4 sm:$0xff]  }
 0x6b3   :  { %v5008_v33 = vld [vmem:[#allocation8 + $0x234] ss:$8 sps:$4 sm:$0xff]   ;;  %v5010_v24 = vld [vmem:[#allocation8 + $0x244] ss:$8 sps:$4 sm:$0xff]  }
 0x6b4   :  { %v3693_v29 = vrot.slane %v5481_v27, %v5295_v16  ;;  %v3705_v60 = vrot.slane %v5481_v27, %v5318_v5  ;;  %v3701_v62 = vrot.slane %v5481_v27, %v5329_v63 }
 0x6b5   :  { %3601 = vmatpush1.bf16.msra.mxu0 %v3185_v61  ;;  %v3656_v61 = vrot.slane %v5479_v26, %v5295_v16 }
 0x6b6   :  { %3611 = vmatprep.subr.bf16.mxu0 %v3192_v28  ;;  %v3660_v28 = vrot.slane %v5479_v26, %v5298_v17 }
 0x6b8   :  { %3603 = vmatmul.mubr.bf16.vlgmr.msra.gmra.mrb[20].mxu0 %v5458_v18  ;;  %v3222_v18 = vunpack.c.h.s8.bf16 %v2964_v45 }
 0x6b9   :  { %3612 = vmatpush1.bf16.msra.mxu0 %v3191_v25  ;;  %3643 = vmatprep.mubr.bf16.mxu0 %v5460_v0  ;;  %v3221_v0 = vunpack.c.h.s8.bf16 %v2963_v40 }
 0x6ba   :  { %3613 = vmatprep.subr.bf16.mxu0 %v3198_v31  ;;  %v3697_v31 = vrot.slane %v5481_v27, %v5298_v17 }
 0x6bd   :  { %3614 = vmatpush1.bf16.msra.mxu0 %v3197_v32 }
 0x6be   :  { %3615 = vmatprep.subr.bf16.mxu0 %v3204_v34 }
 0x6c1   :  { %3616 = vmatpush1.bf16.msra.mxu0 %v3203_v52 }
 0x6c2   :  { %3617 = vmatprep.subr.bf16.mxu0 %v3210_v36 }
 0x6c5   :  { %3618 = vmatpush1.bf16.msra.mxu0 %v3209_v51 }
 0x6c6   :  { %3619 = vmatprep.subr.bf16.mxu0 %v3216_v38 }
 0x6c9   :  { %3620 = vmatpush1.bf16.msra.mxu0 %v3215_v41 }
 0x6ca   :  { %3621 = vmatprep.subr.bf16.mxu0 %v3222_v18 }
 0x6cd   :  { %3622 = vmatpush1.bf16.msra.mxu0 %v3221_v0 }
 0x6ce   :  { %3623 = vmatprep.subr.bf16.mxu0 %v3228_v43 }
 0x6d1   :  { %3624 = vmatpush1.bf16.msra.mxu0 %v3227_v47  ;;  %v4986_v47 = vld [vmem:[#allocation8 + $0x104] ss:$8 sps:$4 sm:$0xff]  }
 0x6d2   :  { %3625 = vmatprep.subr.bf16.mxu0 %v3234_v58 }
 0x6d5   :  { %3626 = vmatpush1.bf16.msra.mxu0 %v3233_v49 }
 0x6d6   :  { %3627 = vmatprep.subr.bf16.mxu0 %v3240_v50  ;;  %v4989_v50 = vld [vmem:[#allocation8 + $0x1a4] ss:$8 sps:$4 sm:$0xff]  }
 0x6d9   :  { %3628 = vmatpush1.bf16.msra.mxu0 %v3239_v54  ;;  %v4991_v54 = vld [vmem:[#allocation8 + $0x1b4] ss:$8 sps:$4 sm:$0xff]  }
 0x6da   :  { %3629 = vmatprep.subr.bf16.mxu0 %v3246_v55  ;;  %v4992_v55 = vld [vmem:[#allocation8 + $0x134] ss:$8 sps:$4 sm:$0xff]  }
 0x6dd   :  { %3630 = vmatpush1.bf16.msra.mxu0 %v3245_v8  ;;  %v4994_v8 = vld [vmem:[#allocation8 + $0x144] ss:$8 sps:$4 sm:$0xff]  }
 0x6de   :  { %3631 = vmatprep.subr.bf16.mxu0 %v3252_v56  ;;  %v3664_v56 = vrot.slane %v5479_v26, %v5329_v63  ;;  %v5004_v63 = vld [vmem:[#allocation8 + $0x214] ss:$8 sps:$4 sm:$0xff]  }
 0x6e1   :  { %3632 = vmatpush1.bf16.msra.mxu0 %v3251_v59  ;;  %v4996_v59 = vld [vmem:[#allocation8 + $0x154] ss:$8 sps:$4 sm:$0xff]  }
 0x6e2   :  { %3633 = vmatprep.subr.bf16.mxu0 %v3258_v7 }
 0x6e5   :  { %3634 = vmatpush1.bf16.msra.mxu0 %v3257_v21  ;;  %v4997_v21 = vld [vmem:[#allocation8 + $0x1e4] ss:$8 sps:$4 sm:$0xff]  }
 0x6e6   :  { %3635 = vmatprep.subr.bf16.mxu0 %v3264_v1  ;;  %v4998_v1 = vld [vmem:[#allocation8 + $0x164] ss:$8 sps:$4 sm:$0xff]  }
 0x6e9   :  { %3636 = vmatpush1.bf16.msra.mxu0 %v3263_v4  ;;  %v4999_v4 = vld [vmem:[#allocation8 + $0x1f4] ss:$8 sps:$4 sm:$0xff]  }
 0x6ea   :  { %3637 = vmatprep.subr.bf16.mxu0 %v3270_v42  ;;  %v5000_v42 = vld [vmem:[#allocation8 + $0x174] ss:$8 sps:$4 sm:$0xff]  }
 0x6ed   :  { %3638 = vmatpush1.bf16.msra.mxu0 %v3269_v15  ;;  %v5001_v15 = vld [vmem:[#allocation8 + $0x284] ss:$8 sps:$4 sm:$0xff]  }
 0x6ee   :  { %3639 = vmatprep.subr.bf16.mxu0 %v3276_v6  ;;  %v5002_v6 = vld [vmem:[#allocation8 + $0x204] ss:$8 sps:$4 sm:$0xff]  }
 0x6f1   :  { %3640 = vmatpush1.bf16.msra.mxu0 %v3275_v13  ;;  %v5003_v13 = vld [vmem:[#allocation8 + $0x294] ss:$8 sps:$4 sm:$0xff]  }
 0x6f2   :  { %3641 = vmatprep.subr.bf16.mxu0 %v3282_v14  ;;  %v5005_v14 = vld [vmem:[#allocation8 + $0x2a4] ss:$8 sps:$4 sm:$0xff]  }
 0x6f5   :  { %3642 = vmatpush1.bf16.msra.mxu0 %v3281_v2  ;;  %v5006_v2 = vld [vmem:[#allocation8 + $0x224] ss:$8 sps:$4 sm:$0xff]  }
 0x6f8   :  { %3644 = vmatmul.mubr.bf16.vlgmr.msra.gmra.mrb[20].mxu0 %v5469_v44  ;;  %v3668_v44 = vrot.slane %v5479_v26, %v5318_v5  ;;  %v4988_v5 = vld [vmem:[#allocation8 + $0x114] ss:$8 sps:$4 sm:$0xff]  }
 0x70b   :  { %v3399_v25 = vpop.f32.mrb[16].mxu0 }
 0x70c   :  { %v3683_v39 = vmul.f32 %v3656_v61, %v3399_v25  ;;  %v3522_v32 = vpop.f32.mrb[44].mxu1  ;;  %v3401_v34 = vpop.f32.mrb[17].mxu0  ;;  %v5011_v61 = vld [vmem:[#allocation8 + $0x2d4] ss:$8 sps:$4 sm:$0xff]  }
 0x70d   :  { %v3684_v52 = vmul.f32 %v3660_v28, %v3401_v34  ;;  %v3524_v36 = vpop.f32.mrb[45].mxu1  ;;  %v3403_v45 = vpop.f32.mrb[18].mxu0  ;;  %v3685_v7 = vmul.f32 %v3664_v56, %v3522_v32  ;;  %v5012_v28 = vld [vmem:[#allocation8 + $0x254] ss:$8 sps:$4 sm:$0xff]   ;;  %v3676_v32 = vrot.slane %v5479_v26, %v5336_v10  ;;  %v3709_v34 = vrot.slane %v5481_v27, %v5353_v23 }
 0x70e   :  { %v3720_v51 = vadd.f32 %v3693_v29, %v3683_v39  ;;  %v3686_v38 = vmul.f32 %v3668_v44, %v3524_v36  ;;  %v3526_v40 = vpop.f32.mrb[46].mxu1  ;;  %v3404_v16 = vpop.f32.mrb[19].mxu0  ;;  %v5013_v29 = vld [vmem:[#allocation8 + $0x2e4] ss:$8 sps:$4 sm:$0xff]   ;;  %v5015_v25 = vld [vmem:[#allocation8 + $0x2f4] ss:$8 sps:$4 sm:$0xff]   ;;  %v3672_v39 = vrot.slane %v5479_v26, %v5353_v23 }
 0x70f   :  { %v3721_v41 = vadd.f32 %v3697_v31, %v3684_v52  ;;  %v3527_v18 = vpop.f32.mrb[47].mxu1  ;;  %v3722_v30 = vadd.f32 %v3701_v62, %v3685_v7  ;;  %v5014_v44 = vld [vmem:[#allocation8 + $0x264] ss:$8 sps:$4 sm:$0xff]   ;;  %v5016_v31 = vld [vmem:[#allocation8 + $0x274] ss:$8 sps:$4 sm:$0xff]   ;;  %v3713_v52 = vrot.slane %v5481_v27, %v5336_v10 }
 0x710   :  { %v3726_v22 = vmax.f32 %v3720_v51, 0.0  ;;  %v3723_v0 = vadd.f32 %v3705_v60, %v3686_v38 }
 0x711   :  { %v3727_v43 = vmax.f32 %v3721_v41, 0.0  ;;  %v3728_v37 = vmax.f32 %v3722_v30, 0.0 }
 0x712   :  { %v3729_v46 = vmax.f32 %v3723_v0, 0.0  ;;  %v3732_v58 = vpack.c.bf16 %v3726_v22, %v3726_v22 }
 0x713   :  { %v3733_v17 = vpack.c.bf16 %v3727_v43, %v3727_v43  ;;  %v3734_v9 = vpack.c.bf16 %v3728_v37, %v3728_v37 }
 0x714   :  { %v3735_v49 = vpack.c.bf16 %v3729_v46, %v3729_v46 }
 0x715   :  { %4154 = vmatprep.mubr.bf16.mxu1 %v3733_v17 }
 0x716   :  { %4155 = vmatmul.mubr.bf16.vlgmr.msra.gmra.mrb[48].mxu1 %v3732_v58  ;;  %v105_v58 = vld [vmem:[#allocation10 + $0x5] ss:$0 sm:$0xff] }
 0x717   :  { %4600 = vmatpush3.bf16.msra.mxu1 %v4986_v47  ;;  %4194 = vmatprep.mubr.bf16.mxu1 %v3735_v49 }
 0x718   :  { %4601 = vmatprep.subr.bf16.mxu1 %v4987_v48 }
 0x71b   :  { %4602 = vmatpush3.bf16.msra.mxu1 %v4988_v5 }
 0x71c   :  { %4603 = vmatprep.subr.bf16.mxu1 %v4989_v50 }
 0x71f   :  { %4604 = vmatpush3.bf16.msra.mxu1 %v4990_v53 }
 0x720   :  { %4605 = vmatprep.subr.bf16.mxu1 %v4991_v54 }
 0x723   :  { %4606 = vmatpush3.bf16.msra.mxu1 %v4992_v55 }
 0x724   :  { %4607 = vmatprep.subr.bf16.mxu1 %v4993_v3 }
 0x727   :  { %4608 = vmatpush3.bf16.msra.mxu1 %v4994_v8 }
 0x728   :  { %4609 = vmatprep.subr.bf16.mxu1 %v4995_v57 }
 0x72b   :  { %4610 = vmatpush3.bf16.msra.mxu1 %v4996_v59  ;;  %v4244_v59 = vand.u32 127, %v937_v11 }
 0x72c   :  { %4611 = vmatprep.subr.bf16.mxu1 %v4997_v21 }
 0x72d   :  { %vm4247_vm0 = vcmp.ge.s32.totalorder %v4244_v59, 64  ;;  %vm4248_vm1 = vcmp.lt.s32.totalorder %v4244_v59, 68  ;;  %vm4245_vm2 = vcmp.lt.s32.totalorder %v4244_v59, 64 }
 0x72e   :  { %vm4249_vm3 = vmand %vm4247_vm0, %vm4248_vm1  ;;  %v4246_v62 = vsel %vm4245_vm2, %v5405_v12, 0.0 }
 0x72f   :  { %4612 = vmatpush3.bf16.msra.mxu1 %v4998_v1  ;;  %v4250_v1 = vsel %vm4249_vm3, %v5408_v35, 0.0 }
 0x730   :  { %4613 = vmatprep.subr.bf16.mxu1 %v4999_v4 }
 0x733   :  { %4614 = vmatpush3.bf16.msra.mxu1 %v5000_v42 }
 0x734   :  { %4621 = vmatprep.subr.bf16.mxu1 %v5001_v15 }
 0x736   :  { %4195 = vmatmul.mubr.bf16.vlgmr.msra.gmra.mrb[52].mxu1 %v3734_v9 }
 0x737   :  { %4622 = vmatpush3.bf16.msra.mxu1 %v5002_v6 }
 0x738   :  { %4623 = vmatprep.subr.bf16.mxu1 %v5003_v13 }
 0x73b   :  { %4624 = vmatpush3.bf16.msra.mxu1 %v5004_v63 }
 0x73c   :  { %4625 = vmatprep.subr.bf16.mxu1 %v5005_v14 }
 0x73f   :  { %4626 = vmatpush3.bf16.msra.mxu1 %v5006_v2 }
 0x740   :  { %4627 = vmatprep.subr.bf16.mxu1 %v5007_v19 }
 0x743   :  { %4628 = vmatpush3.bf16.msra.mxu1 %v5008_v33 }
 0x744   :  { %4629 = vmatprep.subr.bf16.mxu1 %v5009_v20 }
 0x747   :  { %4630 = vmatpush3.bf16.msra.mxu1 %v5010_v24 }
 0x748   :  { %4631 = vmatprep.subr.bf16.mxu1 %v5011_v61 }
 0x74b   :  { %4632 = vmatpush3.bf16.msra.mxu1 %v5012_v28 }
 0x74c   :  { %4633 = vmatprep.subr.bf16.mxu1 %v5013_v29 }
 0x74f   :  { %4634 = vmatpush3.bf16.msra.mxu1 %v5014_v44 }
 0x750   :  { %4635 = vmatprep.subr.bf16.mxu1 %v5015_v25 }
 0x753   :  { %4636 = vmatpush3.bf16.msra.mxu1 %v5016_v31 }
 0x7cb   :  { %v3645_v60 = vpop.f32.mrb[20].mxu0 }
 0x7cc   :  { %v3687_v36 = vmul.f32 %v3672_v39, %v3645_v60  ;;  %v3647_v45 = vpop.f32.mrb[21].mxu0 }
 0x7cd   :  { %v3688_v51 = vmul.f32 %v3676_v32, %v3647_v45  ;;  %v3649_v38 = vpop.f32.mrb[22].mxu0 }
 0x7ce   :  { %v3724_v40 = vadd.f32 %v3709_v34, %v3687_v36  ;;  %v3650_v16 = vpop.f32.mrb[23].mxu0 }
 0x7cf   :  { %v3725_v41 = vadd.f32 %v3713_v52, %v3688_v51 }
 0x7d0   :  { %v3730_v18 = vmax.f32 %v3724_v40, 0.0 }
 0x7d1   :  { %v3731_v22 = vmax.f32 %v3725_v41, 0.0 }
 0x7d2   :  { %v3736_v43 = vpack.c.bf16 %v3730_v18, %v3730_v18 }
 0x7d3   :  { %v3737_v0 = vpack.c.bf16 %v3731_v22, %v3731_v22 }
 0x7d5   :  { %4234 = vmatprep.mubr.bf16.mxu1 %v3737_v0 }
 0x7d6   :  { %4235 = vmatmul.mubr.bf16.vlgmr.msra.gmra.mrb[56].mxu1 %v3736_v43 }
 0x7e9   :  { %v4593_v26 = vpop.f32.mrb[48].mxu1 }
 0x7ea   :  { %v4594_v46 = vpop.f32.mrb[49].mxu1 }
 0x7eb   :  { %v4595_v23 = vadd.f32 %v4594_v46, %v4593_v26  ;;  %v4596_v17 = vpop.f32.mrb[50].mxu1 }
 0x7ec   :  { %v4597_v47 = vpop.f32.mrb[51].mxu1 }
 0x7ed   :  { %v4157_v48 = vadd.f32 %v4595_v23, %v105_v58 }
 0x809   :  { %v4615_v10 = vpop.f32.mrb[52].mxu1 }
 0x80a   :  { %v4616_v27 = vpop.f32.mrb[53].mxu1 }
 0x80b   :  { %v4617_v49 = vadd.f32 %v4616_v27, %v4615_v10  ;;  %v4618_v5 = vpop.f32.mrb[54].mxu1 }
 0x80c   :  { %v4619_v50 = vpop.f32.mrb[55].mxu1 }
 0x80d   :  { %v4197_v53 = vadd.f32 %v4617_v49, %v4157_v48 }
 0x8a9   :  { %v4637_v54 = vpop.f32.mrb[56].mxu1 }
 0x8aa   :  { %v4638_v55 = vpop.f32.mrb[57].mxu1 }
 0x8ab   :  { %v4639_v3 = vadd.f32 %v4638_v55, %v4637_v54  ;;  %v4640_v8 = vpop.f32.mrb[58].mxu1 }
 0x8ac   :  { %v4641_v56 = vpop.f32.mrb[59].mxu1 }
 0x8ad   :  { %v4237_v57 = vadd.f32 %v4639_v3, %v4197_v53 }
 0x8af   :  { %5019 = vtanh.f32 %v4237_v57 }
 0x8b9   :  { %v5020_v7 = vpop.eup %5019 }
 0x8ba   :  { %v4251_v21 = vadd.f32 %v5020_v7, %v4246_v62 }
 0x8bc   :  { %v4252_v30 = vadd.f32 %v4251_v21, %v4250_v1 }
 0x8be   :  { %4253 = vst [vmem:[#allocation11] sm:$0xff] %v4252_v30 }
 0x8bf   :  { %5142 = shalt.err (!%p5139_p2)
}
 0x8c0   :  { %s5143_s8 = scalar_lea.hbm %s5527_s5, 128 }
 0x8c1   :  { %p5144_p3 = scmp.ne.s32.totalorder %s5527_s5, %s5143_s8  ;;  %p5147_p4 = scmp.lt.u32.totalorder %s5143_s8, %s5527_s5 }
 0x8c3   :  { %p5149_p5 = pnand %p5147_p4, %p5144_p3 }
 0x8c5   :  { %5152 = shalt.err (!%p5149_p5)
}
 0x8c6   :  { %4263 = dma.vmem_to_hbm [thread:$0]  %s4261_s30, 128, %s5527_s5, [#allocation4]  }
 0x8c7   :  { %5159 = dma.done.wait [#allocation4], 128  }
 0x8c8   :  { %5160 = vsyncadd [#allocation4], 4294967168 }
 0x8c9   :  { %4267 = vsyncpa [#allocation3], 1 }
 0x8ca   :  { %4268 = vsyncpa [#allocation6], 1 }
 0x8cb   :  { %4269 = vsyncpa [#allocation9], 1 }
 0x8cc   :  { %4270 = vsyncpa [#allocation4], 1 }

</bundles_post_ra>
